<compile_context>
chip_gen: v7x
topology: tpu7x:2x2x1
jax: 0.10.0
libtpu: 0.0.40
codegen_flags: <defaults>
</compile_context>

<pallas_src>
import functools
import math

import jax
import jax.numpy as jnp
from jax import lax
from jax.experimental import pallas as pl
from jax.experimental.pallas import tpu as pltpu

# Build the 9-tap stack in bf16 (halves XLU roll + VPU mask-multiply traffic;
# the v6e/v7x-preferred ordering).  Keep False on v5e (no bf16 VALU path) or if
# the local Mosaic build lacks 16-bit lane rotates; the default f32-taps-then-
# cast-at-the-matmul ordering is the portable / v5e-fast path.
TAPS_IN_BF16 = False


# ---------------------------------------------------------------------------
# in-kernel helpers (activations live as (C, N) slabs, N = Bt*H*W on lanes)
# ---------------------------------------------------------------------------
def _conv3x3(x, w_packed, b, masks, *, W, N, tap_dtype):
    """3x3 same-padding conv on a (Cin, N) slab (Bt images concatenated on lanes).

    w_packed : (Cout, 9*Cin) bf16, tap-major (t = 3*i + j), channels contiguous.
    b        : (Cout, 1) f32.
    masks    : list of 9 (1, N) arrays — 1.0 where tap t's source pixel is inside
               its image (handles zero padding AND image seams in the lane concat).

    One (9*Cin, N) tap stack (XLU rolls + mask multiplies) -> one MXU matmul
    with K = 9*Cin, f32 accumulation.
    """
    xt = x.astype(tap_dtype)
    taps = []
    for t in range(9):
        di, dj = t // 3 - 1, t % 3 - 1
        s = di * W + dj                                    # flat source offset
        shifted = xt if s == 0 else pltpu.roll(xt, shift=(-s) % N, axis=1)
        taps.append(shifted * masks[t].astype(tap_dtype))
    stack = jnp.concatenate(taps, axis=0).astype(jnp.bfloat16)    # (9*Cin, N)
    return jnp.dot(w_packed, stack, preferred_element_type=jnp.float32) + b


def _ca_layer(t, wp_a, bp_a, wp_b, bp_b, w1t, b1, w2, b2, masks, *,
              W, HW, Bt, tap_dtype):
    """CALayer exactly as in the spec: p = conv(relu(conv(t))); y = avgpool(p);
    z = sigmoid(MLP(y)); return t + z*y  (z*y is a per-channel, per-image scalar)."""
    C = t.shape[0]
    N = Bt * HW
    u = jnp.maximum(_conv3x3(t, wp_a, bp_a, masks, W=W, N=N, tap_dtype=tap_dtype), 0.0)
    p = _conv3x3(u, wp_b, bp_b, masks, W=W, N=N, tap_dtype=tap_dtype)
    gate_cols = []
    for i in range(Bt):                      # per-image pool + squeeze/excite MLP
        y = jnp.mean(p[:, i * HW:(i + 1) * HW], axis=1, keepdims=True)       # (C,1)
        h = jnp.maximum(jnp.sum(w1t * y, axis=0, keepdims=True) + b1, 0.0)   # (1,Cr)
        z = jax.nn.sigmoid(jnp.sum(w2 * h, axis=1, keepdims=True) + b2)      # (C,1)
        gate_cols.append(jnp.broadcast_to(z * y, (C, HW)))
    gate = gate_cols[0] if Bt == 1 else jnp.concatenate(gate_cols, axis=1)
    return t + gate


# ---------------------------------------------------------------------------
# the single fused kernel: whole Refine forward for Bt images per grid step
# ---------------------------------------------------------------------------
def _refine_kernel(x_ref, mask_ref, wconv_ref, bconv_ref, wdu1_ref, bdu1_ref,
                   wdu2_ref, bdu2_ref, wlast_ref, blast_ref, out_ref, *,
                   W, HW, Bt):
    tap_dtype = jnp.bfloat16 if TAPS_IN_BF16 else jnp.float32
    N = Bt * HW
    masks = [mask_ref[t] for t in range(9)]         # each (1, N), resident constants
    x = x_ref[0]                                     # (C, N) f32

    # conv_in
    t = _conv3x3(x, wconv_ref[0], bconv_ref[0], masks, W=W, N=N, tap_dtype=tap_dtype)

    # two CALayers
    for i in range(2):
        t = _ca_layer(t,
                      wconv_ref[1 + 2 * i], bconv_ref[1 + 2 * i],
                      wconv_ref[2 + 2 * i], bconv_ref[2 + 2 * i],
                      wdu1_ref[i], bdu1_ref[i], wdu2_ref[i], bdu2_ref[i],
                      masks, W=W, HW=HW, Bt=Bt, tap_dtype=tap_dtype)

    # conv_last
    out_ref[0] = _conv3x3(t, wlast_ref[...], blast_ref[...], masks,
                          W=W, N=N, tap_dtype=tap_dtype).astype(out_ref.dtype)


# ---------------------------------------------------------------------------
# host side: masks, layout packing, wrapper
# ---------------------------------------------------------------------------
def _tap_masks(H, W, Bt):
    """(9, 1, Bt*H*W) f32: 1.0 where tap t's source pixel is in-bounds (per image)."""
    pos = jnp.arange(H * W)
    hh, ww = pos // W, pos % W
    rows = []
    for t in range(9):
        di, dj = t // 3 - 1, t % 3 - 1
        m = (hh + di >= 0) & (hh + di < H) & (ww + dj >= 0) & (ww + dj < W)
        rows.append(m.astype(jnp.float32))
    m = jnp.tile(jnp.stack(rows), (1, Bt))           # repeat per lane segment/image
    return m[:, None, :]


def refine_forward(x, kparams, images_per_step=None):
    """x: (B, C, H, W) float32 (NCHW). Returns (B, Cout, H, W) float32."""
    B, C, H, W = x.shape
    HW = H * W
    Cout = kparams["wlast"].shape[0]

    if images_per_step is None:
        # Keep >=2 grid steps so both v7x TensorCores get work; on single-TC
        # v5e/v6e pass images_per_step=B to fold the whole batch into one step.
        images_per_step = max(1, B // 2)
    Bt = images_per_step
    assert B % Bt == 0, "batch must be divisible by images_per_step"
    G = B // Bt
    N = Bt * HW

    # lane-dense layout: Bt images concatenated along the lane axis per step
    x_slab = x.reshape(G, Bt, C, HW).transpose(0, 2, 1, 3).reshape(G, C, N)
    masks = _tap_masks(H, W, Bt)

    def full(arr):        # whole-array block, constant index_map -> stays resident
        return pl.BlockSpec(arr.shape, lambda g, nd=arr.ndim: (0,) * nd)

    kern = functools.partial(_refine_kernel, W=W, HW=HW, Bt=Bt)
    out = pl.pallas_call(
        kern,
        out_shape=jax.ShapeDtypeStruct((G, Cout, N), jnp.float32),
        grid=(G,),
        in_specs=[
            pl.BlockSpec((1, C, N), lambda g: (g, 0, 0)),   # Bt images per step
            full(masks),              # (9, 1, N)   f32
            full(kparams["wconv"]),   # (5, C, 9C)  bf16 (prepacked)
            full(kparams["bconv"]),   # (5, C, 1)   f32
            full(kparams["wdu1"]),    # (2, C, Cr)  f32
            full(kparams["bdu1"]),    # (2, 1, Cr)  f32
            full(kparams["wdu2"]),    # (2, C, Cr)  f32
            full(kparams["bdu2"]),    # (2, C, 1)   f32
            full(kparams["wlast"]),   # (Cout, 9C)  bf16 (prepacked)
            full(kparams["blast"]),   # (Cout, 1)   f32
        ],
        out_specs=pl.BlockSpec((1, Cout, N), lambda g: (g, 0, 0)),
        compiler_params=pltpu.CompilerParams(
            dimension_semantics=("parallel",),     # shard batch steps across TCs
            vmem_limit_bytes=32 * 1024 * 1024),
    )(x_slab, masks, kparams["wconv"], kparams["bconv"], kparams["wdu1"],
      kparams["bdu1"], kparams["wdu2"], kparams["bdu2"],
      kparams["wlast"], kparams["blast"])

    return out.reshape(G, Cout, Bt, HW).transpose(0, 2, 1, 3).reshape(B, Cout, H, W)


# ---------------------------------------------------------------------------
# parameters: PyTorch-layout init, kernel-layout packing, pure-JAX reference
# ---------------------------------------------------------------------------
def init_refine_params(key, n_feat, out_channels, reduction=4):
    """Deterministic, Conv2d-default-like uniform init, stored in PyTorch layouts."""
    C, Cr = n_feat, n_feat // reduction
    ks = iter(jax.random.split(key, 20))

    def u(shape, fan_in):
        b = 1.0 / math.sqrt(fan_in)
        return jax.random.uniform(next(ks), shape, jnp.float32, -b, b)

    # conv order: [conv_in, CA1.process.0, CA1.process.2, CA2.process.0, CA2.process.2]
    return dict(
        wconv_t=jnp.stack([u((C, C, 3, 3), C * 9) for _ in range(5)]),
        bconv_t=jnp.stack([u((C,), C * 9) for _ in range(5)]),
        wdu1_t=jnp.stack([u((Cr, C), C) for _ in range(2)]),
        bdu1_t=jnp.stack([u((Cr,), C) for _ in range(2)]),
        wdu2_t=jnp.stack([u((C, Cr), Cr) for _ in range(2)]),
        bdu2_t=jnp.stack([u((C,), Cr) for _ in range(2)]),
        wlast_t=u((out_channels, C, 3, 3), C * 9),
        blast_t=u((out_channels,), C * 9),
    )


def pack_refine_params(p):
    """PyTorch layout -> kernel layout: 3x3 weights become (Cout, 9*Cin) bf16,
    tap-major (t = 3*i + j matches cross-correlation taps), channels contiguous."""
    def pack_w(w):                    # (O, I, 3, 3) -> (O, 9I) bf16
        return jnp.transpose(w, (0, 2, 3, 1)).reshape(w.shape[0], -1).astype(jnp.bfloat16)
    return dict(
        wconv=jnp.stack([pack_w(p["wconv_t"][k]) for k in range(5)]),   # (5, C, 9C)
        bconv=p["bconv_t"][..., None],                                  # (5, C, 1)
        wdu1=jnp.transpose(p["wdu1_t"], (0, 2, 1)),                     # (2, C, Cr)
        bdu1=p["bdu1_t"][:, None, :],                                   # (2, 1, Cr)
        wdu2=p["wdu2_t"],                                               # (2, C, Cr)
        bdu2=p["bdu2_t"][..., None],                                    # (2, C, 1)
        wlast=pack_w(p["wlast_t"]),                                     # (Cout, 9C)
        blast=p["blast_t"][:, None],                                    # (Cout, 1)
    )


def refine_reference(x, p):
    """Pure-JAX f32 reference mirroring the PyTorch module (parity check)."""
    def conv3(x, w, b):
        out = lax.conv_general_dilated(x, w, (1, 1), [(1, 1), (1, 1)],
                                       dimension_numbers=("NCHW", "OIHW", "NCHW"),
                                       precision=lax.Precision.HIGHEST)
        return out + b[None, :, None, None]

    def ca(x, i):
        y = conv3(x, p["wconv_t"][1 + 2 * i], p["bconv_t"][1 + 2 * i])
        y = jnp.maximum(y, 0.0)
        y = conv3(y, p["wconv_t"][2 + 2 * i], p["bconv_t"][2 + 2 * i])
        y = jnp.mean(y, axis=(2, 3), keepdims=True)                   # avg_pool -> (B,C,1,1)
        v = y[:, :, 0, 0]
        h = jnp.maximum(v @ p["wdu1_t"][i].T + p["bdu1_t"][i], 0.0)
        z = jax.nn.sigmoid(h @ p["wdu2_t"][i].T + p["bdu2_t"][i])
        return z[:, :, None, None] * y + x                            # spec: gate the pooled y

    t = conv3(x, p["wconv_t"][0], p["bconv_t"][0])
    t = ca(t, 0)
    t = ca(t, 1)
    return conv3(t, p["wlast_t"], p["blast_t"])


# ---------------------------------------------------------------------------
if __name__ == "__main__":
    B, C, H, W = 4, 8, 16, 16          # n_feat = 8, out_channels = 8, reduction = 4
    out_channels = 8

    key = jax.random.PRNGKey(0)
    kx, kp = jax.random.split(key)
    x = jax.random.normal(kx, (B, C, H, W), jnp.float32)      # NCHW (PyTorch convention)
    params = init_refine_params(kp, C, out_channels)
    kparams = pack_refine_params(params)

    # default images_per_step -> Bt = 2, grid = (2,): lane-batched matmuls (N = 512)
    # while still giving both v7x TensorCores one step each.
    fwd = jax.jit(lambda xx: refine_forward(xx, kparams))
    out = fwd(x)
    jax.block_until_ready(out)

    assert out.shape == (B, out_channels, H, W)
    assert bool(jnp.all(jnp.isfinite(out)))

    # parity vs. pure-JAX f32 reference (kernel uses bf16 MXU inputs -> loose tol)
    ref = refine_reference(x, params)
    err = float(jnp.max(jnp.abs(out - ref)))
    scale = max(1.0, float(jnp.max(jnp.abs(ref))))
    assert err <= 5e-2 * scale, f"kernel/reference mismatch: max abs err {err}"

    print("KERNEL_OK")
</pallas_src>

<mosaic_0001>
module attributes {stable_mosaic.version = 11 : i64} {
  func.func @_refine_kernel(%arg0: i32, %arg1: memref<1x8x512xf32, #tpu.memory_space<vmem>>, %arg2: memref<9x1x512xf32, #tpu.memory_space<vmem>>, %arg3: memref<5x8x72xbf16, #tpu.memory_space<vmem>>, %arg4: memref<5x8x1xf32, #tpu.memory_space<vmem>>, %arg5: memref<2x8x2xf32, #tpu.memory_space<vmem>>, %arg6: memref<2x1x2xf32, #tpu.memory_space<vmem>>, %arg7: memref<2x8x2xf32, #tpu.memory_space<vmem>>, %arg8: memref<2x8x1xf32, #tpu.memory_space<vmem>>, %arg9: memref<8x72xbf16, #tpu.memory_space<vmem>>, %arg10: memref<8x1xf32, #tpu.memory_space<vmem>>, %arg11: memref<1x8x512xf32, #tpu.memory_space<vmem>>) attributes {dimension_semantics = [#tpu.dimension_semantics<parallel>], iteration_bounds = array<i64: 2>, scalar_prefetch = 0 : i64, scratch_operands = 0 : i64, tpu.core_type = #tpu.core_type<tc>, window_params = [{transform_indices = @transform_0, window_bounds = array<i64: 1, 8, 512>}, {pipeline_mode = #tpu.pipeline_mode<synchronous>, transform_indices = @transform_1, window_bounds = array<i64: 9, 1, 512>}, {pipeline_mode = #tpu.pipeline_mode<synchronous>, transform_indices = @transform_2, window_bounds = array<i64: 5, 8, 72>}, {pipeline_mode = #tpu.pipeline_mode<synchronous>, transform_indices = @transform_3, window_bounds = array<i64: 5, 8, 1>}, {pipeline_mode = #tpu.pipeline_mode<synchronous>, transform_indices = @transform_4, window_bounds = array<i64: 2, 8, 2>}, {pipeline_mode = #tpu.pipeline_mode<synchronous>, transform_indices = @transform_5, window_bounds = array<i64: 2, 1, 2>}, {pipeline_mode = #tpu.pipeline_mode<synchronous>, transform_indices = @transform_6, window_bounds = array<i64: 2, 8, 2>}, {pipeline_mode = #tpu.pipeline_mode<synchronous>, transform_indices = @transform_7, window_bounds = array<i64: 2, 8, 1>}, {pipeline_mode = #tpu.pipeline_mode<synchronous>, transform_indices = @transform_8, window_bounds = array<i64: 8, 72>}, {pipeline_mode = #tpu.pipeline_mode<synchronous>, transform_indices = @transform_9, window_bounds = array<i64: 8, 1>}, {transform_indices = @transform_10, window_bounds = array<i64: 1, 8, 512>}]} {
    %c0 = arith.constant 0 : index
    %c0_0 = arith.constant 0 : index
    %c0_1 = arith.constant 0 : index
    %0 = vector.load %arg2[%c0, %c0_0, %c0_1] : memref<9x1x512xf32, #tpu.memory_space<vmem>>, vector<1x1x512xf32>
    %1 = vector.shape_cast %0 : vector<1x1x512xf32> to vector<1x512xf32>
    %c1 = arith.constant 1 : index
    %c0_2 = arith.constant 0 : index
    %c0_3 = arith.constant 0 : index
    %2 = vector.load %arg2[%c1, %c0_2, %c0_3] : memref<9x1x512xf32, #tpu.memory_space<vmem>>, vector<1x1x512xf32>
    %3 = vector.shape_cast %2 : vector<1x1x512xf32> to vector<1x512xf32>
    %c2 = arith.constant 2 : index
    %c0_4 = arith.constant 0 : index
    %c0_5 = arith.constant 0 : index
    %4 = vector.load %arg2[%c2, %c0_4, %c0_5] : memref<9x1x512xf32, #tpu.memory_space<vmem>>, vector<1x1x512xf32>
    %5 = vector.shape_cast %4 : vector<1x1x512xf32> to vector<1x512xf32>
    %c3 = arith.constant 3 : index
    %c0_6 = arith.constant 0 : index
    %c0_7 = arith.constant 0 : index
    %6 = vector.load %arg2[%c3, %c0_6, %c0_7] : memref<9x1x512xf32, #tpu.memory_space<vmem>>, vector<1x1x512xf32>
    %7 = vector.shape_cast %6 : vector<1x1x512xf32> to vector<1x512xf32>
    %c4 = arith.constant 4 : index
    %c0_8 = arith.constant 0 : index
    %c0_9 = arith.constant 0 : index
    %8 = vector.load %arg2[%c4, %c0_8, %c0_9] : memref<9x1x512xf32, #tpu.memory_space<vmem>>, vector<1x1x512xf32>
    %9 = vector.shape_cast %8 : vector<1x1x512xf32> to vector<1x512xf32>
    %c5 = arith.constant 5 : index
    %c0_10 = arith.constant 0 : index
    %c0_11 = arith.constant 0 : index
    %10 = vector.load %arg2[%c5, %c0_10, %c0_11] : memref<9x1x512xf32, #tpu.memory_space<vmem>>, vector<1x1x512xf32>
    %11 = vector.shape_cast %10 : vector<1x1x512xf32> to vector<1x512xf32>
    %c6 = arith.constant 6 : index
    %c0_12 = arith.constant 0 : index
    %c0_13 = arith.constant 0 : index
    %12 = vector.load %arg2[%c6, %c0_12, %c0_13] : memref<9x1x512xf32, #tpu.memory_space<vmem>>, vector<1x1x512xf32>
    %13 = vector.shape_cast %12 : vector<1x1x512xf32> to vector<1x512xf32>
    %c7 = arith.constant 7 : index
    %c0_14 = arith.constant 0 : index
    %c0_15 = arith.constant 0 : index
    %14 = vector.load %arg2[%c7, %c0_14, %c0_15] : memref<9x1x512xf32, #tpu.memory_space<vmem>>, vector<1x1x512xf32>
    %15 = vector.shape_cast %14 : vector<1x1x512xf32> to vector<1x512xf32>
    %c8 = arith.constant 8 : index
    %c0_16 = arith.constant 0 : index
    %c0_17 = arith.constant 0 : index
    %16 = vector.load %arg2[%c8, %c0_16, %c0_17] : memref<9x1x512xf32, #tpu.memory_space<vmem>>, vector<1x1x512xf32>
    %17 = vector.shape_cast %16 : vector<1x1x512xf32> to vector<1x512xf32>
    %c0_18 = arith.constant 0 : index
    %c0_19 = arith.constant 0 : index
    %c0_20 = arith.constant 0 : index
    %18 = vector.load %arg1[%c0_18, %c0_19, %c0_20] : memref<1x8x512xf32, #tpu.memory_space<vmem>>, vector<1x8x512xf32>
    %19 = vector.shape_cast %18 : vector<1x8x512xf32> to vector<8x512xf32>
    %c0_21 = arith.constant 0 : index
    %c0_22 = arith.constant 0 : index
    %c0_23 = arith.constant 0 : index
    %20 = vector.load %arg3[%c0_21, %c0_22, %c0_23] : memref<5x8x72xbf16, #tpu.memory_space<vmem>>, vector<1x8x72xbf16>
    %21 = vector.shape_cast %20 : vector<1x8x72xbf16> to vector<8x72xbf16>
    %c0_24 = arith.constant 0 : index
    %c0_25 = arith.constant 0 : index
    %c0_26 = arith.constant 0 : index
    %22 = vector.load %arg4[%c0_24, %c0_25, %c0_26] : memref<5x8x1xf32, #tpu.memory_space<vmem>>, vector<1x8x1xf32>
    %23 = vector.shape_cast %22 : vector<1x8x1xf32> to vector<8x1xf32>
    %c17_i32 = arith.constant 17 : i32
    %24 = tpu.dynamic_rotate %19 by %c17_i32 dim 1 : vector<8x512xf32>, i32 -> vector<8x512xf32>
    %25 = vector.broadcast %1 : vector<1x512xf32> to vector<8x512xf32>
    %26 = arith.mulf %24, %25 : vector<8x512xf32>
    %c16_i32 = arith.constant 16 : i32
    %27 = tpu.dynamic_rotate %19 by %c16_i32 dim 1 : vector<8x512xf32>, i32 -> vector<8x512xf32>
    %28 = vector.broadcast %3 : vector<1x512xf32> to vector<8x512xf32>
    %29 = arith.mulf %27, %28 : vector<8x512xf32>
    %c15_i32 = arith.constant 15 : i32
    %30 = tpu.dynamic_rotate %19 by %c15_i32 dim 1 : vector<8x512xf32>, i32 -> vector<8x512xf32>
    %31 = vector.broadcast %5 : vector<1x512xf32> to vector<8x512xf32>
    %32 = arith.mulf %30, %31 : vector<8x512xf32>
    %c1_i32 = arith.constant 1 : i32
    %33 = tpu.dynamic_rotate %19 by %c1_i32 dim 1 : vector<8x512xf32>, i32 -> vector<8x512xf32>
    %34 = vector.broadcast %7 : vector<1x512xf32> to vector<8x512xf32>
    %35 = arith.mulf %33, %34 : vector<8x512xf32>
    %36 = vector.broadcast %9 : vector<1x512xf32> to vector<8x512xf32>
    %37 = arith.mulf %19, %36 : vector<8x512xf32>
    %c511_i32 = arith.constant 511 : i32
    %38 = tpu.dynamic_rotate %19 by %c511_i32 dim 1 : vector<8x512xf32>, i32 -> vector<8x512xf32>
    %39 = vector.broadcast %11 : vector<1x512xf32> to vector<8x512xf32>
    %40 = arith.mulf %38, %39 : vector<8x512xf32>
    %c497_i32 = arith.constant 497 : i32
    %41 = tpu.dynamic_rotate %19 by %c497_i32 dim 1 : vector<8x512xf32>, i32 -> vector<8x512xf32>
    %42 = vector.broadcast %13 : vector<1x512xf32> to vector<8x512xf32>
    %43 = arith.mulf %41, %42 : vector<8x512xf32>
    %c496_i32 = arith.constant 496 : i32
    %44 = tpu.dynamic_rotate %19 by %c496_i32 dim 1 : vector<8x512xf32>, i32 -> vector<8x512xf32>
    %45 = vector.broadcast %15 : vector<1x512xf32> to vector<8x512xf32>
    %46 = arith.mulf %44, %45 : vector<8x512xf32>
    %c495_i32 = arith.constant 495 : i32
    %47 = tpu.dynamic_rotate %19 by %c495_i32 dim 1 : vector<8x512xf32>, i32 -> vector<8x512xf32>
    %48 = vector.broadcast %17 : vector<1x512xf32> to vector<8x512xf32>
    %49 = arith.mulf %47, %48 : vector<8x512xf32>
    %50 = tpu.concatenate %26, %29, %32, %35, %37, %40, %43, %46, %49 in 0 : vector<8x512xf32>, vector<8x512xf32>, vector<8x512xf32>, vector<8x512xf32>, vector<8x512xf32>, vector<8x512xf32>, vector<8x512xf32>, vector<8x512xf32>, vector<8x512xf32> -> vector<72x512xf32>
    %51 = arith.truncf %50 : vector<72x512xf32> to vector<72x512xbf16>
    %cst = arith.constant dense<0.000000e+00> : vector<8x512xf32>
    %52 = tpu.matmul %21, %51, %cst {dimension_numbers = #tpu.dot_dimension_numbers<[1], [0], [0], [1], [0, 0, 1, 1], [], []>} : vector<8x72xbf16>, vector<72x512xbf16>, vector<8x512xf32> -> vector<8x512xf32>
    %53 = vector.broadcast %23 : vector<8x1xf32> to vector<8x512xf32>
    %54 = arith.addf %52, %53 : vector<8x512xf32>
    %c1_27 = arith.constant 1 : index
    %c0_28 = arith.constant 0 : index
    %c0_29 = arith.constant 0 : index
    %55 = vector.load %arg3[%c1_27, %c0_28, %c0_29] : memref<5x8x72xbf16, #tpu.memory_space<vmem>>, vector<1x8x72xbf16>
    %56 = vector.shape_cast %55 : vector<1x8x72xbf16> to vector<8x72xbf16>
    %c1_30 = arith.constant 1 : index
    %c0_31 = arith.constant 0 : index
    %c0_32 = arith.constant 0 : index
    %57 = vector.load %arg4[%c1_30, %c0_31, %c0_32] : memref<5x8x1xf32, #tpu.memory_space<vmem>>, vector<1x8x1xf32>
    %58 = vector.shape_cast %57 : vector<1x8x1xf32> to vector<8x1xf32>
    %c2_33 = arith.constant 2 : index
    %c0_34 = arith.constant 0 : index
    %c0_35 = arith.constant 0 : index
    %59 = vector.load %arg3[%c2_33, %c0_34, %c0_35] : memref<5x8x72xbf16, #tpu.memory_space<vmem>>, vector<1x8x72xbf16>
    %60 = vector.shape_cast %59 : vector<1x8x72xbf16> to vector<8x72xbf16>
    %c2_36 = arith.constant 2 : index
    %c0_37 = arith.constant 0 : index
    %c0_38 = arith.constant 0 : index
    %61 = vector.load %arg4[%c2_36, %c0_37, %c0_38] : memref<5x8x1xf32, #tpu.memory_space<vmem>>, vector<1x8x1xf32>
    %62 = vector.shape_cast %61 : vector<1x8x1xf32> to vector<8x1xf32>
    %c0_39 = arith.constant 0 : index
    %c0_40 = arith.constant 0 : index
    %c0_41 = arith.constant 0 : index
    %63 = vector.load %arg5[%c0_39, %c0_40, %c0_41] : memref<2x8x2xf32, #tpu.memory_space<vmem>>, vector<1x8x2xf32>
    %64 = vector.shape_cast %63 : vector<1x8x2xf32> to vector<8x2xf32>
    %c0_42 = arith.constant 0 : index
    %c0_43 = arith.constant 0 : index
    %c0_44 = arith.constant 0 : index
    %65 = vector.load %arg6[%c0_42, %c0_43, %c0_44] : memref<2x1x2xf32, #tpu.memory_space<vmem>>, vector<1x1x2xf32>
    %66 = vector.shape_cast %65 : vector<1x1x2xf32> to vector<1x2xf32>
    %c0_45 = arith.constant 0 : index
    %c0_46 = arith.constant 0 : index
    %c0_47 = arith.constant 0 : index
    %67 = vector.load %arg7[%c0_45, %c0_46, %c0_47] : memref<2x8x2xf32, #tpu.memory_space<vmem>>, vector<1x8x2xf32>
    %68 = vector.shape_cast %67 : vector<1x8x2xf32> to vector<8x2xf32>
    %c0_48 = arith.constant 0 : index
    %c0_49 = arith.constant 0 : index
    %c0_50 = arith.constant 0 : index
    %69 = vector.load %arg8[%c0_48, %c0_49, %c0_50] : memref<2x8x1xf32, #tpu.memory_space<vmem>>, vector<1x8x1xf32>
    %70 = vector.shape_cast %69 : vector<1x8x1xf32> to vector<8x1xf32>
    %c17_i32_51 = arith.constant 17 : i32
    %71 = tpu.dynamic_rotate %54 by %c17_i32_51 dim 1 : vector<8x512xf32>, i32 -> vector<8x512xf32>
    %72 = vector.broadcast %1 : vector<1x512xf32> to vector<8x512xf32>
    %73 = arith.mulf %71, %72 : vector<8x512xf32>
    %c16_i32_52 = arith.constant 16 : i32
    %74 = tpu.dynamic_rotate %54 by %c16_i32_52 dim 1 : vector<8x512xf32>, i32 -> vector<8x512xf32>
    %75 = vector.broadcast %3 : vector<1x512xf32> to vector<8x512xf32>
    %76 = arith.mulf %74, %75 : vector<8x512xf32>
    %c15_i32_53 = arith.constant 15 : i32
    %77 = tpu.dynamic_rotate %54 by %c15_i32_53 dim 1 : vector<8x512xf32>, i32 -> vector<8x512xf32>
    %78 = vector.broadcast %5 : vector<1x512xf32> to vector<8x512xf32>
    %79 = arith.mulf %77, %78 : vector<8x512xf32>
    %c1_i32_54 = arith.constant 1 : i32
    %80 = tpu.dynamic_rotate %54 by %c1_i32_54 dim 1 : vector<8x512xf32>, i32 -> vector<8x512xf32>
    %81 = vector.broadcast %7 : vector<1x512xf32> to vector<8x512xf32>
    %82 = arith.mulf %80, %81 : vector<8x512xf32>
    %83 = vector.broadcast %9 : vector<1x512xf32> to vector<8x512xf32>
    %84 = arith.mulf %54, %83 : vector<8x512xf32>
    %c511_i32_55 = arith.constant 511 : i32
    %85 = tpu.dynamic_rotate %54 by %c511_i32_55 dim 1 : vector<8x512xf32>, i32 -> vector<8x512xf32>
    %86 = vector.broadcast %11 : vector<1x512xf32> to vector<8x512xf32>
    %87 = arith.mulf %85, %86 : vector<8x512xf32>
    %c497_i32_56 = arith.constant 497 : i32
    %88 = tpu.dynamic_rotate %54 by %c497_i32_56 dim 1 : vector<8x512xf32>, i32 -> vector<8x512xf32>
    %89 = vector.broadcast %13 : vector<1x512xf32> to vector<8x512xf32>
    %90 = arith.mulf %88, %89 : vector<8x512xf32>
    %c496_i32_57 = arith.constant 496 : i32
    %91 = tpu.dynamic_rotate %54 by %c496_i32_57 dim 1 : vector<8x512xf32>, i32 -> vector<8x512xf32>
    %92 = vector.broadcast %15 : vector<1x512xf32> to vector<8x512xf32>
    %93 = arith.mulf %91, %92 : vector<8x512xf32>
    %c495_i32_58 = arith.constant 495 : i32
    %94 = tpu.dynamic_rotate %54 by %c495_i32_58 dim 1 : vector<8x512xf32>, i32 -> vector<8x512xf32>
    %95 = vector.broadcast %17 : vector<1x512xf32> to vector<8x512xf32>
    %96 = arith.mulf %94, %95 : vector<8x512xf32>
    %97 = tpu.concatenate %73, %76, %79, %82, %84, %87, %90, %93, %96 in 0 : vector<8x512xf32>, vector<8x512xf32>, vector<8x512xf32>, vector<8x512xf32>, vector<8x512xf32>, vector<8x512xf32>, vector<8x512xf32>, vector<8x512xf32>, vector<8x512xf32> -> vector<72x512xf32>
    %98 = arith.truncf %97 : vector<72x512xf32> to vector<72x512xbf16>
    %cst_59 = arith.constant dense<0.000000e+00> : vector<8x512xf32>
    %99 = tpu.matmul %56, %98, %cst_59 {dimension_numbers = #tpu.dot_dimension_numbers<[1], [0], [0], [1], [0, 0, 1, 1], [], []>} : vector<8x72xbf16>, vector<72x512xbf16>, vector<8x512xf32> -> vector<8x512xf32>
    %100 = vector.broadcast %58 : vector<8x1xf32> to vector<8x512xf32>
    %101 = arith.addf %99, %100 : vector<8x512xf32>
    %cst_60 = arith.constant 0.000000e+00 : f32
    %102 = vector.broadcast %cst_60 : f32 to vector<8x512xf32>
    %103 = arith.maximumf %101, %102 : vector<8x512xf32>
    %c17_i32_61 = arith.constant 17 : i32
    %104 = tpu.dynamic_rotate %103 by %c17_i32_61 dim 1 : vector<8x512xf32>, i32 -> vector<8x512xf32>
    %105 = vector.broadcast %1 : vector<1x512xf32> to vector<8x512xf32>
    %106 = arith.mulf %104, %105 : vector<8x512xf32>
    %c16_i32_62 = arith.constant 16 : i32
    %107 = tpu.dynamic_rotate %103 by %c16_i32_62 dim 1 : vector<8x512xf32>, i32 -> vector<8x512xf32>
    %108 = vector.broadcast %3 : vector<1x512xf32> to vector<8x512xf32>
    %109 = arith.mulf %107, %108 : vector<8x512xf32>
    %c15_i32_63 = arith.constant 15 : i32
    %110 = tpu.dynamic_rotate %103 by %c15_i32_63 dim 1 : vector<8x512xf32>, i32 -> vector<8x512xf32>
    %111 = vector.broadcast %5 : vector<1x512xf32> to vector<8x512xf32>
    %112 = arith.mulf %110, %111 : vector<8x512xf32>
    %c1_i32_64 = arith.constant 1 : i32
    %113 = tpu.dynamic_rotate %103 by %c1_i32_64 dim 1 : vector<8x512xf32>, i32 -> vector<8x512xf32>
    %114 = vector.broadcast %7 : vector<1x512xf32> to vector<8x512xf32>
    %115 = arith.mulf %113, %114 : vector<8x512xf32>
    %116 = vector.broadcast %9 : vector<1x512xf32> to vector<8x512xf32>
    %117 = arith.mulf %103, %116 : vector<8x512xf32>
    %c511_i32_65 = arith.constant 511 : i32
    %118 = tpu.dynamic_rotate %103 by %c511_i32_65 dim 1 : vector<8x512xf32>, i32 -> vector<8x512xf32>
    %119 = vector.broadcast %11 : vector<1x512xf32> to vector<8x512xf32>
    %120 = arith.mulf %118, %119 : vector<8x512xf32>
    %c497_i32_66 = arith.constant 497 : i32
    %121 = tpu.dynamic_rotate %103 by %c497_i32_66 dim 1 : vector<8x512xf32>, i32 -> vector<8x512xf32>
    %122 = vector.broadcast %13 : vector<1x512xf32> to vector<8x512xf32>
    %123 = arith.mulf %121, %122 : vector<8x512xf32>
    %c496_i32_67 = arith.constant 496 : i32
    %124 = tpu.dynamic_rotate %103 by %c496_i32_67 dim 1 : vector<8x512xf32>, i32 -> vector<8x512xf32>
    %125 = vector.broadcast %15 : vector<1x512xf32> to vector<8x512xf32>
    %126 = arith.mulf %124, %125 : vector<8x512xf32>
    %c495_i32_68 = arith.constant 495 : i32
    %127 = tpu.dynamic_rotate %103 by %c495_i32_68 dim 1 : vector<8x512xf32>, i32 -> vector<8x512xf32>
    %128 = vector.broadcast %17 : vector<1x512xf32> to vector<8x512xf32>
    %129 = arith.mulf %127, %128 : vector<8x512xf32>
    %130 = tpu.concatenate %106, %109, %112, %115, %117, %120, %123, %126, %129 in 0 : vector<8x512xf32>, vector<8x512xf32>, vector<8x512xf32>, vector<8x512xf32>, vector<8x512xf32>, vector<8x512xf32>, vector<8x512xf32>, vector<8x512xf32>, vector<8x512xf32> -> vector<72x512xf32>
    %131 = arith.truncf %130 : vector<72x512xf32> to vector<72x512xbf16>
    %cst_69 = arith.constant dense<0.000000e+00> : vector<8x512xf32>
    %132 = tpu.matmul %60, %131, %cst_69 {dimension_numbers = #tpu.dot_dimension_numbers<[1], [0], [0], [1], [0, 0, 1, 1], [], []>} : vector<8x72xbf16>, vector<72x512xbf16>, vector<8x512xf32> -> vector<8x512xf32>
    %133 = vector.broadcast %62 : vector<8x1xf32> to vector<8x512xf32>
    %134 = arith.addf %132, %133 : vector<8x512xf32>
    %135 = vector.extract_strided_slice %134 {offsets = [0, 0], sizes = [8, 256], strides = [1, 1]} : vector<8x512xf32> to vector<8x256xf32>
    %cst_70 = arith.constant dense<0.000000e+00> : vector<8xf32>
    %136 = vector.multi_reduction <add>, %135, %cst_70 [1] : vector<8x256xf32> to vector<8xf32>
    %137 = vector.shape_cast %136 : vector<8xf32> to vector<8x1xf32>
    %cst_71 = arith.constant 2.560000e+02 : f32
    %138 = vector.broadcast %cst_71 : f32 to vector<8x1xf32>
    %139 = arith.divf %137, %138 : vector<8x1xf32>
    %140 = vector.broadcast %139 : vector<8x1xf32> to vector<8x2xf32>
    %141 = arith.mulf %64, %140 : vector<8x2xf32>
    %cst_72 = arith.constant dense<0.000000e+00> : vector<2xf32>
    %142 = vector.multi_reduction <add>, %141, %cst_72 [0] : vector<8x2xf32> to vector<2xf32>
    %143 = vector.shape_cast %142 : vector<2xf32> to vector<1x2xf32>
    %144 = arith.addf %143, %66 : vector<1x2xf32>
    %cst_73 = arith.constant 0.000000e+00 : f32
    %145 = vector.broadcast %cst_73 : f32 to vector<1x2xf32>
    %146 = arith.maximumf %144, %145 : vector<1x2xf32>
    %147 = vector.broadcast %146 : vector<1x2xf32> to vector<8x2xf32>
    %148 = arith.mulf %68, %147 : vector<8x2xf32>
    %cst_74 = arith.constant dense<0.000000e+00> : vector<8xf32>
    %149 = vector.multi_reduction <add>, %148, %cst_74 [1] : vector<8x2xf32> to vector<8xf32>
    %150 = vector.shape_cast %149 : vector<8xf32> to vector<8x1xf32>
    %151 = arith.addf %150, %70 : vector<8x1xf32>
    %152 = arith.negf %151 : vector<8x1xf32>
    %153 = math.exp %152 : vector<8x1xf32>
    %cst_75 = arith.constant 1.000000e+00 : f32
    %154 = vector.broadcast %cst_75 : f32 to vector<8x1xf32>
    %155 = arith.addf %154, %153 : vector<8x1xf32>
    %156 = arith.divf %154, %155 : vector<8x1xf32>
    %157 = arith.mulf %156, %139 : vector<8x1xf32>
    %158 = vector.shape_cast %157 : vector<8x1xf32> to vector<8x1xf32>
    %159 = vector.broadcast %158 : vector<8x1xf32> to vector<8x256xf32>
    %160 = vector.extract_strided_slice %134 {offsets = [0, 256], sizes = [8, 256], strides = [1, 1]} : vector<8x512xf32> to vector<8x256xf32>
    %cst_76 = arith.constant dense<0.000000e+00> : vector<8xf32>
    %161 = vector.multi_reduction <add>, %160, %cst_76 [1] : vector<8x256xf32> to vector<8xf32>
    %162 = vector.shape_cast %161 : vector<8xf32> to vector<8x1xf32>
    %cst_77 = arith.constant 2.560000e+02 : f32
    %163 = vector.broadcast %cst_77 : f32 to vector<8x1xf32>
    %164 = arith.divf %162, %163 : vector<8x1xf32>
    %165 = vector.broadcast %164 : vector<8x1xf32> to vector<8x2xf32>
    %166 = arith.mulf %64, %165 : vector<8x2xf32>
    %cst_78 = arith.constant dense<0.000000e+00> : vector<2xf32>
    %167 = vector.multi_reduction <add>, %166, %cst_78 [0] : vector<8x2xf32> to vector<2xf32>
    %168 = vector.shape_cast %167 : vector<2xf32> to vector<1x2xf32>
    %169 = arith.addf %168, %66 : vector<1x2xf32>
    %cst_79 = arith.constant 0.000000e+00 : f32
    %170 = vector.broadcast %cst_79 : f32 to vector<1x2xf32>
    %171 = arith.maximumf %169, %170 : vector<1x2xf32>
    %172 = vector.broadcast %171 : vector<1x2xf32> to vector<8x2xf32>
    %173 = arith.mulf %68, %172 : vector<8x2xf32>
    %cst_80 = arith.constant dense<0.000000e+00> : vector<8xf32>
    %174 = vector.multi_reduction <add>, %173, %cst_80 [1] : vector<8x2xf32> to vector<8xf32>
    %175 = vector.shape_cast %174 : vector<8xf32> to vector<8x1xf32>
    %176 = arith.addf %175, %70 : vector<8x1xf32>
    %177 = arith.negf %176 : vector<8x1xf32>
    %178 = math.exp %177 : vector<8x1xf32>
    %cst_81 = arith.constant 1.000000e+00 : f32
    %179 = vector.broadcast %cst_81 : f32 to vector<8x1xf32>
    %180 = arith.addf %179, %178 : vector<8x1xf32>
    %181 = arith.divf %179, %180 : vector<8x1xf32>
    %182 = arith.mulf %181, %164 : vector<8x1xf32>
    %183 = vector.shape_cast %182 : vector<8x1xf32> to vector<8x1xf32>
    %184 = vector.broadcast %183 : vector<8x1xf32> to vector<8x256xf32>
    %185 = tpu.concatenate %159, %184 in 1 : vector<8x256xf32>, vector<8x256xf32> -> vector<8x512xf32>
    %186 = arith.addf %54, %185 : vector<8x512xf32>
    %c3_82 = arith.constant 3 : index
    %c0_83 = arith.constant 0 : index
    %c0_84 = arith.constant 0 : index
    %187 = vector.load %arg3[%c3_82, %c0_83, %c0_84] : memref<5x8x72xbf16, #tpu.memory_space<vmem>>, vector<1x8x72xbf16>
    %188 = vector.shape_cast %187 : vector<1x8x72xbf16> to vector<8x72xbf16>
    %c3_85 = arith.constant 3 : index
    %c0_86 = arith.constant 0 : index
    %c0_87 = arith.constant 0 : index
    %189 = vector.load %arg4[%c3_85, %c0_86, %c0_87] : memref<5x8x1xf32, #tpu.memory_space<vmem>>, vector<1x8x1xf32>
    %190 = vector.shape_cast %189 : vector<1x8x1xf32> to vector<8x1xf32>
    %c4_88 = arith.constant 4 : index
    %c0_89 = arith.constant 0 : index
    %c0_90 = arith.constant 0 : index
    %191 = vector.load %arg3[%c4_88, %c0_89, %c0_90] : memref<5x8x72xbf16, #tpu.memory_space<vmem>>, vector<1x8x72xbf16>
    %192 = vector.shape_cast %191 : vector<1x8x72xbf16> to vector<8x72xbf16>
    %c4_91 = arith.constant 4 : index
    %c0_92 = arith.constant 0 : index
    %c0_93 = arith.constant 0 : index
    %193 = vector.load %arg4[%c4_91, %c0_92, %c0_93] : memref<5x8x1xf32, #tpu.memory_space<vmem>>, vector<1x8x1xf32>
    %194 = vector.shape_cast %193 : vector<1x8x1xf32> to vector<8x1xf32>
    %c1_94 = arith.constant 1 : index
    %c0_95 = arith.constant 0 : index
    %c0_96 = arith.constant 0 : index
    %195 = vector.load %arg5[%c1_94, %c0_95, %c0_96] : memref<2x8x2xf32, #tpu.memory_space<vmem>>, vector<1x8x2xf32>
    %196 = vector.shape_cast %195 : vector<1x8x2xf32> to vector<8x2xf32>
    %c1_97 = arith.constant 1 : index
    %c0_98 = arith.constant 0 : index
    %c0_99 = arith.constant 0 : index
    %197 = vector.load %arg6[%c1_97, %c0_98, %c0_99] : memref<2x1x2xf32, #tpu.memory_space<vmem>>, vector<1x1x2xf32>
    %198 = vector.shape_cast %197 : vector<1x1x2xf32> to vector<1x2xf32>
    %c1_100 = arith.constant 1 : index
    %c0_101 = arith.constant 0 : index
    %c0_102 = arith.constant 0 : index
    %199 = vector.load %arg7[%c1_100, %c0_101, %c0_102] : memref<2x8x2xf32, #tpu.memory_space<vmem>>, vector<1x8x2xf32>
    %200 = vector.shape_cast %199 : vector<1x8x2xf32> to vector<8x2xf32>
    %c1_103 = arith.constant 1 : index
    %c0_104 = arith.constant 0 : index
    %c0_105 = arith.constant 0 : index
    %201 = vector.load %arg8[%c1_103, %c0_104, %c0_105] : memref<2x8x1xf32, #tpu.memory_space<vmem>>, vector<1x8x1xf32>
    %202 = vector.shape_cast %201 : vector<1x8x1xf32> to vector<8x1xf32>
    %c17_i32_106 = arith.constant 17 : i32
    %203 = tpu.dynamic_rotate %186 by %c17_i32_106 dim 1 : vector<8x512xf32>, i32 -> vector<8x512xf32>
    %204 = vector.broadcast %1 : vector<1x512xf32> to vector<8x512xf32>
    %205 = arith.mulf %203, %204 : vector<8x512xf32>
    %c16_i32_107 = arith.constant 16 : i32
    %206 = tpu.dynamic_rotate %186 by %c16_i32_107 dim 1 : vector<8x512xf32>, i32 -> vector<8x512xf32>
    %207 = vector.broadcast %3 : vector<1x512xf32> to vector<8x512xf32>
    %208 = arith.mulf %206, %207 : vector<8x512xf32>
    %c15_i32_108 = arith.constant 15 : i32
    %209 = tpu.dynamic_rotate %186 by %c15_i32_108 dim 1 : vector<8x512xf32>, i32 -> vector<8x512xf32>
    %210 = vector.broadcast %5 : vector<1x512xf32> to vector<8x512xf32>
    %211 = arith.mulf %209, %210 : vector<8x512xf32>
    %c1_i32_109 = arith.constant 1 : i32
    %212 = tpu.dynamic_rotate %186 by %c1_i32_109 dim 1 : vector<8x512xf32>, i32 -> vector<8x512xf32>
    %213 = vector.broadcast %7 : vector<1x512xf32> to vector<8x512xf32>
    %214 = arith.mulf %212, %213 : vector<8x512xf32>
    %215 = vector.broadcast %9 : vector<1x512xf32> to vector<8x512xf32>
    %216 = arith.mulf %186, %215 : vector<8x512xf32>
    %c511_i32_110 = arith.constant 511 : i32
    %217 = tpu.dynamic_rotate %186 by %c511_i32_110 dim 1 : vector<8x512xf32>, i32 -> vector<8x512xf32>
    %218 = vector.broadcast %11 : vector<1x512xf32> to vector<8x512xf32>
    %219 = arith.mulf %217, %218 : vector<8x512xf32>
    %c497_i32_111 = arith.constant 497 : i32
    %220 = tpu.dynamic_rotate %186 by %c497_i32_111 dim 1 : vector<8x512xf32>, i32 -> vector<8x512xf32>
    %221 = vector.broadcast %13 : vector<1x512xf32> to vector<8x512xf32>
    %222 = arith.mulf %220, %221 : vector<8x512xf32>
    %c496_i32_112 = arith.constant 496 : i32
    %223 = tpu.dynamic_rotate %186 by %c496_i32_112 dim 1 : vector<8x512xf32>, i32 -> vector<8x512xf32>
    %224 = vector.broadcast %15 : vector<1x512xf32> to vector<8x512xf32>
    %225 = arith.mulf %223, %224 : vector<8x512xf32>
    %c495_i32_113 = arith.constant 495 : i32
    %226 = tpu.dynamic_rotate %186 by %c495_i32_113 dim 1 : vector<8x512xf32>, i32 -> vector<8x512xf32>
    %227 = vector.broadcast %17 : vector<1x512xf32> to vector<8x512xf32>
    %228 = arith.mulf %226, %227 : vector<8x512xf32>
    %229 = tpu.concatenate %205, %208, %211, %214, %216, %219, %222, %225, %228 in 0 : vector<8x512xf32>, vector<8x512xf32>, vector<8x512xf32>, vector<8x512xf32>, vector<8x512xf32>, vector<8x512xf32>, vector<8x512xf32>, vector<8x512xf32>, vector<8x512xf32> -> vector<72x512xf32>
    %230 = arith.truncf %229 : vector<72x512xf32> to vector<72x512xbf16>
    %cst_114 = arith.constant dense<0.000000e+00> : vector<8x512xf32>
    %231 = tpu.matmul %188, %230, %cst_114 {dimension_numbers = #tpu.dot_dimension_numbers<[1], [0], [0], [1], [0, 0, 1, 1], [], []>} : vector<8x72xbf16>, vector<72x512xbf16>, vector<8x512xf32> -> vector<8x512xf32>
    %232 = vector.broadcast %190 : vector<8x1xf32> to vector<8x512xf32>
    %233 = arith.addf %231, %232 : vector<8x512xf32>
    %cst_115 = arith.constant 0.000000e+00 : f32
    %234 = vector.broadcast %cst_115 : f32 to vector<8x512xf32>
    %235 = arith.maximumf %233, %234 : vector<8x512xf32>
    %c17_i32_116 = arith.constant 17 : i32
    %236 = tpu.dynamic_rotate %235 by %c17_i32_116 dim 1 : vector<8x512xf32>, i32 -> vector<8x512xf32>
    %237 = vector.broadcast %1 : vector<1x512xf32> to vector<8x512xf32>
    %238 = arith.mulf %236, %237 : vector<8x512xf32>
    %c16_i32_117 = arith.constant 16 : i32
    %239 = tpu.dynamic_rotate %235 by %c16_i32_117 dim 1 : vector<8x512xf32>, i32 -> vector<8x512xf32>
    %240 = vector.broadcast %3 : vector<1x512xf32> to vector<8x512xf32>
    %241 = arith.mulf %239, %240 : vector<8x512xf32>
    %c15_i32_118 = arith.constant 15 : i32
    %242 = tpu.dynamic_rotate %235 by %c15_i32_118 dim 1 : vector<8x512xf32>, i32 -> vector<8x512xf32>
    %243 = vector.broadcast %5 : vector<1x512xf32> to vector<8x512xf32>
    %244 = arith.mulf %242, %243 : vector<8x512xf32>
    %c1_i32_119 = arith.constant 1 : i32
    %245 = tpu.dynamic_rotate %235 by %c1_i32_119 dim 1 : vector<8x512xf32>, i32 -> vector<8x512xf32>
    %246 = vector.broadcast %7 : vector<1x512xf32> to vector<8x512xf32>
    %247 = arith.mulf %245, %246 : vector<8x512xf32>
    %248 = vector.broadcast %9 : vector<1x512xf32> to vector<8x512xf32>
    %249 = arith.mulf %235, %248 : vector<8x512xf32>
    %c511_i32_120 = arith.constant 511 : i32
    %250 = tpu.dynamic_rotate %235 by %c511_i32_120 dim 1 : vector<8x512xf32>, i32 -> vector<8x512xf32>
    %251 = vector.broadcast %11 : vector<1x512xf32> to vector<8x512xf32>
    %252 = arith.mulf %250, %251 : vector<8x512xf32>
    %c497_i32_121 = arith.constant 497 : i32
    %253 = tpu.dynamic_rotate %235 by %c497_i32_121 dim 1 : vector<8x512xf32>, i32 -> vector<8x512xf32>
    %254 = vector.broadcast %13 : vector<1x512xf32> to vector<8x512xf32>
    %255 = arith.mulf %253, %254 : vector<8x512xf32>
    %c496_i32_122 = arith.constant 496 : i32
    %256 = tpu.dynamic_rotate %235 by %c496_i32_122 dim 1 : vector<8x512xf32>, i32 -> vector<8x512xf32>
    %257 = vector.broadcast %15 : vector<1x512xf32> to vector<8x512xf32>
    %258 = arith.mulf %256, %257 : vector<8x512xf32>
    %c495_i32_123 = arith.constant 495 : i32
    %259 = tpu.dynamic_rotate %235 by %c495_i32_123 dim 1 : vector<8x512xf32>, i32 -> vector<8x512xf32>
    %260 = vector.broadcast %17 : vector<1x512xf32> to vector<8x512xf32>
    %261 = arith.mulf %259, %260 : vector<8x512xf32>
    %262 = tpu.concatenate %238, %241, %244, %247, %249, %252, %255, %258, %261 in 0 : vector<8x512xf32>, vector<8x512xf32>, vector<8x512xf32>, vector<8x512xf32>, vector<8x512xf32>, vector<8x512xf32>, vector<8x512xf32>, vector<8x512xf32>, vector<8x512xf32> -> vector<72x512xf32>
    %263 = arith.truncf %262 : vector<72x512xf32> to vector<72x512xbf16>
    %cst_124 = arith.constant dense<0.000000e+00> : vector<8x512xf32>
    %264 = tpu.matmul %192, %263, %cst_124 {dimension_numbers = #tpu.dot_dimension_numbers<[1], [0], [0], [1], [0, 0, 1, 1], [], []>} : vector<8x72xbf16>, vector<72x512xbf16>, vector<8x512xf32> -> vector<8x512xf32>
    %265 = vector.broadcast %194 : vector<8x1xf32> to vector<8x512xf32>
    %266 = arith.addf %264, %265 : vector<8x512xf32>
    %267 = vector.extract_strided_slice %266 {offsets = [0, 0], sizes = [8, 256], strides = [1, 1]} : vector<8x512xf32> to vector<8x256xf32>
    %cst_125 = arith.constant dense<0.000000e+00> : vector<8xf32>
    %268 = vector.multi_reduction <add>, %267, %cst_125 [1] : vector<8x256xf32> to vector<8xf32>
    %269 = vector.shape_cast %268 : vector<8xf32> to vector<8x1xf32>
    %cst_126 = arith.constant 2.560000e+02 : f32
    %270 = vector.broadcast %cst_126 : f32 to vector<8x1xf32>
    %271 = arith.divf %269, %270 : vector<8x1xf32>
    %272 = vector.broadcast %271 : vector<8x1xf32> to vector<8x2xf32>
    %273 = arith.mulf %196, %272 : vector<8x2xf32>
    %cst_127 = arith.constant dense<0.000000e+00> : vector<2xf32>
    %274 = vector.multi_reduction <add>, %273, %cst_127 [0] : vector<8x2xf32> to vector<2xf32>
    %275 = vector.shape_cast %274 : vector<2xf32> to vector<1x2xf32>
    %276 = arith.addf %275, %198 : vector<1x2xf32>
    %cst_128 = arith.constant 0.000000e+00 : f32
    %277 = vector.broadcast %cst_128 : f32 to vector<1x2xf32>
    %278 = arith.maximumf %276, %277 : vector<1x2xf32>
    %279 = vector.broadcast %278 : vector<1x2xf32> to vector<8x2xf32>
    %280 = arith.mulf %200, %279 : vector<8x2xf32>
    %cst_129 = arith.constant dense<0.000000e+00> : vector<8xf32>
    %281 = vector.multi_reduction <add>, %280, %cst_129 [1] : vector<8x2xf32> to vector<8xf32>
    %282 = vector.shape_cast %281 : vector<8xf32> to vector<8x1xf32>
    %283 = arith.addf %282, %202 : vector<8x1xf32>
    %284 = arith.negf %283 : vector<8x1xf32>
    %285 = math.exp %284 : vector<8x1xf32>
    %cst_130 = arith.constant 1.000000e+00 : f32
    %286 = vector.broadcast %cst_130 : f32 to vector<8x1xf32>
    %287 = arith.addf %286, %285 : vector<8x1xf32>
    %288 = arith.divf %286, %287 : vector<8x1xf32>
    %289 = arith.mulf %288, %271 : vector<8x1xf32>
    %290 = vector.shape_cast %289 : vector<8x1xf32> to vector<8x1xf32>
    %291 = vector.broadcast %290 : vector<8x1xf32> to vector<8x256xf32>
    %292 = vector.extract_strided_slice %266 {offsets = [0, 256], sizes = [8, 256], strides = [1, 1]} : vector<8x512xf32> to vector<8x256xf32>
    %cst_131 = arith.constant dense<0.000000e+00> : vector<8xf32>
    %293 = vector.multi_reduction <add>, %292, %cst_131 [1] : vector<8x256xf32> to vector<8xf32>
    %294 = vector.shape_cast %293 : vector<8xf32> to vector<8x1xf32>
    %cst_132 = arith.constant 2.560000e+02 : f32
    %295 = vector.broadcast %cst_132 : f32 to vector<8x1xf32>
    %296 = arith.divf %294, %295 : vector<8x1xf32>
    %297 = vector.broadcast %296 : vector<8x1xf32> to vector<8x2xf32>
    %298 = arith.mulf %196, %297 : vector<8x2xf32>
    %cst_133 = arith.constant dense<0.000000e+00> : vector<2xf32>
    %299 = vector.multi_reduction <add>, %298, %cst_133 [0] : vector<8x2xf32> to vector<2xf32>
    %300 = vector.shape_cast %299 : vector<2xf32> to vector<1x2xf32>
    %301 = arith.addf %300, %198 : vector<1x2xf32>
    %cst_134 = arith.constant 0.000000e+00 : f32
    %302 = vector.broadcast %cst_134 : f32 to vector<1x2xf32>
    %303 = arith.maximumf %301, %302 : vector<1x2xf32>
    %304 = vector.broadcast %303 : vector<1x2xf32> to vector<8x2xf32>
    %305 = arith.mulf %200, %304 : vector<8x2xf32>
    %cst_135 = arith.constant dense<0.000000e+00> : vector<8xf32>
    %306 = vector.multi_reduction <add>, %305, %cst_135 [1] : vector<8x2xf32> to vector<8xf32>
    %307 = vector.shape_cast %306 : vector<8xf32> to vector<8x1xf32>
    %308 = arith.addf %307, %202 : vector<8x1xf32>
    %309 = arith.negf %308 : vector<8x1xf32>
    %310 = math.exp %309 : vector<8x1xf32>
    %cst_136 = arith.constant 1.000000e+00 : f32
    %311 = vector.broadcast %cst_136 : f32 to vector<8x1xf32>
    %312 = arith.addf %311, %310 : vector<8x1xf32>
    %313 = arith.divf %311, %312 : vector<8x1xf32>
    %314 = arith.mulf %313, %296 : vector<8x1xf32>
    %315 = vector.shape_cast %314 : vector<8x1xf32> to vector<8x1xf32>
    %316 = vector.broadcast %315 : vector<8x1xf32> to vector<8x256xf32>
    %317 = tpu.concatenate %291, %316 in 1 : vector<8x256xf32>, vector<8x256xf32> -> vector<8x512xf32>
    %318 = arith.addf %186, %317 : vector<8x512xf32>
    %c0_137 = arith.constant 0 : index
    %c0_138 = arith.constant 0 : index
    %319 = vector.load %arg9[%c0_137, %c0_138] : memref<8x72xbf16, #tpu.memory_space<vmem>>, vector<8x72xbf16>
    %c0_139 = arith.constant 0 : index
    %c0_140 = arith.constant 0 : index
    %320 = vector.load %arg10[%c0_139, %c0_140] : memref<8x1xf32, #tpu.memory_space<vmem>>, vector<8x1xf32>
    %c17_i32_141 = arith.constant 17 : i32
    %321 = tpu.dynamic_rotate %318 by %c17_i32_141 dim 1 : vector<8x512xf32>, i32 -> vector<8x512xf32>
    %322 = vector.broadcast %1 : vector<1x512xf32> to vector<8x512xf32>
    %323 = arith.mulf %321, %322 : vector<8x512xf32>
    %c16_i32_142 = arith.constant 16 : i32
    %324 = tpu.dynamic_rotate %318 by %c16_i32_142 dim 1 : vector<8x512xf32>, i32 -> vector<8x512xf32>
    %325 = vector.broadcast %3 : vector<1x512xf32> to vector<8x512xf32>
    %326 = arith.mulf %324, %325 : vector<8x512xf32>
    %c15_i32_143 = arith.constant 15 : i32
    %327 = tpu.dynamic_rotate %318 by %c15_i32_143 dim 1 : vector<8x512xf32>, i32 -> vector<8x512xf32>
    %328 = vector.broadcast %5 : vector<1x512xf32> to vector<8x512xf32>
    %329 = arith.mulf %327, %328 : vector<8x512xf32>
    %c1_i32_144 = arith.constant 1 : i32
    %330 = tpu.dynamic_rotate %318 by %c1_i32_144 dim 1 : vector<8x512xf32>, i32 -> vector<8x512xf32>
    %331 = vector.broadcast %7 : vector<1x512xf32> to vector<8x512xf32>
    %332 = arith.mulf %330, %331 : vector<8x512xf32>
    %333 = vector.broadcast %9 : vector<1x512xf32> to vector<8x512xf32>
    %334 = arith.mulf %318, %333 : vector<8x512xf32>
    %c511_i32_145 = arith.constant 511 : i32
    %335 = tpu.dynamic_rotate %318 by %c511_i32_145 dim 1 : vector<8x512xf32>, i32 -> vector<8x512xf32>
    %336 = vector.broadcast %11 : vector<1x512xf32> to vector<8x512xf32>
    %337 = arith.mulf %335, %336 : vector<8x512xf32>
    %c497_i32_146 = arith.constant 497 : i32
    %338 = tpu.dynamic_rotate %318 by %c497_i32_146 dim 1 : vector<8x512xf32>, i32 -> vector<8x512xf32>
    %339 = vector.broadcast %13 : vector<1x512xf32> to vector<8x512xf32>
    %340 = arith.mulf %338, %339 : vector<8x512xf32>
    %c496_i32_147 = arith.constant 496 : i32
    %341 = tpu.dynamic_rotate %318 by %c496_i32_147 dim 1 : vector<8x512xf32>, i32 -> vector<8x512xf32>
    %342 = vector.broadcast %15 : vector<1x512xf32> to vector<8x512xf32>
    %343 = arith.mulf %341, %342 : vector<8x512xf32>
    %c495_i32_148 = arith.constant 495 : i32
    %344 = tpu.dynamic_rotate %318 by %c495_i32_148 dim 1 : vector<8x512xf32>, i32 -> vector<8x512xf32>
    %345 = vector.broadcast %17 : vector<1x512xf32> to vector<8x512xf32>
    %346 = arith.mulf %344, %345 : vector<8x512xf32>
    %347 = tpu.concatenate %323, %326, %329, %332, %334, %337, %340, %343, %346 in 0 : vector<8x512xf32>, vector<8x512xf32>, vector<8x512xf32>, vector<8x512xf32>, vector<8x512xf32>, vector<8x512xf32>, vector<8x512xf32>, vector<8x512xf32>, vector<8x512xf32> -> vector<72x512xf32>
    %348 = arith.truncf %347 : vector<72x512xf32> to vector<72x512xbf16>
    %cst_149 = arith.constant dense<0.000000e+00> : vector<8x512xf32>
    %349 = tpu.matmul %319, %348, %cst_149 {dimension_numbers = #tpu.dot_dimension_numbers<[1], [0], [0], [1], [0, 0, 1, 1], [], []>} : vector<8x72xbf16>, vector<72x512xbf16>, vector<8x512xf32> -> vector<8x512xf32>
    %350 = vector.broadcast %320 : vector<8x1xf32> to vector<8x512xf32>
    %351 = arith.addf %349, %350 : vector<8x512xf32>
    %c0_150 = arith.constant 0 : index
    %c0_151 = arith.constant 0 : index
    %c0_152 = arith.constant 0 : index
    %352 = vector.load %arg11[%c0_150, %c0_151, %c0_152] : memref<1x8x512xf32, #tpu.memory_space<vmem>>, vector<1x8x512xf32>
    %353 = vector.shape_cast %352 : vector<1x8x512xf32> to vector<8x512xf32>
    %354 = vector.shape_cast %351 : vector<8x512xf32> to vector<1x8x512xf32>
    tpu.vector_store %arg11[%c0_150, %c0_151, %c0_152], %354 {strides = array<i32>} : memref<1x8x512xf32, #tpu.memory_space<vmem>>, vector<1x8x512xf32>,
    return
  }
  func.func @transform_0(%arg0: i32) -> (i32, i32, i32) {
    %c0_i32 = arith.constant 0 : i32
    %c0_i32_0 = arith.constant 0 : i32
    %c0_i32_1 = arith.constant 0 : i32
    return %arg0, %c0_i32, %c0_i32_0 : i32, i32, i32
  }
  func.func @transform_1(%arg0: i32) -> (i32, i32, i32) {
    %c0_i32 = arith.constant 0 : i32
    %c0_i32_0 = arith.constant 0 : i32
    %c0_i32_1 = arith.constant 0 : i32
    %c0_i32_2 = arith.constant 0 : i32
    return %c0_i32, %c0_i32_0, %c0_i32_1 : i32, i32, i32
  }
  func.func @transform_2(%arg0: i32) -> (i32, i32, i32) {
    %c0_i32 = arith.constant 0 : i32
    %c0_i32_0 = arith.constant 0 : i32
    %c0_i32_1 = arith.constant 0 : i32
    %c0_i32_2 = arith.constant 0 : i32
    return %c0_i32, %c0_i32_0, %c0_i32_1 : i32, i32, i32
  }
  func.func @transform_3(%arg0: i32) -> (i32, i32, i32) {
    %c0_i32 = arith.constant 0 : i32
    %c0_i32_0 = arith.constant 0 : i32
    %c0_i32_1 = arith.constant 0 : i32
    %c0_i32_2 = arith.constant 0 : i32
    return %c0_i32, %c0_i32_0, %c0_i32_1 : i32, i32, i32
  }
  func.func @transform_4(%arg0: i32) -> (i32, i32, i32) {
    %c0_i32 = arith.constant 0 : i32
    %c0_i32_0 = arith.constant 0 : i32
    %c0_i32_1 = arith.constant 0 : i32
    %c0_i32_2 = arith.constant 0 : i32
    return %c0_i32, %c0_i32_0, %c0_i32_1 : i32, i32, i32
  }
  func.func @transform_5(%arg0: i32) -> (i32, i32, i32) {
    %c0_i32 = arith.constant 0 : i32
    %c0_i32_0 = arith.constant 0 : i32
    %c0_i32_1 = arith.constant 0 : i32
    %c0_i32_2 = arith.constant 0 : i32
    return %c0_i32, %c0_i32_0, %c0_i32_1 : i32, i32, i32
  }
  func.func @transform_6(%arg0: i32) -> (i32, i32, i32) {
    %c0_i32 = arith.constant 0 : i32
    %c0_i32_0 = arith.constant 0 : i32
    %c0_i32_1 = arith.constant 0 : i32
    %c0_i32_2 = arith.constant 0 : i32
    return %c0_i32, %c0_i32_0, %c0_i32_1 : i32, i32, i32
  }
  func.func @transform_7(%arg0: i32) -> (i32, i32, i32) {
    %c0_i32 = arith.constant 0 : i32
    %c0_i32_0 = arith.constant 0 : i32
    %c0_i32_1 = arith.constant 0 : i32
    %c0_i32_2 = arith.constant 0 : i32
    return %c0_i32, %c0_i32_0, %c0_i32_1 : i32, i32, i32
  }
  func.func @transform_8(%arg0: i32) -> (i32, i32) {
    %c0_i32 = arith.constant 0 : i32
    %c0_i32_0 = arith.constant 0 : i32
    %c0_i32_1 = arith.constant 0 : i32
    return %c0_i32, %c0_i32_0 : i32, i32
  }
  func.func @transform_9(%arg0: i32) -> (i32, i32) {
    %c0_i32 = arith.constant 0 : i32
    %c0_i32_0 = arith.constant 0 : i32
    %c0_i32_1 = arith.constant 0 : i32
    return %c0_i32, %c0_i32_0 : i32, i32
  }
  func.func @transform_10(%arg0: i32) -> (i32, i32, i32) {
    %c0_i32 = arith.constant 0 : i32
    %c0_i32_0 = arith.constant 0 : i32
    %c0_i32_1 = arith.constant 0 : i32
    return %arg0, %c0_i32, %c0_i32_0 : i32, i32, i32
  }
}

</mosaic_0001>

<bundles_post_ra>
// kernel: _lambda_.1
= control target key start
LH: loop header
LB: loop body
LE: loop exit
PB: predicated region body
PF: predicated region fallthrough
CT: control target
= control target key end

     0   :  { %s2524_s13 = smov 0   ;;  %s3887_s0 = inlined_call_operand.vmem [shape: f32[2,8,512], index: 0, kind: input, shape index: {}]   ;;  %s3888_s1 = inlined_call_operand.vmem [shape: f32[9,1,512], index: 1, kind: input, shape index: {}]   ;;  %s3889_s2 = inlined_call_operand.vmem [shape: bf16[5,8,72], index: 2, kind: input, shape index: {}]   ;;  %s3890_s3 = inlined_call_operand.vmem [shape: f32[5,8,1], index: 3, kind: input, shape index: {}]   ;;  %s3891_s4 = inlined_call_operand.vmem [shape: f32[2,8,2], index: 4, kind: input, shape index: {}]   ;;  %s3892_s5 = inlined_call_operand.vmem [shape: f32[2,1,2], index: 5, kind: input, shape index: {}]   ;;  %s3893_s6 = inlined_call_operand.vmem [shape: f32[2,8,2], index: 6, kind: input, shape index: {}]   ;;  %s3894_s7 = inlined_call_operand.vmem [shape: f32[2,8,1], index: 7, kind: input, shape index: {}]   ;;  %s3895_s8 = inlined_call_operand.vmem [shape: bf16[8,72], index: 8, kind: input, shape index: {}]   ;;  %s3896_s9 = inlined_call_operand.vmem [shape: f32[8,1], index: 9, kind: input, shape index: {}]   ;;  %s3897_s10 = inlined_call_operand.vmem [shape: f32[2,8,512], index: 10, kind: output, shape index: {}]  }
   0x1 LB: > { %s2356_s14 = sadd.s32 4294967295, %s2458_s13   ;;  %p2360_p0 = scmp.ge.s32.totalorder %s2458_s13, 1  ;;  %s2458_s13 = sphi %s2524_s13, %s20_s13  }
   0x2   : > { %p312_p1 = scmp.lt.s32.totalorder %s2458_s13, 3 }
   0x4   : > { %p313_p2 = pnand %p2360_p0, %p312_p1 }
   0x6   : > { %316 = sbr.rel (%p313_p2) target bundleno = 3363 (0xd23), region = 60 }
   0xd   : > { %p350_p3 = scmp.lt.s32.totalorder %s2356_s14, 1  ;;  %s2460_s19 = smov 17   ;;  %v3898_v4 = vmov 0   ;;  %v383_v5 = vld [vmem:[%s3890_s3] sm:$0xff]  ;;  %v392_v6 = vlaneseq  ;;  %v2366_v53 = vld [vmem:[%s3888_s1 + $0x8] sm:$0xf] }
   0xe   : > { %s2461_s20 = smov 16   ;;  %s2462_s21 = smov 15   ;;  %789 = vmatprep.mubr.bf16.mxu0 %v3898_v4  ;;  %830 = vmatprep.mubr.bf16.mxu1 %v3898_v4  ;;  %v361_v12 = vld [vmem:[%s3888_s1] sm:$0xf]  ;;  %v2365_v13 = vld [vmem:[%s3888_s1 + $0x4] sm:$0xf] }
   0xf   : > { %s3920_s14 = smov (!%p350_p3, %s2356_s14), 1  ;;  %s2463_s22 = smov 1   ;;  %2434 = vset.pattern.permute.xlu0 %v3898_v4  ;;  %2435 = vset.pattern.permute.xlu1 %v3898_v4  ;;  %v401_v7 = vshrl.u32 %v392_v6, 7  ;;  %v2619_v10 = vand.u32 127, %v392_v6  ;;  %v2367_v54 = vld [vmem:[%s3888_s1 + $0xc] sm:$0xf] }
  0x10   : > { %s2415_s15 = sshll.u32 %s3920_s14, 5  ;;  %s2464_s23 = smov 127   ;;  %vm744_vm8 = vcmask 1043456   ;;  %vm740_vm9 = vcmask 588800   ;;  %vm1369_vm10 = vcmask 15360  }
  0x11   : > { %s354_s18 = scalar_lea.vmem %s3887_s0, %s2415_s15  ;;  %s2465_s24 = smov 113   ;;  %v2621_v11 = vsub.s32 1, %v401_v7  ;;  %vm394_vm0 = vcmp.lt.s32.totalorder %v2619_v10, 17  ;;  %v2630_v16 = vsub.s32 0, %v401_v7  ;;  %v2632_v17 = vsub.s32 3, %v401_v7 }
  0x12   : > { %v2540_v0 = vld [vmem:[%s354_s18 + $0x10] sm:$0xff]  ;;  %v2542_v1 = vld [vmem:[%s354_s18] sm:$0xff]  ;;  %v2548_v2 = vld [vmem:[%s354_s18 + $0x18] sm:$0xff]  ;;  %s2466_s25 = smov 112   ;;  %s2468_s26 = smov 111   ;;  %v2634_v18 = vsub.s32 2, %v401_v7 }
  0x13   : > { %388 = vrot.lane.b32.xlu1 %v2540_v0, %s2460_s19  ;;  %384 = vrot.lane.b32.xlu0 %v2542_v1, %s2460_s19  ;;  %v2550_v3 = vld [vmem:[%s354_s18 + $0x8] sm:$0xff]  ;;  %vm432_vm1 = vcmp.lt.s32.totalorder %v2619_v10, 16  ;;  %v2638_v19 = vrot.slane %v361_v12, %v2621_v11  ;;  %v2641_v20 = vrot.slane %v2365_v13, %v2621_v11  ;;  %v2646_v24 = vrot.slane %v361_v12, %v2630_v16 }
  0x14   : > { %v2649_v25 = vrot.slane %v2365_v13, %v2630_v16  ;;  %v2652_v26 = vrot.slane %v361_v12, %v2632_v17  ;;  %v2659_v29 = vrot.slane %v2365_v13, %v2632_v17  ;;  %v2662_v30 = vrot.slane %v361_v12, %v2634_v18 }
  0x15   : > { %3908 = vst [vmem:[#allocation2_spill] sm:$0xff] %v2641_v20  ;;  %v2669_v34 = vrot.slane %v2365_v13, %v2634_v18  ;;  %vm470_vm2 = vcmp.lt.s32.totalorder %v2619_v10, 15  ;;  %vm508_vm3 = vcmp.lt.s32.totalorder %v2619_v10, 1  ;;  %v2694_v57 = vrot.slane %v2366_v53, %v2621_v11 }
  0x16   : > { %v2697_v58 = vrot.slane %v2367_v54, %v2621_v11  ;;  %v2702_v60 = vrot.slane %v2366_v53, %v2630_v16  ;;  %v2705_v61 = vrot.slane %v2366_v53, %v2634_v18  ;;  %v2708_v62 = vrot.slane %v2366_v53, %v2632_v17 }
  0x17   : > { %390 = vrot.lane.b32.xlu1 %v2548_v2, %s2460_s19  ;;  %386 = vrot.lane.b32.xlu0 %v2550_v3, %s2460_s19  ;;  %3909 = vst [vmem:[#allocation3_spill] sm:$0xff] %v2669_v34  ;;  %vm571_vm4 = vcmp.lt.s32.totalorder %v2619_v10, 127  ;;  %vm647_vm5 = vcmp.lt.s32.totalorder %v2619_v10, 112  ;;  %vm609_vm6 = vcmp.lt.s32.totalorder %v2619_v10, 113  ;;  %vm685_vm7 = vcmp.lt.s32.totalorder %v2619_v10, 111 }
  0x1b   : > { %426 = vrot.lane.b32.xlu1 %v2550_v3, %s2461_s20  ;;  %424 = vrot.lane.b32.xlu0 %v2542_v1, %s2461_s20 }
  0x1f   : > { %430 = vrot.lane.b32.xlu1 %v2548_v2, %s2461_s20  ;;  %428 = vrot.lane.b32.xlu0 %v2540_v0, %s2461_s20 }
  0x23   : > { %464 = vrot.lane.b32.xlu1 %v2550_v3, %s2462_s21  ;;  %462 = vrot.lane.b32.xlu0 %v2542_v1, %s2462_s21 }
  0x27   : > { %468 = vrot.lane.b32.xlu1 %v2548_v2, %s2462_s21  ;;  %466 = vrot.lane.b32.xlu0 %v2540_v0, %s2462_s21 }
  0x2b   : > { %502 = vrot.lane.b32.xlu1 %v2550_v3, %s2463_s22  ;;  %500 = vrot.lane.b32.xlu0 %v2542_v1, %s2463_s22 }
  0x2f   : > { %506 = vrot.lane.b32.xlu1 %v2548_v2, %s2463_s22  ;;  %504 = vrot.lane.b32.xlu0 %v2540_v0, %s2463_s22 }
  0x33   : > { %565 = vrot.lane.b32.xlu1 %v2550_v3, %s2464_s23  ;;  %563 = vrot.lane.b32.xlu0 %v2542_v1, %s2464_s23 }
  0x37   : > { %569 = vrot.lane.b32.xlu1 %v2548_v2, %s2464_s23  ;;  %567 = vrot.lane.b32.xlu0 %v2540_v0, %s2464_s23 }
  0x3b   : > { %603 = vrot.lane.b32.xlu1 %v2550_v3, %s2465_s24  ;;  %601 = vrot.lane.b32.xlu0 %v2542_v1, %s2465_s24 }
  0x3f   : > { %607 = vrot.lane.b32.xlu1 %v2548_v2, %s2465_s24  ;;  %605 = vrot.lane.b32.xlu0 %v2540_v0, %s2465_s24 }
  0x43   : > { %641 = vrot.lane.b32.xlu1 %v2550_v3, %s2466_s25  ;;  %639 = vrot.lane.b32.xlu0 %v2542_v1, %s2466_s25 }
  0x47   : > { %645 = vrot.lane.b32.xlu1 %v2548_v2, %s2466_s25  ;;  %643 = vrot.lane.b32.xlu0 %v2540_v0, %s2466_s25 }
  0x4b   : > { %679 = vrot.lane.b32.xlu1 %v2550_v3, %s2468_s26  ;;  %677 = vrot.lane.b32.xlu0 %v2542_v1, %s2468_s26 }
  0x4f   : > { %683 = vrot.lane.b32.xlu1 %v2548_v2, %s2468_s26  ;;  %681 = vrot.lane.b32.xlu0 %v2540_v0, %s2468_s26 }
  0x53   : > { %737 = vperm.xlu0 %2434, %v383_v5  }
  0x85   : > { %v389_v8 = vpop.permute.xlu1 %388  ;;  %v385_v9 = vpop.permute.xlu0 %384 }
  0x89   : > { %v391_v14 = vpop.permute.xlu1 %390  ;;  %v387_v15 = vpop.permute.xlu0 %386 }
  0x8a   : > { %v397_v21 = vsel %vm394_vm0, %v385_v9, %v387_v15  ;;  %v398_v27 = vsel %vm394_vm0, %v391_v14, %v385_v9  ;;  %v395_v33 = vsel %vm394_vm0, %v389_v8, %v391_v14  ;;  %v396_v35 = vsel %vm394_vm0, %v387_v15, %v389_v8 }
  0x8b   : > { %v421_v31 = vmul.f32 %v2638_v19, %v397_v21  ;;  %v420_v39 = vmul.f32 %v2646_v24, %v398_v27  ;;  %v423_v42 = vmul.f32 %v2652_v26, %v395_v33  ;;  %v422_v46 = vmul.f32 %v2662_v30, %v396_v35 }
  0x8c   : > { %v2715_v8 = vrot.slane %v2367_v54, %v2630_v16  ;;  %v2718_v9 = vrot.slane %v2367_v54, %v2634_v18  ;;  %v2725_v15 = vrot.slane %v2367_v54, %v2632_v17 }
  0x8d   : > { %v427_v22 = vpop.permute.xlu1 %426  ;;  %v425_v23 = vpop.permute.xlu0 %424 }
  0x8e   : > { %v435_v28 = vsel %vm432_vm1, %v425_v23, %v427_v22 }
  0x8f   : > { %v459_v32 = vmul.f32 %v2641_v20, %v435_v28 }
  0x91   : > { %v431_v36 = vpop.permute.xlu1 %430  ;;  %v429_v37 = vpop.permute.xlu0 %428  ;;  %v716_v38 = vpack.c.bf16 %v459_v32, %v421_v31  ;;  %v2368_v31 = vld [vmem:[%s3888_s1 + $0x10] sm:$0xf] }
  0x92   : > { %v436_v40 = vsel %vm432_vm1, %v431_v36, %v425_v23  ;;  %v434_v41 = vsel %vm432_vm1, %v427_v22, %v429_v37  ;;  %v433_v43 = vsel %vm432_vm1, %v429_v37, %v431_v36 }
  0x93   : > { %757 = vmatprep.subr.bf16.mxu0 %v716_v38  ;;  %v458_v44 = vmul.f32 %v2649_v25, %v436_v40  ;;  %v461_v45 = vmul.f32 %v2659_v29, %v433_v43  ;;  %v460_v47 = vmul.f32 %v2669_v34, %v434_v41  ;;  %v2369_v41 = vld [vmem:[%s3888_s1 + $0x14] sm:$0xf]  ;;  %v2752_v43 = vrot.slane %v2368_v31, %v2632_v17 }
  0x94   : > { %v2769_v54 = vrot.slane %v2369_v41, %v2621_v11 }
  0x95   : > { %v465_v48 = vpop.permute.xlu1 %464  ;;  %v463_v49 = vpop.permute.xlu0 %462  ;;  %v715_v50 = vpack.c.bf16 %v458_v44, %v420_v39  ;;  %v718_v51 = vpack.c.bf16 %v461_v45, %v423_v42  ;;  %v717_v52 = vpack.c.bf16 %v460_v47, %v422_v46  ;;  %v2749_v42 = vrot.slane %v2368_v31, %v2621_v11 }
  0x96   : > { %v473_v59 = vsel %vm470_vm2, %v463_v49, %v465_v48  ;;  %v2755_v44 = vrot.slane %v2368_v31, %v2630_v16 }
  0x97   : > { %758 = vmatpush1.bf16.msra.mxu0 %v715_v50  ;;  %798 = vmatprep.subr.bf16.mxu1 %v718_v51  ;;  %v497_v12 = vmul.f32 %v2694_v57, %v473_v59  ;;  %v2758_v50 = vrot.slane %v2368_v31, %v2634_v18  ;;  %v2761_v51 = vrot.slane %v2369_v41, %v2630_v16 }
  0x98   : > { %799 = vmatpush1.bf16.msra.mxu1 %v717_v52  ;;  %v2764_v52 = vrot.slane %v2369_v41, %v2632_v17 }
  0x99   : > { %v469_v55 = vpop.permute.xlu1 %468  ;;  %v467_v56 = vpop.permute.xlu0 %466 }
  0x9a   : > { %v474_v6 = vsel %vm470_vm2, %v469_v55, %v463_v49  ;;  %v472_v13 = vsel %vm470_vm2, %v465_v48, %v467_v56  ;;  %v471_v21 = vsel %vm470_vm2, %v467_v56, %v469_v55  ;;  %v2772_v55 = vrot.slane %v2369_v41, %v2634_v18 }
  0x9b   : > { %v496_v22 = vmul.f32 %v2702_v60, %v474_v6  ;;  %v498_v32 = vmul.f32 %v2705_v61, %v472_v13  ;;  %v499_v37 = vmul.f32 %v2708_v62, %v471_v21  ;;  %v559_v6 = vmul.f32 %v2755_v44, %v2542_v1 }
  0x9d   : > { %v503_v63 = vpop.permute.xlu1 %502  ;;  %v501_v5 = vpop.permute.xlu0 %500 }
  0x9e   : > { %v511_v7 = vsel %vm508_vm3, %v501_v5, %v503_v63 }
  0x9f   : > { %v535_v14 = vmul.f32 %v2697_v58, %v511_v7  ;;  %v561_v7 = vmul.f32 %v2758_v50, %v2540_v0 }
  0xa1   : > { %v507_v23 = vpop.permute.xlu1 %506  ;;  %v505_v27 = vpop.permute.xlu0 %504  ;;  %v720_v28 = vpack.c.bf16 %v535_v14, %v497_v12 }
  0xa2   : > { %v512_v33 = vsel %vm508_vm3, %v507_v23, %v501_v5  ;;  %v509_v35 = vsel %vm508_vm3, %v505_v27, %v507_v23  ;;  %v510_v36 = vsel %vm508_vm3, %v503_v63, %v505_v27  ;;  %v560_v63 = vmul.f32 %v2749_v42, %v2550_v3 }
  0xa3   : > { %v534_v38 = vmul.f32 %v2715_v8, %v512_v33  ;;  %v536_v39 = vmul.f32 %v2718_v9, %v510_v36  ;;  %v537_v40 = vmul.f32 %v2725_v15, %v509_v35  ;;  %759 = vmatprep.subr.bf16.mxu0 %v720_v28  ;;  %v562_v5 = vmul.f32 %v2752_v43, %v2548_v2  ;;  %v2371_v35 = vld [vmem:[%s3888_s1 + $0x1c] sm:$0xf]  ;;  %v2370_v36 = vld [vmem:[%s3888_s1 + $0x18] sm:$0xf] }
  0xa5   : > { %v566_v45 = vpop.permute.xlu1 %565  ;;  %v564_v46 = vpop.permute.xlu0 %563  ;;  %v719_v47 = vpack.c.bf16 %v534_v38, %v496_v22  ;;  %v722_v48 = vpack.c.bf16 %v537_v40, %v499_v37  ;;  %v721_v49 = vpack.c.bf16 %v536_v39, %v498_v32  ;;  %v2801_v37 = vrot.slane %v2370_v36, %v2632_v17 }
  0xa6   : > { %v574_v53 = vsel %vm571_vm4, %v564_v46, %v566_v45  ;;  %v2804_v38 = vrot.slane %v2370_v36, %v2621_v11 }
  0xa7   : > { %760 = vmatpush1.bf16.msra.mxu0 %v719_v47  ;;  %800 = vmatprep.subr.bf16.mxu1 %v722_v48  ;;  %v597_v12 = vmul.f32 %v2761_v51, %v574_v53  ;;  %v2814_v47 = vrot.slane %v2371_v35, %v2630_v16  ;;  %v2372_v48 = vld [vmem:[%s3888_s1 + $0x20] sm:$0xf]  ;;  %v2822_v53 = vrot.slane %v2371_v35, %v2632_v17 }
  0xa8   : > { %801 = vmatpush1.bf16.msra.mxu1 %v721_v49 }
  0xa9   : > { %v570_v56 = vpop.permute.xlu1 %569  ;;  %v568_v59 = vpop.permute.xlu0 %567  ;;  %v723_v31 = vpack.c.bf16 %v597_v12, %v559_v6 }
  0xaa   : > { %v575_v13 = vsel %vm571_vm4, %v570_v56, %v564_v46  ;;  %v572_v14 = vsel %vm571_vm4, %v568_v59, %v570_v56  ;;  %v573_v3 = vsel %vm571_vm4, %v566_v45, %v568_v59  ;;  %v2809_v45 = vrot.slane %v2370_v36, %v2634_v18 }
  0xab   : > { %v600_v21 = vmul.f32 %v2764_v52, %v575_v13  ;;  %v598_v2 = vmul.f32 %v2769_v54, %v573_v3  ;;  %v599_v1 = vmul.f32 %v2772_v55, %v572_v14  ;;  %v2825_v56 = vrot.slane %v2371_v35, %v2621_v11 }
  0xac   : > { %v2828_v59 = vrot.slane %v2371_v35, %v2634_v18  ;;  %v2841_v3 = vrot.slane %v2372_v48, %v2630_v16 }
  0xad   : > { %v604_v22 = vpop.permute.xlu1 %603  ;;  %v602_v23 = vpop.permute.xlu0 %601  ;;  %v724_v0 = vpack.c.bf16 %v598_v2, %v560_v63  ;;  %v726_v27 = vpack.c.bf16 %v600_v21, %v562_v5  ;;  %v725_v28 = vpack.c.bf16 %v599_v1, %v561_v7  ;;  %v2832_v63 = vrot.slane %v2370_v36, %v2630_v16 }
  0xae   : > { %v612_v6 = vsel %vm609_vm6, %v602_v23, %v604_v22 }
  0xaf   : > { %761 = vmatprep.subr.bf16.mxu0 %v724_v0  ;;  %802 = vmatprep.subr.bf16.mxu1 %v726_v27 }
  0xb0   : > { %762 = vmatpush1.bf16.msra.mxu0 %v723_v31  ;;  %803 = vmatpush1.bf16.msra.mxu1 %v725_v28  ;;  %v635_v31 = vmul.f32 %v2832_v63, %v612_v6  ;;  %v2865_v6 = vrot.slane %v2372_v48, %v2634_v18 }
  0xb1   : > { %v608_v32 = vpop.permute.xlu1 %607  ;;  %v606_v33 = vpop.permute.xlu0 %605 }
  0xb2   : > { %v613_v41 = vsel %vm609_vm6, %v608_v32, %v602_v23  ;;  %v611_v46 = vsel %vm609_vm6, %v604_v22, %v606_v33  ;;  %v610_v5 = vsel %vm609_vm6, %v606_v33, %v608_v32 }
  0xb3   : > { %v638_v7 = vmul.f32 %v2801_v37, %v613_v41  ;;  %v636_v12 = vmul.f32 %v2804_v38, %v611_v46  ;;  %v637_v23 = vmul.f32 %v2809_v45, %v610_v5 }
  0xb5   : > { %v642_v39 = vpop.permute.xlu1 %641  ;;  %v640_v40 = vpop.permute.xlu0 %639 }
  0xb6   : > { %v650_v49 = vsel %vm647_vm5, %v640_v40, %v642_v39 }
  0xb7   : > { %v673_v21 = vmul.f32 %v2814_v47, %v650_v49  ;;  %v2861_v49 = vrot.slane %v2372_v48, %v2621_v11 }
  0xb9   : > { %v646_v13 = vpop.permute.xlu1 %645  ;;  %v644_v14 = vpop.permute.xlu0 %643  ;;  %v727_v46 = vpack.c.bf16 %v673_v21, %v635_v31 }
  0xba   : > { %v651_v2 = vsel %vm647_vm5, %v646_v13, %v640_v40  ;;  %v648_v1 = vsel %vm647_vm5, %v644_v14, %v646_v13  ;;  %v649_v22 = vsel %vm647_vm5, %v642_v39, %v644_v14  ;;  %v2858_v39 = vrot.slane %v2372_v48, %v2632_v17 }
  0xbb   : > { %v676_v0 = vmul.f32 %v2822_v53, %v651_v2  ;;  %v674_v27 = vmul.f32 %v2825_v56, %v649_v22  ;;  %v675_v28 = vmul.f32 %v2828_v59, %v648_v1 }
  0xbd   : > { %v680_v32 = vpop.permute.xlu1 %679  ;;  %v678_v33 = vpop.permute.xlu0 %677  ;;  %v728_v35 = vpack.c.bf16 %v674_v27, %v636_v12  ;;  %v730_v36 = vpack.c.bf16 %v676_v0, %v638_v7  ;;  %v729_v40 = vpack.c.bf16 %v675_v28, %v637_v23  ;;  %v382_v27 = vld [vmem:[%s3889_s2] sm:$0xf] }
  0xbe   : > { %v688_v41 = vsel %vm685_vm7, %v678_v33, %v680_v32 }
  0xbf   : > { %763 = vmatprep.subr.bf16.mxu0 %v728_v35  ;;  %804 = vmatprep.subr.bf16.mxu1 %v730_v36  ;;  %v711_v5 = vmul.f32 %v2841_v3, %v688_v41 }
  0xc0   : > { %764 = vmatpush1.bf16.msra.mxu0 %v727_v46  ;;  %805 = vmatpush1.bf16.msra.mxu1 %v729_v40 }
  0xc1   : > { %v684_v7 = vpop.permute.xlu1 %683  ;;  %v682_v12 = vpop.permute.xlu0 %681  ;;  %v731_v2 = vpack.c.bf16 %v711_v5, %v711_v5 }
  0xc2   : > { %v689_v13 = vsel %vm685_vm7, %v684_v7, %v678_v33  ;;  %v686_v17 = vsel %vm685_vm7, %v682_v12, %v684_v7  ;;  %v687_v14 = vsel %vm685_vm7, %v680_v32, %v682_v12 }
  0xc3   : > { %v714_v11 = vmul.f32 %v2858_v39, %v689_v13  ;;  %v712_v21 = vmul.f32 %v2861_v49, %v687_v14  ;;  %v713_v18 = vmul.f32 %v2865_v6, %v686_v17  ;;  %v746_v23 = vsel %vm744_vm8, %v731_v2, 0  ;;  %v2378_v17 = vld [vmem:[%s3890_s3 + $0x8] sm:$0xff] }
  0xc5   : > { %v734_v48 = vpack.c.bf16 %v714_v11, %v714_v11  ;;  %v732_v1 = vpack.c.bf16 %v712_v21, %v712_v21  ;;  %v733_v22 = vpack.c.bf16 %v713_v18, %v713_v18 }
  0xc7   : > { %2373 = vmatprep.subr.msk.bf16.mxu0 %vm744_vm8, %v732_v1  ;;  %2375 = vmatprep.subr.msk.bf16.mxu1 %vm744_vm8, %v734_v48  ;;  %v752_v0 = vsel %vm744_vm8, %v733_v22, 0 }
  0xc8   : > { %766 = vmatpush1.bf16.msra.mxu0 %v746_v23  ;;  %807 = vmatpush1.bf16.msra.mxu1 %v752_v0 }
  0xcb   : > { %2374 = vmatmul.mubr.msk.bf16.vlgmr.msra.gmra.mrb[0].mxu0 %vm740_vm9, %v382_v27  ;;  %2376 = vmatmul.mubr.msk.bf16.vlgmr.msra.gmra.mrb[0].mxu1 %vm740_vm9, %v382_v27 }
  0xcc   : > { %1055 = vmatprep.mubr.bf16.mxu0 %v3898_v4  ;;  %1096 = vmatprep.mubr.bf16.mxu1 %v3898_v4 }
  0xd2   : > { %v738_v28 = vpop.permute.xlu0 %737 }
 0x19e   : > { %v832_v31 = vpop.f32.mrb[0].mxu1  ;;  %v791_v32 = vpop.f32.mrb[0].mxu0 }
 0x19f   : > { %v2887_v33 = vadd.f32 %v832_v31, %v738_v28  ;;  %v2889_v35 = vadd.f32 %v791_v32, %v738_v28  ;;  %v793_v36 = vpop.f32.mrb[1].mxu0  ;;  %v834_v40 = vpop.f32.mrb[1].mxu1 }
 0x1a0   : > { %v795_v41 = vpop.f32.mrb[2].mxu0  ;;  %v836_v46 = vpop.f32.mrb[2].mxu1  ;;  %v2895_v12 = vadd.f32 %v793_v36, %v738_v28  ;;  %v2901_v13 = vadd.f32 %v834_v40, %v738_v28 }
 0x1a1   : > { %855 = vrot.lane.b32.xlu0 %v2887_v33, %s2460_s19  ;;  %v796_v5 = vpop.f32.mrb[3].mxu0  ;;  %851 = vrot.lane.b32.xlu1 %v2889_v35, %s2460_s19  ;;  %v837_v7 = vpop.f32.mrb[3].mxu1 }
 0x1a2   : > { %3910 = vst [vmem:[#allocation4_spill] sm:$0xff] %v2901_v13 }
 0x1a5   : > { %867 = vrot.lane.b32.xlu0 %v2889_v35, %s2461_s20  ;;  %853 = vrot.lane.b32.xlu1 %v2895_v12, %s2460_s19 }
 0x1a9   : > { %871 = vrot.lane.b32.xlu0 %v2887_v33, %s2461_s20  ;;  %857 = vrot.lane.b32.xlu1 %v2901_v13, %s2460_s19 }
 0x1ad   : > { %883 = vrot.lane.b32.xlu0 %v2889_v35, %s2462_s21  ;;  %869 = vrot.lane.b32.xlu1 %v2895_v12, %s2461_s20 }
 0x1b1   : > { %887 = vrot.lane.b32.xlu0 %v2887_v33, %s2462_s21  ;;  %873 = vrot.lane.b32.xlu1 %v2901_v13, %s2461_s20 }
 0x1b5   : > { %899 = vrot.lane.b32.xlu0 %v2889_v35, %s2463_s22  ;;  %885 = vrot.lane.b32.xlu1 %v2895_v12, %s2462_s21 }
 0x1b9   : > { %903 = vrot.lane.b32.xlu0 %v2887_v33, %s2463_s22  ;;  %889 = vrot.lane.b32.xlu1 %v2901_v13, %s2462_s21 }
 0x1bd   : > { %919 = vrot.lane.b32.xlu0 %v2889_v35, %s2464_s23  ;;  %901 = vrot.lane.b32.xlu1 %v2895_v12, %s2463_s22 }
 0x1c1   : > { %923 = vrot.lane.b32.xlu0 %v2887_v33, %s2464_s23  ;;  %905 = vrot.lane.b32.xlu1 %v2901_v13, %s2463_s22 }
 0x1c5   : > { %935 = vrot.lane.b32.xlu0 %v2889_v35, %s2465_s24  ;;  %921 = vrot.lane.b32.xlu1 %v2895_v12, %s2464_s23 }
 0x1c9   : > { %939 = vrot.lane.b32.xlu0 %v2887_v33, %s2465_s24  ;;  %925 = vrot.lane.b32.xlu1 %v2901_v13, %s2464_s23 }
 0x1cd   : > { %951 = vrot.lane.b32.xlu0 %v2889_v35, %s2466_s25  ;;  %937 = vrot.lane.b32.xlu1 %v2895_v12, %s2465_s24 }
 0x1d1   : > { %955 = vrot.lane.b32.xlu0 %v2887_v33, %s2466_s25  ;;  %941 = vrot.lane.b32.xlu1 %v2901_v13, %s2465_s24 }
 0x1d5   : > { %967 = vrot.lane.b32.xlu0 %v2889_v35, %s2468_s26  ;;  %953 = vrot.lane.b32.xlu1 %v2895_v12, %s2466_s25 }
 0x1d9   : > { %971 = vrot.lane.b32.xlu0 %v2887_v33, %s2468_s26  ;;  %957 = vrot.lane.b32.xlu1 %v2901_v13, %s2466_s25 }
 0x1dd   : > { %1005 = vperm.xlu0 %2434, %v2378_v17   ;;  %969 = vrot.lane.b32.xlu1 %v2895_v12, %s2468_s26 }
 0x1e1   : > { %973 = vrot.lane.b32.xlu1 %v2901_v13, %s2468_s26 }
 0x213   : > { %v856_v14 = vpop.permute.xlu0 %855  ;;  %v852_v11 = vpop.permute.xlu1 %851 }
 0x217   : > { %v868_v21 = vpop.permute.xlu0 %867  ;;  %v854_v2 = vpop.permute.xlu1 %853 }
 0x218   : > { %v861_v1 = vsel %vm394_vm0, %v852_v11, %v854_v2  ;;  %v860_v40 = vsel %vm394_vm0, %v854_v2, %v856_v14 }
 0x219   : > { %v864_v27 = vmul.f32 %v861_v1, %v2638_v19 }
 0x21b   : > { %v872_v18 = vpop.permute.xlu0 %871  ;;  %v858_v48 = vpop.permute.xlu1 %857 }
 0x21c   : > { %v859_v32 = vsel %vm394_vm0, %v856_v14, %v858_v48  ;;  %v862_v36 = vsel %vm394_vm0, %v858_v48, %v852_v11  ;;  %v865_v14 = vmul.f32 %v860_v40, %v2662_v30 }
 0x21f   : > { %v884_v22 = vpop.permute.xlu0 %883  ;;  %v870_v23 = vpop.permute.xlu1 %869 }
 0x220   : > { %v877_v0 = vsel %vm432_vm1, %v868_v21, %v870_v23  ;;  %v876_v28 = vsel %vm432_vm1, %v870_v23, %v872_v18  ;;  %v863_v23 = vmul.f32 %v862_v36, %v2646_v24 }
 0x221   : > { %v880_v31 = vmul.f32 %v877_v0, %v2641_v20  ;;  %v881_v7 = vmul.f32 %v876_v28, %v2669_v34  ;;  %v866_v0 = vmul.f32 %v859_v32, %v2652_v26 }
 0x223   : > { %v888_v41 = vpop.permute.xlu0 %887  ;;  %v874_v46 = vpop.permute.xlu1 %873  ;;  %v984_v5 = vpack.c.bf16 %v880_v31, %v864_v27  ;;  %v985_v4 = vpack.c.bf16 %v881_v7, %v865_v14 }
 0x224   : > { %v875_v17 = vsel %vm432_vm1, %v872_v18, %v874_v46  ;;  %v878_v1 = vsel %vm432_vm1, %v874_v46, %v868_v21 }
 0x225   : > { %v879_v11 = vmul.f32 %v878_v1, %v2649_v25  ;;  %v882_v48 = vmul.f32 %v875_v17, %v2659_v29  ;;  %1023 = vmatprep.subr.bf16.mxu0 %v984_v5 }
 0x227   : > { %v983_v2 = vpack.c.bf16 %v879_v11, %v863_v23  ;;  %v900_v27 = vpop.permute.xlu0 %899  ;;  %v886_v28 = vpop.permute.xlu1 %885  ;;  %v986_v31 = vpack.c.bf16 %v882_v48, %v866_v0 }
 0x228   : > { %v893_v32 = vsel %vm470_vm2, %v884_v22, %v886_v28  ;;  %v892_v23 = vsel %vm470_vm2, %v886_v28, %v888_v41 }
 0x229   : > { %1024 = vmatpush1.bf16.msra.mxu0 %v983_v2  ;;  %1064 = vmatprep.subr.bf16.mxu1 %v986_v31  ;;  %v896_v40 = vmul.f32 %v893_v32, %v2694_v57 }
 0x22a   : > { %1065 = vmatpush1.bf16.msra.mxu1 %v985_v4 }
 0x22b   : > { %v904_v21 = vpop.permute.xlu0 %903  ;;  %v890_v18 = vpop.permute.xlu1 %889 }
 0x22c   : > { %v891_v4 = vsel %vm470_vm2, %v888_v41, %v890_v18  ;;  %v894_v1 = vsel %vm470_vm2, %v890_v18, %v884_v22  ;;  %v897_v41 = vmul.f32 %v892_v23, %v2705_v61  ;;  %v916_v23 = vmul.f32 %v2895_v12, %v2749_v42 }
 0x22d   : > { %v895_v32 = vmul.f32 %v894_v1, %v2702_v60 }
 0x22f   : > { %v920_v36 = vpop.permute.xlu0 %919  ;;  %v902_v46 = vpop.permute.xlu1 %901 }
 0x230   : > { %v909_v5 = vsel %vm508_vm3, %v900_v27, %v902_v46  ;;  %v908_v17 = vsel %vm508_vm3, %v902_v46, %v904_v21  ;;  %v898_v46 = vmul.f32 %v891_v4, %v2708_v62 }
 0x231   : > { %v912_v7 = vmul.f32 %v909_v5, %v2697_v58  ;;  %v913_v14 = vmul.f32 %v908_v17, %v2718_v9 }
 0x233   : > { %v924_v0 = vpop.permute.xlu0 %923  ;;  %v906_v11 = vpop.permute.xlu1 %905  ;;  %v988_v48 = vpack.c.bf16 %v912_v7, %v896_v40  ;;  %v989_v7 = vpack.c.bf16 %v913_v14, %v897_v41 }
 0x234   : > { %v907_v2 = vsel %vm508_vm3, %v904_v21, %v906_v11  ;;  %v910_v31 = vsel %vm508_vm3, %v906_v11, %v900_v27  ;;  %v915_v21 = vmul.f32 %v2889_v35, %v2755_v44 }
 0x235   : > { %v911_v22 = vmul.f32 %v910_v31, %v2715_v8  ;;  %v914_v18 = vmul.f32 %v907_v2, %v2725_v15  ;;  %1025 = vmatprep.subr.bf16.mxu0 %v988_v48 }
 0x237   : > { %v987_v28 = vpack.c.bf16 %v911_v22, %v895_v32  ;;  %v936_v5 = vpop.permute.xlu0 %935  ;;  %v922_v40 = vpop.permute.xlu1 %921  ;;  %v990_v17 = vpack.c.bf16 %v914_v18, %v898_v46  ;;  %v917_v22 = vmul.f32 %v2887_v33, %v2758_v50 }
 0x238   : > { %v928_v27 = vsel %vm571_vm4, %v922_v40, %v924_v0  ;;  %v929_v4 = vsel %vm571_vm4, %v920_v36, %v922_v40 }
 0x239   : > { %v931_v1 = vmul.f32 %v929_v4, %v2761_v51  ;;  %v932_v11 = vmul.f32 %v928_v27, %v2769_v54  ;;  %1026 = vmatpush1.bf16.msra.mxu0 %v987_v28  ;;  %1066 = vmatprep.subr.bf16.mxu1 %v990_v17  ;;  %v918_v28 = vmul.f32 %v2901_v13, %v2752_v43 }
 0x23a   : > { %1067 = vmatpush1.bf16.msra.mxu1 %v989_v7 }
 0x23b   : > { %v991_v48 = vpack.c.bf16 %v931_v1, %v915_v21  ;;  %v940_v14 = vpop.permute.xlu0 %939  ;;  %v926_v2 = vpop.permute.xlu1 %925  ;;  %v992_v31 = vpack.c.bf16 %v932_v11, %v916_v23 }
 0x23c   : > { %v927_v32 = vsel %vm571_vm4, %v924_v0, %v926_v2  ;;  %v930_v46 = vsel %vm571_vm4, %v926_v2, %v920_v36 }
 0x23d   : > { %v933_v18 = vmul.f32 %v927_v32, %v2772_v55  ;;  %v934_v41 = vmul.f32 %v930_v46, %v2764_v52  ;;  %1027 = vmatprep.subr.bf16.mxu0 %v992_v31 }
 0x23e   : > { %1028 = vmatpush1.bf16.msra.mxu0 %v991_v48 }
 0x23f   : > { %v993_v40 = vpack.c.bf16 %v933_v18, %v917_v22  ;;  %v952_v17 = vpop.permute.xlu0 %951  ;;  %v938_v7 = vpop.permute.xlu1 %937  ;;  %v994_v21 = vpack.c.bf16 %v934_v41, %v918_v28 }
 0x240   : > { %v944_v27 = vsel %vm609_vm6, %v938_v7, %v940_v14  ;;  %v945_v4 = vsel %vm609_vm6, %v936_v5, %v938_v7 }
 0x241   : > { %1068 = vmatprep.subr.bf16.mxu1 %v994_v21  ;;  %v947_v48 = vmul.f32 %v945_v4, %v2832_v63  ;;  %v948_v2 = vmul.f32 %v944_v27, %v2804_v38 }
 0x242   : > { %1069 = vmatpush1.bf16.msra.mxu1 %v993_v40 }
 0x243   : > { %v956_v0 = vpop.permute.xlu0 %955  ;;  %v942_v36 = vpop.permute.xlu1 %941 }
 0x244   : > { %v943_v22 = vsel %vm609_vm6, %v940_v14, %v942_v36  ;;  %v946_v18 = vsel %vm609_vm6, %v942_v36, %v936_v5 }
 0x245   : > { %v949_v27 = vmul.f32 %v943_v22, %v2809_v45  ;;  %v950_v4 = vmul.f32 %v946_v18, %v2801_v37 }
 0x247   : > { %v954_v1 = vpop.permute.xlu1 %953  ;;  %v968_v31 = vpop.permute.xlu0 %967 }
 0x248   : > { %v960_v11 = vsel %vm647_vm5, %v954_v1, %v956_v0  ;;  %v961_v23 = vsel %vm647_vm5, %v952_v17, %v954_v1 }
 0x249   : > { %v963_v32 = vmul.f32 %v961_v23, %v2814_v47  ;;  %v964_v46 = vmul.f32 %v960_v11, %v2825_v56 }
 0x24b   : > { %v995_v41 = vpack.c.bf16 %v963_v32, %v947_v48  ;;  %v958_v28 = vpop.permute.xlu1 %957  ;;  %v996_v40 = vpack.c.bf16 %v964_v46, %v948_v2  ;;  %v972_v5 = vpop.permute.xlu0 %971 }
 0x24c   : > { %v959_v7 = vsel %vm647_vm5, %v956_v0, %v958_v28  ;;  %v962_v21 = vsel %vm647_vm5, %v958_v28, %v952_v17 }
 0x24d   : > { %v965_v1 = vmul.f32 %v959_v7, %v2828_v59  ;;  %v966_v14 = vmul.f32 %v962_v21, %v2822_v53  ;;  %1029 = vmatprep.subr.bf16.mxu0 %v996_v40  ;;  %v2377_v21 = vld [vmem:[%s3889_s2 + $0x4] sm:$0xf] }
 0x24e   : > { %1030 = vmatpush1.bf16.msra.mxu0 %v995_v41 }
 0x24f   : > { %v997_v36 = vpack.c.bf16 %v965_v1, %v949_v27  ;;  %v970_v11 = vpop.permute.xlu1 %969  ;;  %v998_v23 = vpack.c.bf16 %v966_v14, %v950_v4  ;;  %v3911_v1 = vmov 0  }
 0x250   : > { %v976_v0 = vsel %vm685_vm7, %v970_v11, %v972_v5  ;;  %v977_v17 = vsel %vm685_vm7, %v968_v31, %v970_v11 }
 0x251   : > { %v979_v48 = vmul.f32 %v977_v17, %v2841_v3  ;;  %v980_v2 = vmul.f32 %v976_v0, %v2861_v49  ;;  %1070 = vmatprep.subr.bf16.mxu1 %v998_v23 }
 0x252   : > { %1071 = vmatpush1.bf16.msra.mxu1 %v997_v36 }
 0x253   : > { %v999_v32 = vpack.c.bf16 %v979_v48, %v979_v48  ;;  %v1000_v46 = vpack.c.bf16 %v980_v2, %v980_v2  ;;  %v974_v22 = vpop.permute.xlu1 %973 }
 0x254   : > { %v975_v18 = vsel %vm685_vm7, %v972_v5, %v974_v22  ;;  %v978_v41 = vsel %vm685_vm7, %v974_v22, %v968_v31 }
 0x255   : > { %v981_v28 = vmul.f32 %v975_v18, %v2865_v6  ;;  %v982_v40 = vmul.f32 %v978_v41, %v2858_v39  ;;  %2381 = vmatprep.subr.msk.bf16.mxu0 %vm744_vm8, %v1000_v46  ;;  %v1012_v7 = vsel %vm744_vm8, %v999_v32, 0 }
 0x256   : > { %1032 = vmatpush1.bf16.msra.mxu0 %v1012_v7 }
 0x257   : > { %v1001_v27 = vpack.c.bf16 %v981_v28, %v981_v28  ;;  %v1002_v4 = vpack.c.bf16 %v982_v40, %v982_v40 }
 0x259   : > { %2382 = vmatmul.mubr.msk.bf16.vlgmr.msra.gmra.mrb[4].mxu0 %vm740_vm9, %v2377_v21  ;;  %2383 = vmatprep.subr.msk.bf16.mxu1 %vm744_vm8, %v1002_v4  ;;  %v1018_v31 = vsel %vm744_vm8, %v1001_v27, 0 }
 0x25a   : > { %1073 = vmatpush1.bf16.msra.mxu1 %v1018_v31  ;;  %1313 = vmatprep.mubr.bf16.mxu0 %v3911_v1 }
 0x25c   : > { %v1006_v14 = vpop.permute.xlu0 %1005 }
 0x25d   : > { %2384 = vmatmul.mubr.msk.bf16.vlgmr.msra.gmra.mrb[4].mxu1 %vm740_vm9, %v2377_v21  ;;  %v2380_v21 = vld [vmem:[%s3890_s3 + $0x10] sm:$0xff] }
 0x25e   : > { %1354 = vmatprep.mubr.bf16.mxu1 %v3911_v1 }
 0x32c   : > { %v1057_v5 = vpop.f32.mrb[4].mxu0 }
 0x32d   : > { %v1058_v36 = vadd.f32 %v1057_v5, %v1006_v14  ;;  %v1059_v11 = vpop.f32.mrb[5].mxu0 }
 0x32e   : > { %v1060_v23 = vadd.f32 %v1059_v11, %v1006_v14  ;;  %v1061_v0 = vpop.f32.mrb[6].mxu0 }
 0x32f   : > { %v3077_v17 = vmax.f32 %v1058_v36, 0.0  ;;  %v1062_v48 = vpop.f32.mrb[7].mxu0 }
 0x330   : > { %v3079_v2 = vmax.f32 %v1060_v23, 0.0  ;;  %v1098_v32 = vpop.f32.mrb[4].mxu1 }
 0x331   : > { %v1099_v46 = vadd.f32 %v1098_v32, %v1006_v14  ;;  %v1100_v22 = vpop.f32.mrb[5].mxu1  ;;  %1109 = vrot.lane.b32.xlu1 %v3077_v17, %s2460_s19 }
 0x332   : > { %v1101_v18 = vadd.f32 %v1100_v22, %v1006_v14  ;;  %v1102_v41 = vpop.f32.mrb[6].mxu1  ;;  %1111 = vrot.lane.b32.xlu0 %v3079_v2, %s2460_s19 }
 0x333   : > { %v3085_v28 = vmax.f32 %v1099_v46, 0.0  ;;  %v1103_v40 = vpop.f32.mrb[7].mxu1 }
 0x334   : > { %v3087_v7 = vmax.f32 %v1101_v18, 0.0 }
 0x335   : > { %1113 = vrot.lane.b32.xlu1 %v3085_v28, %s2460_s19 }
 0x336   : > { %1115 = vrot.lane.b32.xlu0 %v3087_v7, %s2460_s19 }
 0x339   : > { %1125 = vrot.lane.b32.xlu1 %v3077_v17, %s2461_s20 }
 0x33a   : > { %1127 = vrot.lane.b32.xlu0 %v3079_v2, %s2461_s20 }
 0x33d   : > { %1129 = vrot.lane.b32.xlu1 %v3085_v28, %s2461_s20 }
 0x33e   : > { %1131 = vrot.lane.b32.xlu0 %v3087_v7, %s2461_s20 }
 0x341   : > { %1141 = vrot.lane.b32.xlu1 %v3077_v17, %s2462_s21 }
 0x342   : > { %1143 = vrot.lane.b32.xlu0 %v3079_v2, %s2462_s21 }
 0x345   : > { %1145 = vrot.lane.b32.xlu1 %v3085_v28, %s2462_s21 }
 0x346   : > { %1147 = vrot.lane.b32.xlu0 %v3087_v7, %s2462_s21 }
 0x349   : > { %1157 = vrot.lane.b32.xlu1 %v3077_v17, %s2463_s22 }
 0x34a   : > { %1159 = vrot.lane.b32.xlu0 %v3079_v2, %s2463_s22 }
 0x34d   : > { %1161 = vrot.lane.b32.xlu1 %v3085_v28, %s2463_s22 }
 0x34e   : > { %1163 = vrot.lane.b32.xlu0 %v3087_v7, %s2463_s22 }
 0x351   : > { %1177 = vrot.lane.b32.xlu1 %v3077_v17, %s2464_s23 }
 0x352   : > { %1179 = vrot.lane.b32.xlu0 %v3079_v2, %s2464_s23 }
 0x355   : > { %1181 = vrot.lane.b32.xlu1 %v3085_v28, %s2464_s23 }
 0x356   : > { %1183 = vrot.lane.b32.xlu0 %v3087_v7, %s2464_s23 }
 0x359   : > { %1193 = vrot.lane.b32.xlu1 %v3077_v17, %s2465_s24 }
 0x35a   : > { %1195 = vrot.lane.b32.xlu0 %v3079_v2, %s2465_s24 }
 0x35d   : > { %1197 = vrot.lane.b32.xlu1 %v3085_v28, %s2465_s24 }
 0x35e   : > { %1199 = vrot.lane.b32.xlu0 %v3087_v7, %s2465_s24 }
 0x361   : > { %1209 = vrot.lane.b32.xlu1 %v3077_v17, %s2466_s25 }
 0x362   : > { %1211 = vrot.lane.b32.xlu0 %v3079_v2, %s2466_s25 }
 0x365   : > { %1213 = vrot.lane.b32.xlu1 %v3085_v28, %s2466_s25 }
 0x366   : > { %1215 = vrot.lane.b32.xlu0 %v3087_v7, %s2466_s25 }
 0x369   : > { %1225 = vrot.lane.b32.xlu1 %v3077_v17, %s2468_s26 }
 0x36a   : > { %1227 = vrot.lane.b32.xlu0 %v3079_v2, %s2468_s26 }
 0x36d   : > { %1229 = vrot.lane.b32.xlu1 %v3085_v28, %s2468_s26 }
 0x36e   : > { %1231 = vrot.lane.b32.xlu0 %v3087_v7, %s2468_s26 }
 0x371   : > { %1263 = vperm.xlu1 %2435, %v2380_v21  }
 0x3a3   : > { %v1110_v27 = vpop.permute.xlu1 %1109 }
 0x3a4   : > { %v1112_v4 = vpop.permute.xlu0 %1111 }
 0x3a5   : > { %v1119_v5 = vsel %vm394_vm0, %v1110_v27, %v1112_v4 }
 0x3a6   : > { %v1122_v0 = vmul.f32 %v1119_v5, %v2638_v19 }
 0x3a7   : > { %v1114_v31 = vpop.permute.xlu1 %1113 }
 0x3a8   : > { %v1116_v14 = vpop.permute.xlu0 %1115  ;;  %v1118_v18 = vsel %vm394_vm0, %v1112_v4, %v1114_v31 }
 0x3a9   : > { %v1117_v32 = vsel %vm394_vm0, %v1114_v31, %v1116_v14  ;;  %v1120_v46 = vsel %vm394_vm0, %v1116_v14, %v1110_v27  ;;  %v1123_v31 = vmul.f32 %v1118_v18, %v2662_v30 }
 0x3aa   : > { %v1124_v27 = vmul.f32 %v1117_v32, %v2652_v26 }
 0x3ab   : > { %v1126_v36 = vpop.permute.xlu1 %1125 }
 0x3ac   : > { %v1128_v11 = vpop.permute.xlu0 %1127 }
 0x3ad   : > { %v1135_v23 = vsel %vm432_vm1, %v1126_v36, %v1128_v11 }
 0x3ae   : > { %v1138_v48 = vmul.f32 %v1135_v23, %v2641_v20  ;;  %v1121_v20 = vmul.f32 %v1120_v46, %v2646_v24 }
 0x3af   : > { %v1130_v22 = vpop.permute.xlu1 %1129 }
 0x3b0   : > { %v1134_v41 = vsel %vm432_vm1, %v1128_v11, %v1130_v22  ;;  %v1132_v40 = vpop.permute.xlu0 %1131  ;;  %v1242_v21 = vpack.c.bf16 %v1138_v48, %v1122_v0 }
 0x3b1   : > { %v1139_v13 = vmul.f32 %v1134_v41, %v2669_v34  ;;  %v1133_v5 = vsel %vm432_vm1, %v1130_v22, %v1132_v40  ;;  %v1136_v23 = vsel %vm432_vm1, %v1132_v40, %v1126_v36 }
 0x3b2   : > { %v1137_v14 = vmul.f32 %v1136_v23, %v2649_v25  ;;  %v1140_v4 = vmul.f32 %v1133_v5, %v2659_v29  ;;  %1281 = vmatprep.subr.bf16.mxu0 %v1242_v21 }
 0x3b3   : > { %v1142_v11 = vpop.permute.xlu1 %1141  ;;  %v1243_v34 = vpack.c.bf16 %v1139_v13, %v1123_v31 }
 0x3b4   : > { %v1241_v0 = vpack.c.bf16 %v1137_v14, %v1121_v20  ;;  %v1144_v48 = vpop.permute.xlu0 %1143  ;;  %v1244_v41 = vpack.c.bf16 %v1140_v4, %v1124_v27 }
 0x3b5   : > { %v1151_v32 = vsel %vm470_vm2, %v1142_v11, %v1144_v48 }
 0x3b6   : > { %1282 = vmatpush1.bf16.msra.mxu0 %v1241_v0  ;;  %1322 = vmatprep.subr.bf16.mxu1 %v1244_v41  ;;  %v1154_v18 = vmul.f32 %v1151_v32, %v2694_v57 }
 0x3b7   : > { %1323 = vmatpush1.bf16.msra.mxu1 %v1243_v34  ;;  %v1146_v36 = vpop.permute.xlu1 %1145 }
 0x3b8   : > { %v1148_v22 = vpop.permute.xlu0 %1147  ;;  %v1150_v23 = vsel %vm470_vm2, %v1144_v48, %v1146_v36 }
 0x3b9   : > { %v1149_v13 = vsel %vm470_vm2, %v1146_v36, %v1148_v22  ;;  %v1152_v34 = vsel %vm470_vm2, %v1148_v22, %v1142_v11  ;;  %v1155_v36 = vmul.f32 %v1150_v23, %v2705_v61 }
 0x3ba   : > { %v1153_v32 = vmul.f32 %v1152_v34, %v2702_v60  ;;  %v1156_v11 = vmul.f32 %v1149_v13, %v2708_v62  ;;  %v1173_v13 = vmul.f32 %v3077_v17, %v2755_v44  ;;  %v1175_v17 = vmul.f32 %v3085_v28, %v2758_v50 }
 0x3bb   : > { %v1158_v46 = vpop.permute.xlu1 %1157 }
 0x3bc   : > { %v1160_v40 = vpop.permute.xlu0 %1159 }
 0x3bd   : > { %v1167_v21 = vsel %vm508_vm3, %v1158_v46, %v1160_v40 }
 0x3be   : > { %v1170_v20 = vmul.f32 %v1167_v21, %v2697_v58 }
 0x3bf   : > { %v1162_v5 = vpop.permute.xlu1 %1161 }
 0x3c0   : > { %v1166_v27 = vsel %vm508_vm3, %v1160_v40, %v1162_v5  ;;  %v1164_v14 = vpop.permute.xlu0 %1163  ;;  %v1246_v4 = vpack.c.bf16 %v1170_v20, %v1154_v18 }
 0x3c1   : > { %v1171_v31 = vmul.f32 %v1166_v27, %v2718_v9  ;;  %v1165_v0 = vsel %vm508_vm3, %v1162_v5, %v1164_v14  ;;  %v1168_v41 = vsel %vm508_vm3, %v1164_v14, %v1158_v46 }
 0x3c2   : > { %v1169_v22 = vmul.f32 %v1168_v41, %v2715_v8  ;;  %v1172_v48 = vmul.f32 %v1165_v0, %v2725_v15  ;;  %1283 = vmatprep.subr.bf16.mxu0 %v1246_v4  ;;  %v1174_v41 = vmul.f32 %v3079_v2, %v2749_v42 }
 0x3c3   : > { %v1178_v40 = vpop.permute.xlu1 %1177  ;;  %v1247_v27 = vpack.c.bf16 %v1171_v31, %v1155_v36 }
 0x3c4   : > { %v1245_v21 = vpack.c.bf16 %v1169_v22, %v1153_v32  ;;  %v1180_v18 = vpop.permute.xlu0 %1179  ;;  %v1248_v20 = vpack.c.bf16 %v1172_v48, %v1156_v11  ;;  %v1176_v22 = vmul.f32 %v3087_v7, %v2752_v43 }
 0x3c5   : > { %v1187_v5 = vsel %vm571_vm4, %v1178_v40, %v1180_v18 }
 0x3c6   : > { %1284 = vmatpush1.bf16.msra.mxu0 %v1245_v21  ;;  %1324 = vmatprep.subr.bf16.mxu1 %v1248_v20  ;;  %v1189_v34 = vmul.f32 %v1187_v5, %v2761_v51 }
 0x3c7   : > { %1325 = vmatpush1.bf16.msra.mxu1 %v1247_v27  ;;  %v1182_v46 = vpop.permute.xlu1 %1181 }
 0x3c8   : > { %v1186_v23 = vsel %vm571_vm4, %v1180_v18, %v1182_v46  ;;  %v1184_v14 = vpop.permute.xlu0 %1183  ;;  %v1249_v21 = vpack.c.bf16 %v1189_v34, %v1173_v13 }
 0x3c9   : > { %v1190_v4 = vmul.f32 %v1186_v23, %v2769_v54  ;;  %v1185_v31 = vsel %vm571_vm4, %v1182_v46, %v1184_v14  ;;  %v1188_v0 = vsel %vm571_vm4, %v1184_v14, %v1178_v40 }
 0x3ca   : > { %v1191_v32 = vmul.f32 %v1185_v31, %v2772_v55  ;;  %v1192_v11 = vmul.f32 %v1188_v0, %v2764_v52 }
 0x3cb   : > { %v1194_v48 = vpop.permute.xlu1 %1193  ;;  %v1250_v36 = vpack.c.bf16 %v1190_v4, %v1174_v41 }
 0x3cc   : > { %v1251_v18 = vpack.c.bf16 %v1191_v32, %v1175_v17  ;;  %v1196_v20 = vpop.permute.xlu0 %1195  ;;  %v1252_v27 = vpack.c.bf16 %v1192_v11, %v1176_v22 }
 0x3cd   : > { %1285 = vmatprep.subr.bf16.mxu0 %v1250_v36  ;;  %v1203_v46 = vsel %vm609_vm6, %v1194_v48, %v1196_v20 }
 0x3ce   : > { %1286 = vmatpush1.bf16.msra.mxu0 %v1249_v21  ;;  %1326 = vmatprep.subr.bf16.mxu1 %v1252_v27  ;;  %v1205_v4 = vmul.f32 %v1203_v46, %v2832_v63 }
 0x3cf   : > { %1327 = vmatpush1.bf16.msra.mxu1 %v1251_v18  ;;  %v1198_v2 = vpop.permute.xlu1 %1197 }
 0x3d0   : > { %v1200_v40 = vpop.permute.xlu0 %1199  ;;  %v1202_v13 = vsel %vm609_vm6, %v1196_v20, %v1198_v2 }
 0x3d1   : > { %v1201_v34 = vsel %vm609_vm6, %v1198_v2, %v1200_v40  ;;  %v1204_v23 = vsel %vm609_vm6, %v1200_v40, %v1194_v48  ;;  %v1206_v17 = vmul.f32 %v1202_v13, %v2804_v38 }
 0x3d2   : > { %v1207_v48 = vmul.f32 %v1201_v34, %v2809_v45  ;;  %v1208_v36 = vmul.f32 %v1204_v23, %v2801_v37 }
 0x3d3   : > { %v1210_v28 = vpop.permute.xlu1 %1209 }
 0x3d4   : > { %v1212_v5 = vpop.permute.xlu0 %1211 }
 0x3d5   : > { %v1219_v7 = vsel %vm647_vm5, %v1210_v28, %v1212_v5 }
 0x3d6   : > { %v1221_v31 = vmul.f32 %v1219_v7, %v2814_v47 }
 0x3d7   : > { %v1214_v14 = vpop.permute.xlu1 %1213 }
 0x3d8   : > { %v1218_v0 = vsel %vm647_vm5, %v1212_v5, %v1214_v14  ;;  %v1216_v41 = vpop.permute.xlu0 %1215  ;;  %v1253_v2 = vpack.c.bf16 %v1221_v31, %v1205_v4 }
 0x3d9   : > { %v1222_v32 = vmul.f32 %v1218_v0, %v2825_v56  ;;  %v1217_v11 = vsel %vm647_vm5, %v1214_v14, %v1216_v41  ;;  %v1220_v22 = vsel %vm647_vm5, %v1216_v41, %v1210_v28 }
 0x3da   : > { %v1223_v21 = vmul.f32 %v1217_v11, %v2828_v59  ;;  %v1224_v18 = vmul.f32 %v1220_v22, %v2822_v53 }
 0x3db   : > { %v1226_v20 = vpop.permute.xlu1 %1225  ;;  %v1254_v27 = vpack.c.bf16 %v1222_v32, %v1206_v17 }
 0x3dc   : > { %v1255_v40 = vpack.c.bf16 %v1223_v21, %v1207_v48  ;;  %v1228_v5 = vpop.permute.xlu0 %1227  ;;  %v1256_v46 = vpack.c.bf16 %v1224_v18, %v1208_v36  ;;  %v2379_v21 = vld [vmem:[%s3889_s2 + $0x8] sm:$0xf] }
 0x3dd   : > { %v1235_v7 = vsel %vm685_vm7, %v1226_v20, %v1228_v5  ;;  %1287 = vmatprep.subr.bf16.mxu0 %v1254_v27 }
 0x3de   : > { %v1237_v28 = vmul.f32 %v1235_v7, %v2841_v3  ;;  %1288 = vmatpush1.bf16.msra.mxu0 %v1253_v2  ;;  %1328 = vmatprep.subr.bf16.mxu1 %v1256_v46 }
 0x3df   : > { %1329 = vmatpush1.bf16.msra.mxu1 %v1255_v40  ;;  %v1230_v13 = vpop.permute.xlu1 %1229 }
 0x3e0   : > { %v1234_v34 = vsel %vm685_vm7, %v1228_v5, %v1230_v13  ;;  %v1232_v23 = vpop.permute.xlu0 %1231  ;;  %v1257_v14 = vpack.c.bf16 %v1237_v28, %v1237_v28 }
 0x3e1   : > { %v1238_v4 = vmul.f32 %v1234_v34, %v2861_v49  ;;  %v1233_v31 = vsel %vm685_vm7, %v1230_v13, %v1232_v23  ;;  %v1236_v0 = vsel %vm685_vm7, %v1232_v23, %v1226_v20 }
 0x3e2   : > { %v1239_v41 = vmul.f32 %v1233_v31, %v2865_v6  ;;  %v1240_v17 = vmul.f32 %v1236_v0, %v2858_v39  ;;  %v1270_v48 = vsel %vm744_vm8, %v1257_v14, 0  ;;  %v847_v0 = vld [vmem:[%s3891_s4] sm:$0xff] }
 0x3e3   : > { %v1258_v32 = vpack.c.bf16 %v1238_v4, %v1238_v4 }
 0x3e4   : > { %v1259_v11 = vpack.c.bf16 %v1239_v41, %v1239_v41  ;;  %v1260_v22 = vpack.c.bf16 %v1240_v17, %v1240_v17 }
 0x3e5   : > { %2385 = vmatprep.subr.msk.bf16.mxu0 %vm744_vm8, %v1258_v32 }
 0x3e6   : > { %1290 = vmatpush1.bf16.msra.mxu0 %v1270_v48  ;;  %2387 = vmatprep.subr.msk.bf16.mxu1 %vm744_vm8, %v1260_v22  ;;  %v1276_v36 = vsel %vm744_vm8, %v1259_v11, 0 }
 0x3e7   : > { %1331 = vmatpush1.bf16.msra.mxu1 %v1276_v36 }
 0x3e9   : > { %2386 = vmatmul.mubr.msk.bf16.vlgmr.msra.gmra.mrb[8].mxu0 %vm740_vm9, %v2379_v21 }
 0x3ea   : > { %2388 = vmatmul.mubr.msk.bf16.vlgmr.msra.gmra.mrb[8].mxu1 %vm740_vm9, %v2379_v21  ;;  %1659 = vmatprep.mubr.bf16.mxu0 %v3911_v1 }
 0x3eb   : > { %1700 = vmatprep.mubr.bf16.mxu1 %v3911_v1 }
 0x3f0   : > { %v1264_v18 = vpop.permute.xlu1 %1263 }
 0x4bc   : > { %v1315_v20 = vpop.f32.mrb[8].mxu0 }
 0x4bd   : > { %v1316_v27 = vadd.f32 %v1315_v20, %v1264_v18  ;;  %v1317_v2 = vpop.f32.mrb[9].mxu0  ;;  %v1356_v40 = vpop.f32.mrb[8].mxu1 }
 0x4be   : > { %v1318_v5 = vadd.f32 %v1317_v2, %v1264_v18  ;;  %v1357_v46 = vadd.f32 %v1356_v40, %v1264_v18  ;;  %v1319_v7 = vpop.f32.mrb[10].mxu0  ;;  %v1358_v28 = vpop.f32.mrb[9].mxu1 }
 0x4bf   : > { %v1359_v13 = vadd.f32 %v1358_v28, %v1264_v18  ;;  %v1320_v34 = vpop.f32.mrb[11].mxu0  ;;  %v1360_v23 = vpop.f32.mrb[10].mxu1 }
 0x4c0   : > { %v1363_v14 = vadd.f32 %v1318_v5, %v1316_v27  ;;  %v1361_v4 = vpop.f32.mrb[11].mxu1  ;;  %v848_v34 = vld [vmem:[%s3892_s5] sm:$0x1] }
 0x4c1   : > { %v1400_v31 = vadd.f32 %v1359_v13, %v1357_v46 }
 0x4c2   : > { %1364 = vadd.xlane.f32.xlu0 %v1363_v14 }
 0x4c3   : > { %1401 = vadd.xlane.f32.xlu1 %v1400_v31 }
 0x54f   : > { %v1365_v41 = vpop.xlane.xlu0 %1364 }
 0x550   : > { %v1367_v17 = vmul.f32 0.00390625, %v1365_v41  ;;  %v1402_v32 = vpop.xlane.xlu1 %1401  ;;  %v849_v41 = vld [vmem:[%s3893_s6] sm:$0xff] }
 0x551   : > { %v1403_v11 = vmul.f32 0.00390625, %v1402_v32 }
 0x552   : > { %v1368_v22 = vmul.f32 %v1367_v17, %v847_v0 }
 0x553   : > { %v1404_v48 = vmul.f32 %v1403_v11, %v847_v0 }
 0x554   : > { %v1370_v36 = vsel %vm1369_vm10, %v1368_v22, 0.0 }
 0x555   : > { %v1371_v21 = vrot.slane %v1370_v36, 4  ;;  %v1405_v18 = vsel %vm1369_vm10, %v1404_v48, 0.0 }
 0x556   : > { %v1406_v20 = vrot.slane %v1405_v18, 4 }
 0x557   : > { %v1372_v27 = vadd.f32 %v1371_v21, %v1370_v36 }
 0x558   : > { %v1407_v2 = vadd.f32 %v1406_v20, %v1405_v18 }
 0x559   : > { %v1373_v40 = vrot.slane %v1372_v27, 2 }
 0x55a   : > { %v1408_v5 = vrot.slane %v1407_v2, 2 }
 0x55b   : > { %v1374_v46 = vadd.f32 %v1373_v40, %v1372_v27  ;;  %v850_v27 = vld [vmem:[%s3894_s7] sm:$0xff] }
 0x55c   : > { %v1409_v7 = vadd.f32 %v1408_v5, %v1407_v2 }
 0x55d   : > { %v1375_v28 = vrot.slane %v1374_v46, 1 }
 0x55e   : > { %v1410_v13 = vrot.slane %v1409_v7, 1 }
 0x55f   : > { %v1376_v23 = vadd.f32 %v1375_v28, %v1374_v46 }
 0x560   : > { %v1411_v14 = vadd.f32 %v1410_v13, %v1409_v7 }
 0x561   : > { %v1377_v4 = vadd.f32 %v1376_v23, %v848_v34 }
 0x562   : > { %v1412_v31 = vadd.f32 %v1411_v14, %v848_v34 }
 0x563   : > { %v1378_v0 = vmax.f32 %v1377_v4, 0.0 }
 0x564   : > { %v1413_v32 = vmax.f32 %v1412_v31, 0.0 }
 0x565   : > { %v1382_v22 = vrot.slane %v1378_v0, %v2630_v16 }
 0x566   : > { %v1417_v48 = vrot.slane %v1413_v32, %v2630_v16 }
 0x567   : > { %v1383_v36 = vmul.f32 %v1382_v22, %v849_v41 }
 0x568   : > { %v1418_v18 = vmul.f32 %v1417_v48, %v849_v41 }
 0x569   : > { %v1384_v21 = vsel %vm1369_vm10, %v1383_v36, 0.0 }
 0x56a   : > { %1385 = vadd.xlane.f32.xlu0 %v1384_v21  ;;  %v1419_v20 = vsel %vm1369_vm10, %v1418_v18, 0.0 }
 0x56e   : > { %1420 = vadd.xlane.f32.xlu0 %v1419_v20 }
 0x5f7   : > { %v1386_v2 = vpop.xlane.xlu0 %1385 }
 0x5f8   : > { %v1387_v40 = vadd.f32 %v1386_v2, %v850_v27 }
 0x5fa   : > { %v2389_v5 = vmul.f32 -1.442695, %v1387_v40 }
 0x5fb   : > { %v1421_v46 = vpop.xlane.xlu0 %1420 }
 0x5fc   : > { %2436 = vpow2.f32 %v2389_v5  ;;  %v1422_v7 = vadd.f32 %v1421_v46, %v850_v27 }
 0x5fe   : > { %v2390_v28 = vmul.f32 -1.442695, %v1422_v7 }
 0x600   : > { %2438 = vpow2.f32 %v2390_v28  ;;  %v3914_v28 = vld [vmem:[#allocation2_spill] sm:$0xff] }
 0x606   : > { %v2437_v13 = vpop.eup %2436 }
 0x607   : > { %v1391_v34 = vadd.f32 1.0, %v2437_v13 }
 0x609   : > { %2440 = vrcp.f32 %v1391_v34 }
 0x60a   : > { %v2439_v23 = vpop.eup %2438 }
 0x60b   : > { %v1426_v14 = vadd.f32 1.0, %v2439_v23 }
 0x60d   : > { %2442 = vrcp.f32 %v1426_v14 }
 0x613   : > { %v2441_v4 = vpop.eup %2440 }
 0x614   : > { %v1394_v31 = vmul.f32 %v2441_v4, %v1367_v17  ;;  %v3912_v17 = vld [vmem:[#allocation4_spill] sm:$0xff] }
 0x616   : > { %1397 = vperm.xlu1 %2435, %v1394_v31  }
 0x617   : > { %v2443_v0 = vpop.eup %2442 }
 0x618   : > { %v1429_v41 = vmul.f32 %v2443_v0, %v1403_v11 }
 0x61a   : > { %1432 = vperm.xlu0 %2434, %v1429_v41  }
 0x695   : > { %v1398_v32 = vpop.permute.xlu1 %1397 }
 0x696   : > { %v3286_v22 = vadd.f32 %v1398_v32, %v2889_v35  ;;  %v3291_v36 = vadd.f32 %v1398_v32, %v2895_v12  ;;  %v3915_v32 = vld [vmem:[#allocation3_spill] sm:$0xff] }
 0x698   : > { %1455 = vrot.lane.b32.xlu1 %v3286_v22, %s2460_s19 }
 0x699   : > { %v1433_v48 = vpop.permute.xlu0 %1432 }
 0x69a   : > { %v3294_v21 = vadd.f32 %v1433_v48, %v2887_v33  ;;  %v3301_v11 = vadd.f32 %v1433_v48, %v3912_v17  ;;  %v2392_v33 = vld [vmem:[%s3890_s3 + $0x18] sm:$0xff] }
 0x69c   : > { %1457 = vrot.lane.b32.xlu1 %v3291_v36, %s2460_s19  ;;  %1459 = vrot.lane.b32.xlu0 %v3294_v21, %s2460_s19  ;;  %3913 = vst [vmem:[#allocation4_spill] sm:$0xff] %v3301_v11 }
 0x6a0   : > { %1461 = vrot.lane.b32.xlu1 %v3301_v11, %s2460_s19  ;;  %1471 = vrot.lane.b32.xlu0 %v3286_v22, %s2461_s20 }
 0x6a4   : > { %1473 = vrot.lane.b32.xlu1 %v3291_v36, %s2461_s20  ;;  %1475 = vrot.lane.b32.xlu0 %v3294_v21, %s2461_s20 }
 0x6a8   : > { %1477 = vrot.lane.b32.xlu1 %v3301_v11, %s2461_s20  ;;  %1487 = vrot.lane.b32.xlu0 %v3286_v22, %s2462_s21 }
 0x6ac   : > { %1489 = vrot.lane.b32.xlu1 %v3291_v36, %s2462_s21  ;;  %1491 = vrot.lane.b32.xlu0 %v3294_v21, %s2462_s21 }
 0x6b0   : > { %1493 = vrot.lane.b32.xlu1 %v3301_v11, %s2462_s21  ;;  %1503 = vrot.lane.b32.xlu0 %v3286_v22, %s2463_s22 }
 0x6b4   : > { %1505 = vrot.lane.b32.xlu1 %v3291_v36, %s2463_s22  ;;  %1507 = vrot.lane.b32.xlu0 %v3294_v21, %s2463_s22 }
 0x6b8   : > { %1509 = vrot.lane.b32.xlu1 %v3301_v11, %s2463_s22  ;;  %1523 = vrot.lane.b32.xlu0 %v3286_v22, %s2464_s23 }
 0x6bc   : > { %1525 = vrot.lane.b32.xlu1 %v3291_v36, %s2464_s23  ;;  %1527 = vrot.lane.b32.xlu0 %v3294_v21, %s2464_s23 }
 0x6c0   : > { %1529 = vrot.lane.b32.xlu1 %v3301_v11, %s2464_s23  ;;  %1539 = vrot.lane.b32.xlu0 %v3286_v22, %s2465_s24 }
 0x6c4   : > { %1541 = vrot.lane.b32.xlu1 %v3291_v36, %s2465_s24  ;;  %1543 = vrot.lane.b32.xlu0 %v3294_v21, %s2465_s24 }
 0x6c8   : > { %1545 = vrot.lane.b32.xlu1 %v3301_v11, %s2465_s24  ;;  %1555 = vrot.lane.b32.xlu0 %v3286_v22, %s2466_s25 }
 0x6cc   : > { %1557 = vrot.lane.b32.xlu1 %v3291_v36, %s2466_s25  ;;  %1559 = vrot.lane.b32.xlu0 %v3294_v21, %s2466_s25 }
 0x6d0   : > { %1561 = vrot.lane.b32.xlu1 %v3301_v11, %s2466_s25  ;;  %1571 = vrot.lane.b32.xlu0 %v3286_v22, %s2468_s26 }
 0x6d4   : > { %1573 = vrot.lane.b32.xlu1 %v3291_v36, %s2468_s26  ;;  %1575 = vrot.lane.b32.xlu0 %v3294_v21, %s2468_s26 }
 0x6d8   : > { %1577 = vrot.lane.b32.xlu1 %v3301_v11, %s2468_s26  ;;  %1609 = vperm.xlu0 %2434, %v2392_v33  }
 0x70a   : > { %v1456_v35 = vpop.permute.xlu1 %1455 }
 0x70e   : > { %v1458_v12 = vpop.permute.xlu1 %1457  ;;  %v1460_v18 = vpop.permute.xlu0 %1459 }
 0x70f   : > { %v1465_v2 = vsel %vm394_vm0, %v1456_v35, %v1458_v12  ;;  %v1464_v4 = vsel %vm394_vm0, %v1458_v12, %v1460_v18 }
 0x710   : > { %v1468_v7 = vmul.f32 %v1465_v2, %v2638_v19  ;;  %v1469_v12 = vmul.f32 %v1464_v4, %v2662_v30 }
 0x712   : > { %v1462_v20 = vpop.permute.xlu1 %1461  ;;  %v1472_v27 = vpop.permute.xlu0 %1471 }
 0x713   : > { %v1463_v23 = vsel %vm394_vm0, %v1460_v18, %v1462_v20  ;;  %v1466_v14 = vsel %vm394_vm0, %v1462_v20, %v1456_v35 }
 0x714   : > { %v1467_v2 = vmul.f32 %v1466_v14, %v2646_v24 }
 0x716   : > { %v1474_v40 = vpop.permute.xlu1 %1473  ;;  %v1476_v5 = vpop.permute.xlu0 %1475 }
 0x717   : > { %v1481_v46 = vsel %vm432_vm1, %v1472_v27, %v1474_v40  ;;  %v1480_v34 = vsel %vm432_vm1, %v1474_v40, %v1476_v5  ;;  %v1470_v40 = vmul.f32 %v1463_v23, %v2652_v26 }
 0x718   : > { %v1484_v13 = vmul.f32 %v1481_v46, %v3914_v28  ;;  %v1485_v48 = vmul.f32 %v1480_v34, %v3915_v32 }
 0x71a   : > { %v1478_v31 = vpop.permute.xlu1 %1477  ;;  %v1488_v0 = vpop.permute.xlu0 %1487  ;;  %v1588_v41 = vpack.c.bf16 %v1484_v13, %v1468_v7  ;;  %v1589_v34 = vpack.c.bf16 %v1485_v48, %v1469_v12 }
 0x71b   : > { %v1479_v17 = vsel %vm432_vm1, %v1476_v5, %v1478_v31  ;;  %v1482_v33 = vsel %vm432_vm1, %v1478_v31, %v1472_v27 }
 0x71c   : > { %v1483_v35 = vmul.f32 %v1482_v33, %v2649_v25  ;;  %v1486_v20 = vmul.f32 %v1479_v17, %v2659_v29  ;;  %1627 = vmatprep.subr.bf16.mxu0 %v1588_v41 }
 0x71e   : > { %v1587_v18 = vpack.c.bf16 %v1483_v35, %v1467_v2  ;;  %v1490_v46 = vpop.permute.xlu1 %1489  ;;  %v1492_v7 = vpop.permute.xlu0 %1491  ;;  %v1590_v13 = vpack.c.bf16 %v1486_v20, %v1470_v40 }
 0x71f   : > { %v1497_v23 = vsel %vm470_vm2, %v1488_v0, %v1490_v46  ;;  %v1496_v40 = vsel %vm470_vm2, %v1490_v46, %v1492_v7 }
 0x720   : > { %1628 = vmatpush1.bf16.msra.mxu0 %v1587_v18  ;;  %1668 = vmatprep.subr.bf16.mxu1 %v1590_v13  ;;  %v1500_v4 = vmul.f32 %v1497_v23, %v2694_v57  ;;  %v1501_v46 = vmul.f32 %v1496_v40, %v2705_v61  ;;  %v1520_v40 = vmul.f32 %v3291_v36, %v2749_v42 }
 0x721   : > { %1669 = vmatpush1.bf16.msra.mxu1 %v1589_v34 }
 0x722   : > { %v1494_v27 = vpop.permute.xlu1 %1493  ;;  %v1504_v5 = vpop.permute.xlu0 %1503 }
 0x723   : > { %v1495_v33 = vsel %vm470_vm2, %v1492_v7, %v1494_v27  ;;  %v1498_v2 = vsel %vm470_vm2, %v1494_v27, %v1488_v0 }
 0x724   : > { %v1499_v23 = vmul.f32 %v1498_v2, %v2702_v60 }
 0x726   : > { %v1506_v14 = vpop.permute.xlu1 %1505  ;;  %v1508_v31 = vpop.permute.xlu0 %1507 }
 0x727   : > { %v1513_v41 = vsel %vm508_vm3, %v1504_v5, %v1506_v14  ;;  %v1512_v48 = vsel %vm508_vm3, %v1506_v14, %v1508_v31  ;;  %v1502_v14 = vmul.f32 %v1495_v33, %v2708_v62 }
 0x728   : > { %v1516_v17 = vmul.f32 %v1513_v41, %v2697_v58  ;;  %v1517_v18 = vmul.f32 %v1512_v48, %v2718_v9 }
 0x72a   : > { %v1510_v35 = vpop.permute.xlu1 %1509  ;;  %v1524_v20 = vpop.permute.xlu0 %1523  ;;  %v1592_v12 = vpack.c.bf16 %v1516_v17, %v1500_v4  ;;  %v1593_v48 = vpack.c.bf16 %v1517_v18, %v1501_v46 }
 0x72b   : > { %v1511_v13 = vsel %vm508_vm3, %v1508_v31, %v1510_v35  ;;  %v1514_v34 = vsel %vm508_vm3, %v1510_v35, %v1504_v5  ;;  %v1519_v31 = vmul.f32 %v3286_v22, %v2755_v44 }
 0x72c   : > { %v1515_v0 = vmul.f32 %v1514_v34, %v2715_v8  ;;  %v1518_v27 = vmul.f32 %v1511_v13, %v2725_v15  ;;  %1629 = vmatprep.subr.bf16.mxu0 %v1592_v12 }
 0x72e   : > { %v1591_v7 = vpack.c.bf16 %v1515_v0, %v1499_v23  ;;  %v1526_v41 = vpop.permute.xlu1 %1525  ;;  %v1528_v4 = vpop.permute.xlu0 %1527  ;;  %v1594_v17 = vpack.c.bf16 %v1518_v27, %v1502_v14  ;;  %v1521_v0 = vmul.f32 %v3294_v21, %v2758_v50 }
 0x72f   : > { %v1533_v5 = vsel %vm571_vm4, %v1524_v20, %v1526_v41  ;;  %v1532_v33 = vsel %vm571_vm4, %v1526_v41, %v1528_v4 }
 0x730   : > { %v1535_v2 = vmul.f32 %v1533_v5, %v2761_v51  ;;  %v1536_v35 = vmul.f32 %v1532_v33, %v2769_v54  ;;  %1630 = vmatpush1.bf16.msra.mxu0 %v1591_v7  ;;  %1670 = vmatprep.subr.bf16.mxu1 %v1594_v17  ;;  %v1522_v7 = vmul.f32 %v3301_v11, %v2752_v43 }
 0x731   : > { %1671 = vmatpush1.bf16.msra.mxu1 %v1593_v48 }
 0x732   : > { %v1595_v12 = vpack.c.bf16 %v1535_v2, %v1519_v31  ;;  %v1530_v18 = vpop.permute.xlu1 %1529  ;;  %v1540_v13 = vpop.permute.xlu0 %1539  ;;  %v1596_v34 = vpack.c.bf16 %v1536_v35, %v1520_v40 }
 0x733   : > { %v1531_v23 = vsel %vm571_vm4, %v1528_v4, %v1530_v18  ;;  %v1534_v14 = vsel %vm571_vm4, %v1530_v18, %v1524_v20 }
 0x734   : > { %v1537_v27 = vmul.f32 %v1531_v23, %v2772_v55  ;;  %v1538_v46 = vmul.f32 %v1534_v14, %v2764_v52  ;;  %1631 = vmatprep.subr.bf16.mxu0 %v1596_v34 }
 0x735   : > { %1632 = vmatpush1.bf16.msra.mxu0 %v1595_v12 }
 0x736   : > { %v1597_v41 = vpack.c.bf16 %v1537_v27, %v1521_v0  ;;  %v1542_v17 = vpop.permute.xlu1 %1541  ;;  %v1544_v48 = vpop.permute.xlu0 %1543  ;;  %v1598_v31 = vpack.c.bf16 %v1538_v46, %v1522_v7 }
 0x737   : > { %v1549_v5 = vsel %vm609_vm6, %v1540_v13, %v1542_v17  ;;  %v1548_v33 = vsel %vm609_vm6, %v1542_v17, %v1544_v48 }
 0x738   : > { %1672 = vmatprep.subr.bf16.mxu1 %v1598_v31  ;;  %v1551_v18 = vmul.f32 %v1549_v5, %v2832_v63  ;;  %v1552_v34 = vmul.f32 %v1548_v33, %v2804_v38 }
 0x739   : > { %1673 = vmatpush1.bf16.msra.mxu1 %v1597_v41 }
 0x73a   : > { %v1546_v4 = vpop.permute.xlu1 %1545  ;;  %v1556_v20 = vpop.permute.xlu0 %1555 }
 0x73b   : > { %v1547_v0 = vsel %vm609_vm6, %v1544_v48, %v1546_v4  ;;  %v1550_v27 = vsel %vm609_vm6, %v1546_v4, %v1540_v13 }
 0x73c   : > { %v1553_v33 = vmul.f32 %v1547_v0, %v2809_v45 }
 0x73e   : > { %v1558_v2 = vpop.permute.xlu1 %1557  ;;  %v1560_v35 = vpop.permute.xlu0 %1559 }
 0x73f   : > { %v1565_v40 = vsel %vm647_vm5, %v1556_v20, %v1558_v2  ;;  %v1564_v12 = vsel %vm647_vm5, %v1558_v2, %v1560_v35  ;;  %v1554_v2 = vmul.f32 %v1550_v27, %v2801_v37 }
 0x740   : > { %v1567_v23 = vmul.f32 %v1565_v40, %v2814_v47  ;;  %v1568_v14 = vmul.f32 %v1564_v12, %v2825_v56 }
 0x742   : > { %v1599_v46 = vpack.c.bf16 %v1567_v23, %v1551_v18  ;;  %v1562_v7 = vpop.permute.xlu1 %1561  ;;  %v1572_v41 = vpop.permute.xlu0 %1571  ;;  %v1600_v17 = vpack.c.bf16 %v1568_v14, %v1552_v34 }
 0x743   : > { %v1563_v31 = vsel %vm647_vm5, %v1560_v35, %v1562_v7  ;;  %v1566_v5 = vsel %vm647_vm5, %v1562_v7, %v1556_v20 }
 0x744   : > { %v1569_v40 = vmul.f32 %v1563_v31, %v2828_v59  ;;  %v1570_v48 = vmul.f32 %v1566_v5, %v2822_v53  ;;  %1633 = vmatprep.subr.bf16.mxu0 %v1600_v17 }
 0x745   : > { %1634 = vmatpush1.bf16.msra.mxu0 %v1599_v46 }
 0x746   : > { %v1601_v13 = vpack.c.bf16 %v1569_v40, %v1553_v33  ;;  %v1574_v4 = vpop.permute.xlu1 %1573  ;;  %v1576_v12 = vpop.permute.xlu0 %1575  ;;  %v1602_v18 = vpack.c.bf16 %v1570_v48, %v1554_v2  ;;  %v2391_v33 = vld [vmem:[%s3889_s2 + $0xc] sm:$0xf] }
 0x747   : > { %v1581_v35 = vsel %vm685_vm7, %v1572_v41, %v1574_v4  ;;  %v1580_v20 = vsel %vm685_vm7, %v1574_v4, %v1576_v12 }
 0x748   : > { %v1583_v34 = vmul.f32 %v1581_v35, %v2841_v3  ;;  %v1584_v23 = vmul.f32 %v1580_v20, %v2861_v49  ;;  %1674 = vmatprep.subr.bf16.mxu1 %v1602_v18 }
 0x749   : > { %1675 = vmatpush1.bf16.msra.mxu1 %v1601_v13 }
 0x74a   : > { %v1603_v14 = vpack.c.bf16 %v1583_v34, %v1583_v34  ;;  %v1604_v0 = vpack.c.bf16 %v1584_v23, %v1584_v23  ;;  %v1578_v27 = vpop.permute.xlu1 %1577 }
 0x74b   : > { %v1579_v46 = vsel %vm685_vm7, %v1576_v12, %v1578_v27  ;;  %v1582_v7 = vsel %vm685_vm7, %v1578_v27, %v1572_v41 }
 0x74c   : > { %v1585_v17 = vmul.f32 %v1579_v46, %v2865_v6  ;;  %v1586_v31 = vmul.f32 %v1582_v7, %v2858_v39  ;;  %2399 = vmatprep.subr.msk.bf16.mxu0 %vm744_vm8, %v1604_v0  ;;  %v1616_v5 = vsel %vm744_vm8, %v1603_v14, 0 }
 0x74d   : > { %1636 = vmatpush1.bf16.msra.mxu0 %v1616_v5 }
 0x74e   : > { %v1605_v2 = vpack.c.bf16 %v1585_v17, %v1585_v17  ;;  %v1606_v40 = vpack.c.bf16 %v1586_v31, %v1586_v31 }
 0x750   : > { %2400 = vmatmul.mubr.msk.bf16.vlgmr.msra.gmra.mrb[12].mxu0 %vm740_vm9, %v2391_v33  ;;  %2401 = vmatprep.subr.msk.bf16.mxu1 %vm744_vm8, %v1606_v40  ;;  %v1622_v41 = vsel %vm744_vm8, %v1605_v2, 0 }
 0x751   : > { %1677 = vmatpush1.bf16.msra.mxu1 %v1622_v41  ;;  %1917 = vmatprep.mubr.bf16.mxu0 %v3911_v1 }
 0x754   : > { %2402 = vmatmul.mubr.msk.bf16.vlgmr.msra.gmra.mrb[12].mxu1 %vm740_vm9, %v2391_v33  ;;  %v2394_v33 = vld [vmem:[%s3890_s3 + $0x20] sm:$0xff] }
 0x755   : > { %1958 = vmatprep.mubr.bf16.mxu1 %v3911_v1 }
 0x757   : > { %v1610_v48 = vpop.permute.xlu0 %1609 }
 0x823   : > { %v1661_v13 = vpop.f32.mrb[12].mxu0 }
 0x824   : > { %v1662_v4 = vadd.f32 %v1661_v13, %v1610_v48  ;;  %v1663_v12 = vpop.f32.mrb[13].mxu0 }
 0x825   : > { %v1664_v18 = vadd.f32 %v1663_v12, %v1610_v48  ;;  %v1665_v35 = vpop.f32.mrb[14].mxu0 }
 0x826   : > { %v3479_v20 = vmax.f32 %v1662_v4, 0.0  ;;  %v1666_v34 = vpop.f32.mrb[15].mxu0 }
 0x827   : > { %v3481_v23 = vmax.f32 %v1664_v18, 0.0  ;;  %v1702_v14 = vpop.f32.mrb[12].mxu1 }
 0x828   : > { %v1703_v0 = vadd.f32 %v1702_v14, %v1610_v48  ;;  %1713 = vrot.lane.b32.xlu1 %v3479_v20, %s2460_s19  ;;  %v1704_v27 = vpop.f32.mrb[13].mxu1 }
 0x829   : > { %v1705_v46 = vadd.f32 %v1704_v27, %v1610_v48  ;;  %1715 = vrot.lane.b32.xlu0 %v3481_v23, %s2460_s19  ;;  %v1706_v7 = vpop.f32.mrb[14].mxu1 }
 0x82a   : > { %v3487_v17 = vmax.f32 %v1703_v0, 0.0  ;;  %v1707_v31 = vpop.f32.mrb[15].mxu1 }
 0x82b   : > { %v3489_v5 = vmax.f32 %v1705_v46, 0.0 }
 0x82c   : > { %1717 = vrot.lane.b32.xlu1 %v3487_v17, %s2460_s19 }
 0x82d   : > { %1719 = vrot.lane.b32.xlu0 %v3489_v5, %s2460_s19 }
 0x830   : > { %1729 = vrot.lane.b32.xlu1 %v3479_v20, %s2461_s20 }
 0x831   : > { %1731 = vrot.lane.b32.xlu0 %v3481_v23, %s2461_s20 }
 0x834   : > { %1733 = vrot.lane.b32.xlu1 %v3487_v17, %s2461_s20 }
 0x835   : > { %1735 = vrot.lane.b32.xlu0 %v3489_v5, %s2461_s20 }
 0x838   : > { %1745 = vrot.lane.b32.xlu1 %v3479_v20, %s2462_s21 }
 0x839   : > { %1747 = vrot.lane.b32.xlu0 %v3481_v23, %s2462_s21 }
 0x83c   : > { %1749 = vrot.lane.b32.xlu1 %v3487_v17, %s2462_s21 }
 0x83d   : > { %1751 = vrot.lane.b32.xlu0 %v3489_v5, %s2462_s21 }
 0x840   : > { %1761 = vrot.lane.b32.xlu1 %v3479_v20, %s2463_s22 }
 0x841   : > { %1763 = vrot.lane.b32.xlu0 %v3481_v23, %s2463_s22 }
 0x844   : > { %1765 = vrot.lane.b32.xlu1 %v3487_v17, %s2463_s22 }
 0x845   : > { %1767 = vrot.lane.b32.xlu0 %v3489_v5, %s2463_s22 }
 0x848   : > { %1781 = vrot.lane.b32.xlu1 %v3479_v20, %s2464_s23 }
 0x849   : > { %1783 = vrot.lane.b32.xlu0 %v3481_v23, %s2464_s23 }
 0x84c   : > { %1785 = vrot.lane.b32.xlu1 %v3487_v17, %s2464_s23 }
 0x84d   : > { %1787 = vrot.lane.b32.xlu0 %v3489_v5, %s2464_s23 }
 0x850   : > { %1797 = vrot.lane.b32.xlu1 %v3479_v20, %s2465_s24 }
 0x851   : > { %1799 = vrot.lane.b32.xlu0 %v3481_v23, %s2465_s24 }
 0x854   : > { %1801 = vrot.lane.b32.xlu1 %v3487_v17, %s2465_s24 }
 0x855   : > { %1803 = vrot.lane.b32.xlu0 %v3489_v5, %s2465_s24 }
 0x858   : > { %1813 = vrot.lane.b32.xlu1 %v3479_v20, %s2466_s25 }
 0x859   : > { %1815 = vrot.lane.b32.xlu0 %v3481_v23, %s2466_s25 }
 0x85c   : > { %1817 = vrot.lane.b32.xlu1 %v3487_v17, %s2466_s25 }
 0x85d   : > { %1819 = vrot.lane.b32.xlu0 %v3489_v5, %s2466_s25 }
 0x860   : > { %1829 = vrot.lane.b32.xlu1 %v3479_v20, %s2468_s26 }
 0x861   : > { %1831 = vrot.lane.b32.xlu0 %v3481_v23, %s2468_s26 }
 0x864   : > { %1833 = vrot.lane.b32.xlu1 %v3487_v17, %s2468_s26 }
 0x865   : > { %1835 = vrot.lane.b32.xlu0 %v3489_v5, %s2468_s26 }
 0x868   : > { %1867 = vperm.xlu1 %2435, %v2394_v33  }
 0x89a   : > { %v1714_v2 = vpop.permute.xlu1 %1713 }
 0x89b   : > { %v1716_v40 = vpop.permute.xlu0 %1715 }
 0x89c   : > { %v1723_v13 = vsel %vm394_vm0, %v1714_v2, %v1716_v40 }
 0x89d   : > { %v1726_v35 = vmul.f32 %v1723_v13, %v2638_v19 }
 0x89e   : > { %v1718_v41 = vpop.permute.xlu1 %1717 }
 0x89f   : > { %v1720_v48 = vpop.permute.xlu0 %1719  ;;  %v1722_v46 = vsel %vm394_vm0, %v1716_v40, %v1718_v41 }
 0x8a0   : > { %v1721_v14 = vsel %vm394_vm0, %v1718_v41, %v1720_v48  ;;  %v1724_v0 = vsel %vm394_vm0, %v1720_v48, %v1714_v2  ;;  %v1727_v41 = vmul.f32 %v1722_v46, %v2662_v30 }
 0x8a1   : > { %v1728_v2 = vmul.f32 %v1721_v14, %v2652_v26 }
 0x8a2   : > { %v1730_v4 = vpop.permute.xlu1 %1729 }
 0x8a3   : > { %v1732_v12 = vpop.permute.xlu0 %1731 }
 0x8a4   : > { %v1739_v18 = vsel %vm432_vm1, %v1730_v4, %v1732_v12 }
 0x8a5   : > { %v1742_v34 = vmul.f32 %v1739_v18, %v3914_v28  ;;  %v1725_v28 = vmul.f32 %v1724_v0, %v2646_v24 }
 0x8a6   : > { %v1734_v27 = vpop.permute.xlu1 %1733 }
 0x8a7   : > { %v1738_v7 = vsel %vm432_vm1, %v1732_v12, %v1734_v27  ;;  %v1736_v31 = vpop.permute.xlu0 %1735  ;;  %v1846_v33 = vpack.c.bf16 %v1742_v34, %v1726_v35 }
 0x8a8   : > { %v1743_v11 = vmul.f32 %v1738_v7, %v3915_v32  ;;  %v1737_v13 = vsel %vm432_vm1, %v1734_v27, %v1736_v31  ;;  %v1740_v18 = vsel %vm432_vm1, %v1736_v31, %v1730_v4 }
 0x8a9   : > { %v1741_v48 = vmul.f32 %v1740_v18, %v2649_v25  ;;  %v1744_v40 = vmul.f32 %v1737_v13, %v2659_v29  ;;  %1885 = vmatprep.subr.bf16.mxu0 %v1846_v33 }
 0x8aa   : > { %v1746_v12 = vpop.permute.xlu1 %1745  ;;  %v1847_v32 = vpack.c.bf16 %v1743_v11, %v1727_v41 }
 0x8ab   : > { %v1845_v35 = vpack.c.bf16 %v1741_v48, %v1725_v28  ;;  %v1748_v34 = vpop.permute.xlu0 %1747  ;;  %v1848_v7 = vpack.c.bf16 %v1744_v40, %v1728_v2 }
 0x8ac   : > { %v1755_v14 = vsel %vm470_vm2, %v1746_v12, %v1748_v34 }
 0x8ad   : > { %1886 = vmatpush1.bf16.msra.mxu0 %v1845_v35  ;;  %1926 = vmatprep.subr.bf16.mxu1 %v1848_v7  ;;  %v1758_v46 = vmul.f32 %v1755_v14, %v2694_v57 }
 0x8ae   : > { %1927 = vmatpush1.bf16.msra.mxu1 %v1847_v32  ;;  %v1750_v4 = vpop.permute.xlu1 %1749 }
 0x8af   : > { %v1752_v27 = vpop.permute.xlu0 %1751  ;;  %v1754_v18 = vsel %vm470_vm2, %v1748_v34, %v1750_v4 }
 0x8b0   : > { %v1753_v11 = vsel %vm470_vm2, %v1750_v4, %v1752_v27  ;;  %v1756_v32 = vsel %vm470_vm2, %v1752_v27, %v1746_v12  ;;  %v1759_v4 = vmul.f32 %v1754_v18, %v2705_v61 }
 0x8b1   : > { %v1757_v14 = vmul.f32 %v1756_v32, %v2702_v60  ;;  %v1760_v12 = vmul.f32 %v1753_v11, %v2708_v62  ;;  %v1777_v11 = vmul.f32 %v3479_v20, %v2755_v44  ;;  %v1779_v20 = vmul.f32 %v3487_v17, %v2758_v50 }
 0x8b2   : > { %v1762_v0 = vpop.permute.xlu1 %1761 }
 0x8b3   : > { %v1764_v31 = vpop.permute.xlu0 %1763 }
 0x8b4   : > { %v1771_v33 = vsel %vm508_vm3, %v1762_v0, %v1764_v31 }
 0x8b5   : > { %v1774_v28 = vmul.f32 %v1771_v33, %v2697_v58 }
 0x8b6   : > { %v1766_v13 = vpop.permute.xlu1 %1765 }
 0x8b7   : > { %v1770_v2 = vsel %vm508_vm3, %v1764_v31, %v1766_v13  ;;  %v1768_v48 = vpop.permute.xlu0 %1767  ;;  %v1850_v40 = vpack.c.bf16 %v1774_v28, %v1758_v46 }
 0x8b8   : > { %v1775_v41 = vmul.f32 %v1770_v2, %v2718_v9  ;;  %v1769_v35 = vsel %vm508_vm3, %v1766_v13, %v1768_v48  ;;  %v1772_v7 = vsel %vm508_vm3, %v1768_v48, %v1762_v0 }
 0x8b9   : > { %v1773_v27 = vmul.f32 %v1772_v7, %v2715_v8  ;;  %v1776_v34 = vmul.f32 %v1769_v35, %v2725_v15  ;;  %1887 = vmatprep.subr.bf16.mxu0 %v1850_v40  ;;  %v1778_v7 = vmul.f32 %v3481_v23, %v2749_v42 }
 0x8ba   : > { %v1782_v31 = vpop.permute.xlu1 %1781  ;;  %v1851_v2 = vpack.c.bf16 %v1775_v41, %v1759_v4 }
 0x8bb   : > { %v1849_v33 = vpack.c.bf16 %v1773_v27, %v1757_v14  ;;  %v1784_v46 = vpop.permute.xlu0 %1783  ;;  %v1852_v28 = vpack.c.bf16 %v1776_v34, %v1760_v12  ;;  %v1780_v27 = vmul.f32 %v3489_v5, %v2752_v43 }
 0x8bc   : > { %v1791_v13 = vsel %vm571_vm4, %v1782_v31, %v1784_v46 }
 0x8bd   : > { %1888 = vmatpush1.bf16.msra.mxu0 %v1849_v33  ;;  %1928 = vmatprep.subr.bf16.mxu1 %v1852_v28  ;;  %v1793_v32 = vmul.f32 %v1791_v13, %v2761_v51 }
 0x8be   : > { %1929 = vmatpush1.bf16.msra.mxu1 %v1851_v2  ;;  %v1786_v0 = vpop.permute.xlu1 %1785 }
 0x8bf   : > { %v1790_v18 = vsel %vm571_vm4, %v1784_v46, %v1786_v0  ;;  %v1788_v48 = vpop.permute.xlu0 %1787  ;;  %v1853_v33 = vpack.c.bf16 %v1793_v32, %v1777_v11 }
 0x8c0   : > { %v1794_v40 = vmul.f32 %v1790_v18, %v2769_v54  ;;  %v1789_v41 = vsel %vm571_vm4, %v1786_v0, %v1788_v48  ;;  %v1792_v35 = vsel %vm571_vm4, %v1788_v48, %v1782_v31 }
 0x8c1   : > { %v1795_v14 = vmul.f32 %v1789_v41, %v2772_v55  ;;  %v1796_v12 = vmul.f32 %v1792_v35, %v2764_v52 }
 0x8c2   : > { %v1798_v34 = vpop.permute.xlu1 %1797  ;;  %v1854_v4 = vpack.c.bf16 %v1794_v40, %v1778_v7 }
 0x8c3   : > { %v1855_v46 = vpack.c.bf16 %v1795_v14, %v1779_v20  ;;  %v1800_v28 = vpop.permute.xlu0 %1799  ;;  %v1856_v2 = vpack.c.bf16 %v1796_v12, %v1780_v27 }
 0x8c4   : > { %1889 = vmatprep.subr.bf16.mxu0 %v1854_v4  ;;  %v1807_v0 = vsel %vm609_vm6, %v1798_v34, %v1800_v28 }
 0x8c5   : > { %1890 = vmatpush1.bf16.msra.mxu0 %v1853_v33  ;;  %1930 = vmatprep.subr.bf16.mxu1 %v1856_v2  ;;  %v1809_v40 = vmul.f32 %v1807_v0, %v2832_v63 }
 0x8c6   : > { %v1802_v23 = vpop.permute.xlu1 %1801  ;;  %1931 = vmatpush1.bf16.msra.mxu1 %v1855_v46 }
 0x8c7   : > { %v1804_v31 = vpop.permute.xlu0 %1803  ;;  %v1806_v11 = vsel %vm609_vm6, %v1800_v28, %v1802_v23 }
 0x8c8   : > { %v1805_v32 = vsel %vm609_vm6, %v1802_v23, %v1804_v31  ;;  %v1808_v18 = vsel %vm609_vm6, %v1804_v31, %v1798_v34  ;;  %v1810_v20 = vmul.f32 %v1806_v11, %v2804_v38 }
 0x8c9   : > { %v1811_v34 = vmul.f32 %v1805_v32, %v2809_v45  ;;  %v1812_v4 = vmul.f32 %v1808_v18, %v2801_v37 }
 0x8ca   : > { %v1814_v17 = vpop.permute.xlu1 %1813 }
 0x8cb   : > { %v1816_v13 = vpop.permute.xlu0 %1815 }
 0x8cc   : > { %v1823_v5 = vsel %vm647_vm5, %v1814_v17, %v1816_v13 }
 0x8cd   : > { %v1825_v41 = vmul.f32 %v1823_v5, %v2814_v47 }
 0x8ce   : > { %v1818_v48 = vpop.permute.xlu1 %1817 }
 0x8cf   : > { %v1822_v35 = vsel %vm647_vm5, %v1816_v13, %v1818_v48  ;;  %v1820_v7 = vpop.permute.xlu0 %1819  ;;  %v1857_v23 = vpack.c.bf16 %v1825_v41, %v1809_v40 }
 0x8d0   : > { %v1826_v14 = vmul.f32 %v1822_v35, %v2825_v56  ;;  %v1821_v12 = vsel %vm647_vm5, %v1818_v48, %v1820_v7  ;;  %v1824_v27 = vsel %vm647_vm5, %v1820_v7, %v1814_v17 }
 0x8d1   : > { %v1827_v33 = vmul.f32 %v1821_v12, %v2828_v59  ;;  %v1828_v46 = vmul.f32 %v1824_v27, %v2822_v53 }
 0x8d2   : > { %v1830_v28 = vpop.permute.xlu1 %1829  ;;  %v1858_v2 = vpack.c.bf16 %v1826_v14, %v1810_v20 }
 0x8d3   : > { %v1859_v31 = vpack.c.bf16 %v1827_v33, %v1811_v34  ;;  %v1832_v13 = vpop.permute.xlu0 %1831  ;;  %v1860_v0 = vpack.c.bf16 %v1828_v46, %v1812_v4  ;;  %v2393_v33 = vld [vmem:[%s3889_s2 + $0x10] sm:$0xf] }
 0x8d4   : > { %v1839_v5 = vsel %vm685_vm7, %v1830_v28, %v1832_v13  ;;  %1891 = vmatprep.subr.bf16.mxu0 %v1858_v2 }
 0x8d5   : > { %v1841_v17 = vmul.f32 %v1839_v5, %v2841_v3  ;;  %1892 = vmatpush1.bf16.msra.mxu0 %v1857_v23  ;;  %1932 = vmatprep.subr.bf16.mxu1 %v1860_v0 }
 0x8d6   : > { %v1834_v11 = vpop.permute.xlu1 %1833  ;;  %1933 = vmatpush1.bf16.msra.mxu1 %v1859_v31 }
 0x8d7   : > { %v1838_v32 = vsel %vm685_vm7, %v1832_v13, %v1834_v11  ;;  %v1836_v18 = vpop.permute.xlu0 %1835  ;;  %v1861_v48 = vpack.c.bf16 %v1841_v17, %v1841_v17 }
 0x8d8   : > { %v1842_v40 = vmul.f32 %v1838_v32, %v2861_v49  ;;  %v1837_v41 = vsel %vm685_vm7, %v1834_v11, %v1836_v18  ;;  %v1840_v35 = vsel %vm685_vm7, %v1836_v18, %v1830_v28 }
 0x8d9   : > { %v1843_v7 = vmul.f32 %v1837_v41, %v2865_v6  ;;  %v1844_v20 = vmul.f32 %v1840_v35, %v2858_v39  ;;  %v1874_v34 = vsel %vm744_vm8, %v1861_v48, 0 }
 0x8da   : > { %v1862_v14 = vpack.c.bf16 %v1842_v40, %v1842_v40 }
 0x8db   : > { %v1863_v12 = vpack.c.bf16 %v1843_v7, %v1843_v7  ;;  %v1864_v27 = vpack.c.bf16 %v1844_v20, %v1844_v20 }
 0x8dc   : > { %2403 = vmatprep.subr.msk.bf16.mxu0 %vm744_vm8, %v1862_v14 }
 0x8dd   : > { %1894 = vmatpush1.bf16.msra.mxu0 %v1874_v34  ;;  %2405 = vmatprep.subr.msk.bf16.mxu1 %vm744_vm8, %v1864_v27  ;;  %v1880_v4 = vsel %vm744_vm8, %v1863_v12, 0 }
 0x8de   : > { %1935 = vmatpush1.bf16.msra.mxu1 %v1880_v4 }
 0x8e0   : > { %2404 = vmatmul.mubr.msk.bf16.vlgmr.msra.gmra.mrb[16].mxu0 %vm740_vm9, %v2393_v33 }
 0x8e1   : > { %2406 = vmatmul.mubr.msk.bf16.vlgmr.msra.gmra.mrb[16].mxu1 %vm740_vm9, %v2393_v33  ;;  %2247 = vmatprep.mubr.bf16.mxu0 %v3911_v1 }
 0x8e2   : > { %2288 = vmatprep.mubr.bf16.mxu1 %v3911_v1  ;;  %v2395_v1 = vld [vmem:[%s3891_s4 + $0x8] sm:$0xff] }
 0x8e7   : > { %v1868_v46 = vpop.permute.xlu1 %1867 }
 0x9b3   : > { %v1919_v28 = vpop.f32.mrb[16].mxu0 }
 0x9b4   : > { %v1920_v2 = vadd.f32 %v1919_v28, %v1868_v46  ;;  %v1921_v23 = vpop.f32.mrb[17].mxu0  ;;  %v1960_v31 = vpop.f32.mrb[16].mxu1 }
 0x9b5   : > { %v1922_v13 = vadd.f32 %v1921_v23, %v1868_v46  ;;  %v1961_v0 = vadd.f32 %v1960_v31, %v1868_v46  ;;  %v1923_v5 = vpop.f32.mrb[18].mxu0  ;;  %v1962_v17 = vpop.f32.mrb[17].mxu1 }
 0x9b6   : > { %v1963_v11 = vadd.f32 %v1962_v17, %v1868_v46  ;;  %v1924_v32 = vpop.f32.mrb[19].mxu0  ;;  %v1964_v18 = vpop.f32.mrb[18].mxu1 }
 0x9b7   : > { %v1967_v48 = vadd.f32 %v1922_v13, %v1920_v2  ;;  %v1965_v40 = vpop.f32.mrb[19].mxu1 }
 0x9b8   : > { %v2002_v41 = vadd.f32 %v1963_v11, %v1961_v0  ;;  %v2396_v11 = vld [vmem:[%s3892_s5 + $0x1] sm:$0x1] }
 0x9b9   : > { %1968 = vadd.xlane.f32.xlu0 %v1967_v48 }
 0x9ba   : > { %2003 = vadd.xlane.f32.xlu1 %v2002_v41 }
 0xa46   : > { %v1969_v35 = vpop.xlane.xlu0 %1968 }
 0xa47   : > { %v1970_v7 = vmul.f32 0.00390625, %v1969_v35  ;;  %v2004_v20 = vpop.xlane.xlu1 %2003 }
 0xa48   : > { %v2005_v14 = vmul.f32 0.00390625, %v2004_v20 }
 0xa49   : > { %v1971_v12 = vmul.f32 %v2395_v1, %v1970_v7 }
 0xa4a   : > { %v2006_v27 = vmul.f32 %v2395_v1, %v2005_v14  ;;  %v2397_v1 = vld [vmem:[%s3893_s6 + $0x8] sm:$0xff] }
 0xa4b   : > { %v1972_v34 = vsel %vm1369_vm10, %v1971_v12, 0.0 }
 0xa4c   : > { %v1973_v4 = vrot.slane %v1972_v34, 4  ;;  %v2007_v33 = vsel %vm1369_vm10, %v2006_v27, 0.0 }
 0xa4d   : > { %v2008_v46 = vrot.slane %v2007_v33, 4 }
 0xa4e   : > { %v1974_v28 = vadd.f32 %v1973_v4, %v1972_v34 }
 0xa4f   : > { %v2009_v2 = vadd.f32 %v2008_v46, %v2007_v33  ;;  %v2398_v46 = vld [vmem:[%s3894_s7 + $0x8] sm:$0xff] }
 0xa50   : > { %v1975_v23 = vrot.slane %v1974_v28, 2 }
 0xa51   : > { %v2010_v31 = vrot.slane %v2009_v2, 2 }
 0xa52   : > { %v1976_v13 = vadd.f32 %v1975_v23, %v1974_v28 }
 0xa53   : > { %v2011_v0 = vadd.f32 %v2010_v31, %v2009_v2 }
 0xa54   : > { %v1977_v5 = vrot.slane %v1976_v13, 1 }
 0xa55   : > { %v2012_v17 = vrot.slane %v2011_v0, 1 }
 0xa56   : > { %v1978_v32 = vadd.f32 %v1977_v5, %v1976_v13 }
 0xa57   : > { %v2013_v18 = vadd.f32 %v2012_v17, %v2011_v0 }
 0xa58   : > { %v1979_v48 = vadd.f32 %v2396_v11, %v1978_v32 }
 0xa59   : > { %v2014_v40 = vadd.f32 %v2396_v11, %v2013_v18 }
 0xa5a   : > { %v1980_v41 = vmax.f32 %v1979_v48, 0.0 }
 0xa5b   : > { %v2015_v35 = vmax.f32 %v2014_v40, 0.0 }
 0xa5c   : > { %v1984_v20 = vrot.slane %v1980_v41, %v2630_v16 }
 0xa5d   : > { %v2019_v12 = vrot.slane %v2015_v35, %v2630_v16 }
 0xa5e   : > { %v1985_v27 = vmul.f32 %v2397_v1, %v1984_v20 }
 0xa5f   : > { %v2020_v4 = vmul.f32 %v2397_v1, %v2019_v12 }
 0xa60   : > { %v1986_v34 = vsel %vm1369_vm10, %v1985_v27, 0.0 }
 0xa61   : > { %1987 = vadd.xlane.f32.xlu0 %v1986_v34  ;;  %v2021_v33 = vsel %vm1369_vm10, %v2020_v4, 0.0 }
 0xa65   : > { %2022 = vadd.xlane.f32.xlu0 %v2021_v33 }
 0xaee   : > { %v1988_v28 = vpop.xlane.xlu0 %1987 }
 0xaef   : > { %v1989_v2 = vadd.f32 %v2398_v46, %v1988_v28 }
 0xaf1   : > { %v2407_v23 = vmul.f32 -1.442695, %v1989_v2 }
 0xaf2   : > { %v2023_v31 = vpop.xlane.xlu0 %2022 }
 0xaf3   : > { %2444 = vpow2.f32 %v2407_v23  ;;  %v2024_v13 = vadd.f32 %v2398_v46, %v2023_v31 }
 0xaf5   : > { %v2408_v0 = vmul.f32 -1.442695, %v2024_v13  ;;  %v3917_v13 = vld [vmem:[#allocation2_spill] sm:$0xff] }
 0xaf7   : > { %2446 = vpow2.f32 %v2408_v0 }
 0xafd   : > { %v2445_v16 = vpop.eup %2444 }
 0xafe   : > { %v1993_v5 = vadd.f32 1.0, %v2445_v16 }
 0xb00   : > { %2448 = vrcp.f32 %v1993_v5 }
 0xb01   : > { %v2447_v17 = vpop.eup %2446 }
 0xb02   : > { %v2028_v11 = vadd.f32 1.0, %v2447_v17 }
 0xb04   : > { %2450 = vrcp.f32 %v2028_v11 }
 0xb0a   : > { %v2449_v32 = vpop.eup %2448 }
 0xb0b   : > { %v1996_v18 = vmul.f32 %v2449_v32, %v1970_v7  ;;  %v3916_v7 = vld [vmem:[#allocation4_spill] sm:$0xff] }
 0xb0d   : > { %1999 = vperm.xlu1 %2435, %v1996_v18  }
 0xb0e   : > { %v2451_v48 = vpop.eup %2450 }
 0xb0f   : > { %v2031_v40 = vmul.f32 %v2451_v48, %v2005_v14  ;;  %v3918_v48 = vld [vmem:[#allocation3_spill] sm:$0xff] }
 0xb11   : > { %2034 = vperm.xlu0 %2434, %v2031_v40  }
 0xb8c   : > { %v2000_v41 = vpop.permute.xlu1 %1999 }
 0xb8d   : > { %v3688_v1 = vadd.f32 %v2000_v41, %v3286_v22  ;;  %v3693_v20 = vadd.f32 %v2000_v41, %v3291_v36  ;;  %v2042_v22 = vld [vmem:[%s3896_s9] sm:$0xff] }
 0xb8f   : > { %2043 = vrot.lane.b32.xlu1 %v3688_v1, %s2460_s19 }
 0xb90   : > { %v2035_v35 = vpop.permute.xlu0 %2034 }
 0xb91   : > { %v3696_v12 = vadd.f32 %v2035_v35, %v3294_v21  ;;  %v3703_v14 = vadd.f32 %v2035_v35, %v3916_v7 }
 0xb93   : > { %2047 = vrot.lane.b32.xlu0 %v3696_v12, %s2460_s19  ;;  %2045 = vrot.lane.b32.xlu1 %v3693_v20, %s2460_s19 }
 0xb97   : > { %2059 = vrot.lane.b32.xlu0 %v3688_v1, %s2461_s20  ;;  %2049 = vrot.lane.b32.xlu1 %v3703_v14, %s2460_s19 }
 0xb9b   : > { %2063 = vrot.lane.b32.xlu0 %v3696_v12, %s2461_s20  ;;  %2061 = vrot.lane.b32.xlu1 %v3693_v20, %s2461_s20 }
 0xb9f   : > { %2075 = vrot.lane.b32.xlu0 %v3688_v1, %s2462_s21  ;;  %2065 = vrot.lane.b32.xlu1 %v3703_v14, %s2461_s20 }
 0xba3   : > { %2079 = vrot.lane.b32.xlu0 %v3696_v12, %s2462_s21  ;;  %2077 = vrot.lane.b32.xlu1 %v3693_v20, %s2462_s21 }
 0xba7   : > { %2091 = vrot.lane.b32.xlu0 %v3688_v1, %s2463_s22  ;;  %2081 = vrot.lane.b32.xlu1 %v3703_v14, %s2462_s21 }
 0xbab   : > { %2095 = vrot.lane.b32.xlu0 %v3696_v12, %s2463_s22  ;;  %2093 = vrot.lane.b32.xlu1 %v3693_v20, %s2463_s22 }
 0xbaf   : > { %2111 = vrot.lane.b32.xlu0 %v3688_v1, %s2464_s23  ;;  %2097 = vrot.lane.b32.xlu1 %v3703_v14, %s2463_s22 }
 0xbb3   : > { %2115 = vrot.lane.b32.xlu0 %v3696_v12, %s2464_s23  ;;  %2113 = vrot.lane.b32.xlu1 %v3693_v20, %s2464_s23 }
 0xbb7   : > { %2127 = vrot.lane.b32.xlu0 %v3688_v1, %s2465_s24  ;;  %2117 = vrot.lane.b32.xlu1 %v3703_v14, %s2464_s23 }
 0xbbb   : > { %2131 = vrot.lane.b32.xlu0 %v3696_v12, %s2465_s24  ;;  %2129 = vrot.lane.b32.xlu1 %v3693_v20, %s2465_s24 }
 0xbbf   : > { %2143 = vrot.lane.b32.xlu0 %v3688_v1, %s2466_s25  ;;  %2133 = vrot.lane.b32.xlu1 %v3703_v14, %s2465_s24 }
 0xbc3   : > { %2147 = vrot.lane.b32.xlu0 %v3696_v12, %s2466_s25  ;;  %2145 = vrot.lane.b32.xlu1 %v3693_v20, %s2466_s25 }
 0xbc7   : > { %2159 = vrot.lane.b32.xlu0 %v3688_v1, %s2468_s26  ;;  %2149 = vrot.lane.b32.xlu1 %v3703_v14, %s2466_s25  ;;  %s359_s25 = scalar_lea.vmem %s3897_s10, %s2415_s15 }
 0xbcb   : > { %2163 = vrot.lane.b32.xlu0 %v3696_v12, %s2468_s26  ;;  %2161 = vrot.lane.b32.xlu1 %v3693_v20, %s2468_s26 }
 0xbcf   : > { %2197 = vperm.xlu0 %2434, %v2042_v22   ;;  %2165 = vrot.lane.b32.xlu1 %v3703_v14, %s2468_s26 }
 0xc01   : > { %v2044_v36 = vpop.permute.xlu1 %2043 }
 0xc05   : > { %v2048_v21 = vpop.permute.xlu0 %2047  ;;  %v2046_v27 = vpop.permute.xlu1 %2045 }
 0xc06   : > { %v2053_v33 = vsel %vm394_vm0, %v2044_v36, %v2046_v27  ;;  %v2052_v17 = vsel %vm394_vm0, %v2046_v27, %v2048_v21 }
 0xc07   : > { %v2056_v23 = vmul.f32 %v2053_v33, %v2638_v19 }
 0xc09   : > { %v2060_v34 = vpop.permute.xlu0 %2059  ;;  %v2050_v4 = vpop.permute.xlu1 %2049 }
 0xc0a   : > { %v2051_v16 = vsel %vm394_vm0, %v2048_v21, %v2050_v4  ;;  %v2054_v5 = vsel %vm394_vm0, %v2050_v4, %v2044_v36  ;;  %v2057_v21 = vmul.f32 %v2052_v17, %v2662_v30 }
 0xc0b   : > { %v2055_v35 = vmul.f32 %v2054_v5, %v2646_v24  ;;  %v2058_v7 = vmul.f32 %v2051_v16, %v2652_v26 }
 0xc0d   : > { %v2064_v46 = vpop.permute.xlu0 %2063  ;;  %v2062_v28 = vpop.permute.xlu1 %2061 }
 0xc0e   : > { %v2069_v2 = vsel %vm432_vm1, %v2060_v34, %v2062_v28  ;;  %v2068_v31 = vsel %vm432_vm1, %v2062_v28, %v2064_v46 }
 0xc0f   : > { %v2072_v0 = vmul.f32 %v2069_v2, %v3917_v13  ;;  %v2073_v40 = vmul.f32 %v2068_v31, %v3918_v48 }
 0xc11   : > { %v2076_v11 = vpop.permute.xlu0 %2075  ;;  %v2066_v32 = vpop.permute.xlu1 %2065  ;;  %v2176_v18 = vpack.c.bf16 %v2072_v0, %v2056_v23  ;;  %v2177_v2 = vpack.c.bf16 %v2073_v40, %v2057_v21  ;;  %v2107_v21 = vmul.f32 %v3688_v1, %v2755_v44 }
 0xc12   : > { %v2067_v19 = vsel %vm432_vm1, %v2064_v46, %v2066_v32  ;;  %v2070_v41 = vsel %vm432_vm1, %v2066_v32, %v2060_v34 }
 0xc13   : > { %v2071_v22 = vmul.f32 %v2070_v41, %v2649_v25  ;;  %v2074_v36 = vmul.f32 %v2067_v19, %v2659_v29  ;;  %2215 = vmatprep.subr.bf16.mxu0 %v2176_v18 }
 0xc15   : > { %v2175_v27 = vpack.c.bf16 %v2071_v22, %v2055_v35  ;;  %v2080_v4 = vpop.permute.xlu0 %2079  ;;  %v2078_v33 = vpop.permute.xlu1 %2077  ;;  %v2178_v28 = vpack.c.bf16 %v2074_v36, %v2058_v7 }
 0xc16   : > { %v2085_v24 = vsel %vm470_vm2, %v2076_v11, %v2078_v33  ;;  %v2084_v16 = vsel %vm470_vm2, %v2078_v33, %v2080_v4 }
 0xc17   : > { %2216 = vmatpush1.bf16.msra.mxu0 %v2175_v27  ;;  %2256 = vmatprep.subr.bf16.mxu1 %v2178_v28  ;;  %v2088_v30 = vmul.f32 %v2085_v24, %v2694_v57  ;;  %v2089_v41 = vmul.f32 %v2084_v16, %v2705_v61  ;;  %v2108_v61 = vmul.f32 %v3693_v20, %v2749_v42 }
 0xc18   : > { %2257 = vmatpush1.bf16.msra.mxu1 %v2177_v2  ;;  %v2110_v42 = vmul.f32 %v3703_v14, %v2752_v43 }
 0xc19   : > { %v2092_v34 = vpop.permute.xlu0 %2091  ;;  %v2082_v46 = vpop.permute.xlu1 %2081 }
 0xc1a   : > { %v2083_v13 = vsel %vm470_vm2, %v2080_v4, %v2082_v46  ;;  %v2086_v0 = vsel %vm470_vm2, %v2082_v46, %v2076_v11 }
 0xc1b   : > { %v2087_v48 = vmul.f32 %v2086_v0, %v2702_v60  ;;  %v2090_v40 = vmul.f32 %v2083_v13, %v2708_v62 }
 0xc1d   : > { %v2096_v26 = vpop.permute.xlu0 %2095  ;;  %v2094_v25 = vpop.permute.xlu1 %2093 }
 0xc1e   : > { %v2101_v29 = vsel %vm508_vm3, %v2092_v34, %v2094_v25  ;;  %v2100_v23 = vsel %vm508_vm3, %v2094_v25, %v2096_v26 }
 0xc1f   : > { %v2104_v31 = vmul.f32 %v2101_v29, %v2697_v58  ;;  %v2105_v18 = vmul.f32 %v2100_v23, %v2718_v9 }
 0xc21   : > { %v2112_v5 = vpop.permute.xlu0 %2111  ;;  %v2098_v17 = vpop.permute.xlu1 %2097  ;;  %v2180_v32 = vpack.c.bf16 %v2104_v31, %v2088_v30  ;;  %v2181_v36 = vpack.c.bf16 %v2105_v18, %v2089_v41 }
 0xc22   : > { %v2099_v57 = vsel %vm508_vm3, %v2096_v26, %v2098_v17  ;;  %v2102_v58 = vsel %vm508_vm3, %v2098_v17, %v2092_v34 }
 0xc23   : > { %v2103_v11 = vmul.f32 %v2102_v58, %v2715_v8  ;;  %v2106_v19 = vmul.f32 %v2099_v57, %v2725_v15  ;;  %2217 = vmatprep.subr.bf16.mxu0 %v2180_v32 }
 0xc25   : > { %v2179_v35 = vpack.c.bf16 %v2103_v11, %v2087_v48  ;;  %v2116_v7 = vpop.permute.xlu0 %2115  ;;  %v2114_v9 = vpop.permute.xlu1 %2113  ;;  %v2182_v22 = vpack.c.bf16 %v2106_v19, %v2090_v40 }
 0xc26   : > { %v2120_v60 = vsel %vm571_vm4, %v2114_v9, %v2116_v7  ;;  %v2121_v62 = vsel %vm571_vm4, %v2112_v5, %v2114_v9 }
 0xc27   : > { %v2123_v8 = vmul.f32 %v2121_v62, %v2761_v51  ;;  %v2124_v15 = vmul.f32 %v2120_v60, %v2769_v54  ;;  %2218 = vmatpush1.bf16.msra.mxu0 %v2179_v35  ;;  %2258 = vmatprep.subr.bf16.mxu1 %v2182_v22  ;;  %v2109_v51 = vmul.f32 %v3696_v12, %v2758_v50 }
 0xc28   : > { %2259 = vmatpush1.bf16.msra.mxu1 %v2181_v36 }
 0xc29   : > { %v2183_v27 = vpack.c.bf16 %v2123_v8, %v2107_v21  ;;  %v2128_v4 = vpop.permute.xlu0 %2127  ;;  %v2118_v33 = vpop.permute.xlu1 %2117  ;;  %v2184_v44 = vpack.c.bf16 %v2124_v15, %v2108_v61 }
 0xc2a   : > { %v2119_v1 = vsel %vm571_vm4, %v2116_v7, %v2118_v33  ;;  %v2122_v28 = vsel %vm571_vm4, %v2118_v33, %v2112_v5 }
 0xc2b   : > { %v2125_v54 = vmul.f32 %v2119_v1, %v2772_v55  ;;  %v2126_v2 = vmul.f32 %v2122_v28, %v2764_v52  ;;  %2219 = vmatprep.subr.bf16.mxu0 %v2184_v44 }
 0xc2c   : > { %2220 = vmatpush1.bf16.msra.mxu0 %v2183_v27 }
 0xc2d   : > { %v2185_v20 = vpack.c.bf16 %v2125_v54, %v2109_v51  ;;  %v2132_v34 = vpop.permute.xlu0 %2131  ;;  %v2130_v46 = vpop.permute.xlu1 %2129  ;;  %v2186_v24 = vpack.c.bf16 %v2126_v2, %v2110_v42 }
 0xc2e   : > { %v2136_v50 = vsel %vm609_vm6, %v2130_v46, %v2132_v34  ;;  %v2137_v55 = vsel %vm609_vm6, %v2128_v4, %v2130_v46 }
 0xc2f   : > { %2260 = vmatprep.subr.bf16.mxu1 %v2186_v24  ;;  %v2139_v29 = vmul.f32 %v2137_v55, %v2832_v63  ;;  %v2140_v30 = vmul.f32 %v2136_v50, %v2804_v38 }
 0xc30   : > { %2261 = vmatpush1.bf16.msra.mxu1 %v2185_v20 }
 0xc31   : > { %v2144_v26 = vpop.permute.xlu0 %2143  ;;  %v2134_v25 = vpop.permute.xlu1 %2133 }
 0xc32   : > { %v2135_v13 = vsel %vm609_vm6, %v2132_v34, %v2134_v25  ;;  %v2138_v0 = vsel %vm609_vm6, %v2134_v25, %v2128_v4 }
 0xc35   : > { %v2148_v52 = vpop.permute.xlu0 %2147  ;;  %v2146_v12 = vpop.permute.xlu1 %2145 }
 0xc36   : > { %v2152_v43 = vsel %vm647_vm5, %v2146_v12, %v2148_v52  ;;  %v2153_v14 = vsel %vm647_vm5, %v2144_v26, %v2146_v12 }
 0xc37   : > { %v2155_v23 = vmul.f32 %v2153_v14, %v2814_v47  ;;  %v2156_v31 = vmul.f32 %v2152_v43, %v2825_v56  ;;  %v2141_v47 = vmul.f32 %v2135_v13, %v2809_v45  ;;  %v2142_v56 = vmul.f32 %v2138_v0, %v2801_v37 }
 0xc39   : > { %v2187_v16 = vpack.c.bf16 %v2155_v23, %v2139_v29  ;;  %v2160_v5 = vpop.permute.xlu0 %2159  ;;  %v2150_v17 = vpop.permute.xlu1 %2149  ;;  %v2188_v32 = vpack.c.bf16 %v2156_v31, %v2140_v30 }
 0xc3a   : > { %v2151_v18 = vsel %vm647_vm5, %v2148_v52, %v2150_v17  ;;  %v2154_v38 = vsel %vm647_vm5, %v2150_v17, %v2144_v26 }
 0xc3b   : > { %v2157_v63 = vmul.f32 %v2151_v18, %v2828_v59  ;;  %v2158_v57 = vmul.f32 %v2154_v38, %v2822_v53  ;;  %2221 = vmatprep.subr.bf16.mxu0 %v2188_v32 }
 0xc3c   : > { %2222 = vmatpush1.bf16.msra.mxu0 %v2187_v16 }
 0xc3d   : > { %v2189_v58 = vpack.c.bf16 %v2157_v63, %v2141_v47  ;;  %v2164_v48 = vpop.permute.xlu0 %2163  ;;  %v2162_v40 = vpop.permute.xlu1 %2161  ;;  %v2190_v11 = vpack.c.bf16 %v2158_v57, %v2142_v56 }
 0xc3e   : > { %v2168_v19 = vsel %vm685_vm7, %v2162_v40, %v2164_v48  ;;  %v2169_v41 = vsel %vm685_vm7, %v2160_v5, %v2162_v40 }
 0xc3f   : > { %v2171_v45 = vmul.f32 %v2169_v41, %v2841_v3  ;;  %v2172_v37 = vmul.f32 %v2168_v19, %v2861_v49  ;;  %2262 = vmatprep.subr.bf16.mxu1 %v2190_v11  ;;  %v2041_v49 = vld [vmem:[%s3895_s8] sm:$0xf] }
 0xc40   : > { %2263 = vmatpush1.bf16.msra.mxu1 %v2189_v58 }
 0xc41   : > { %v2191_v59 = vpack.c.bf16 %v2171_v45, %v2171_v45  ;;  %v2192_v53 = vpack.c.bf16 %v2172_v37, %v2172_v37  ;;  %v2166_v35 = vpop.permute.xlu1 %2165 }
 0xc42   : > { %v2167_v7 = vsel %vm685_vm7, %v2164_v48, %v2166_v35  ;;  %v2170_v9 = vsel %vm685_vm7, %v2166_v35, %v2160_v5 }
 0xc43   : > { %v2173_v22 = vmul.f32 %v2167_v7, %v2865_v6  ;;  %v2174_v36 = vmul.f32 %v2170_v9, %v2858_v39  ;;  %2409 = vmatprep.subr.msk.bf16.mxu0 %vm744_vm8, %v2192_v53  ;;  %v2204_v3 = vsel %vm744_vm8, %v2191_v59, 0 }
 0xc44   : > { %2224 = vmatpush1.bf16.msra.mxu0 %v2204_v3 }
 0xc45   : > { %v2193_v21 = vpack.c.bf16 %v2173_v22, %v2173_v22  ;;  %v2194_v60 = vpack.c.bf16 %v2174_v36, %v2174_v36 }
 0xc47   : > { %2410 = vmatmul.mubr.msk.bf16.vlgmr.msra.gmra.mrb[20].mxu0 %vm740_vm9, %v2041_v49  ;;  %2411 = vmatprep.subr.msk.bf16.mxu1 %vm744_vm8, %v2194_v60  ;;  %v2210_v10 = vsel %vm744_vm8, %v2193_v21, 0 }
 0xc48   : > { %2265 = vmatpush1.bf16.msra.mxu1 %v2210_v10 }
 0xc4b   : > { %2412 = vmatmul.mubr.msk.bf16.vlgmr.msra.gmra.mrb[20].mxu1 %vm740_vm9, %v2041_v49 }
 0xc4e   : > { %v2198_v39 = vpop.permute.xlu0 %2197 }
 0xd1a   : > { %v2249_v6 = vpop.f32.mrb[20].mxu0 }
 0xd1b   : > { %v2250_v62 = vadd.f32 %v2249_v6, %v2198_v39  ;;  %v2251_v8 = vpop.f32.mrb[21].mxu0 }
 0xd1c   : > { %v2252_v15 = vadd.f32 %v2251_v8, %v2198_v39  ;;  %v2253_v61 = vpop.f32.mrb[22].mxu0 }
 0xd1d   : > { %2297 = vst [vmem:[%s359_s25] sm:$0xff] %v2250_v62  ;;  %v2254_v27 = vpop.f32.mrb[23].mxu0 }
 0xd1e   : > { %2298 = vst [vmem:[%s359_s25 + $0x8] sm:$0xff] %v2252_v15  ;;  %v2290_v4 = vpop.f32.mrb[20].mxu1 }
 0xd1f   : > { %v2291_v33 = vadd.f32 %v2290_v4, %v2198_v39  ;;  %v2292_v44 = vpop.f32.mrb[21].mxu1 }
 0xd20   : > { %v2293_v1 = vadd.f32 %v2292_v44, %v2198_v39  ;;  %v2294_v28 = vpop.f32.mrb[22].mxu1 }
 0xd21   : > { %2299 = vst [vmem:[%s359_s25 + $0x10] sm:$0xff] %v2291_v33  ;;  %v2295_v51 = vpop.f32.mrb[23].mxu1 }
 0xd22   : > { %2300 = vst [vmem:[%s359_s25 + $0x18] sm:$0xff] %v2293_v1 }
 0xd23 PF: > { %s20_s13 = sadd.s32 1, %s2458_s13  }
 0xd24   : > { %p17_p4 = scmp.ge.s32.totalorder %s20_s13, 4  }
 0xd26   :  { %19 = sbr.rel (!%p17_p4) target bundleno = 1 (0x1), region = 110 }

</bundles_post_ra>
